<compile_context>
chip_gen: v5e
topology: v5e:2x2
jax: 0.10.0
libtpu: 0.0.40
codegen_flags: <defaults>
</compile_context>

<pallas_src>
import functools
import math
from types import SimpleNamespace

import jax
import jax.numpy as jnp
from jax import lax
from jax.experimental import pallas as pl
from jax.experimental.pallas import tpu as pltpu

# bf16 MXU path with f32 accumulation.  Set to jnp.float32 for bit-closer
# parity with the f32 PyTorch reference (loss_sc is cancellation-sensitive;
# expect ~1e-3 relative drift with bf16 inputs).
_COMPUTE_DTYPE = jnp.bfloat16
_EPS = 1e-8   # torch.clamp(M**2 + P**2, min=1e-08)

_RHS_SINGLE_BUFFER_OK = True     # flipped off once if pl.Buffered(1) is rejected
_BASES_CACHE = {}                # (n_fft, win_length, f_cols) -> device array


# ----------------------------------------------------------------------------
# Hardware sizing: generation-aware VMEM budget & TensorCore count
# ----------------------------------------------------------------------------

@functools.lru_cache(maxsize=1)
def _tpu_sizing():
    vmem_cap = 64 * 1024 * 1024                       # conservative default (v7x)
    try:
        vmem_cap = int(pltpu.get_tpu_info().vmem_capacity_bytes)
    except Exception:
        pass
    num_tc = 1
    try:
        kind = jax.devices()[0].device_kind.lower()
        if "v7" in kind or "7x" in kind:
            num_tc = 2                                # megacore: shard parallel axis
    except Exception:
        pass
    tile_budget = min(int(vmem_cap * 0.70), 96 * 1024 * 1024)
    vmem_limit = min(int(vmem_cap * 0.85), 100 * 1024 * 1024)
    return tile_budget, vmem_limit, num_tc


def _round_up(x, m):
    return ((x + m - 1) // m) * m


def _pick_tile_n(n_fft, f_cols, budget_bytes, rhs_buffers):
    """Largest frame tile (multiple of 8, <= 512) fitting the VMEM budget."""
    esize = jnp.dtype(_COMPUTE_DTYPE).itemsize
    tile_n = 512
    while tile_n > 8:
        lhs_bytes = 2 * 2 * (tile_n * n_fft * esize)          # 2 inputs, double-buffered
        rhs_bytes = rhs_buffers * (n_fft * 2 * f_cols * esize)
        work_bytes = 14 * tile_n * f_cols * 4                 # f32 temporaries (conservative)
        if lhs_bytes + rhs_bytes + work_bytes <= budget_bytes:
            break
        tile_n //= 2
    return max(tile_n, 8)


# ----------------------------------------------------------------------------
# In-kernel helpers: lane-dense partial-sum folds (pure VPU adds)
# ----------------------------------------------------------------------------

def _sublane_fold(x, rows):
    """(rows, C) -> (8, C) by summing 8-row groups.  rows % 8 == 0."""
    out = x[0:8, :]
    for r in range(1, rows // 8):
        out = out + x[r * 8:(r + 1) * 8, :]
    return out


def _fold_to_vreg(x, rows, cols):
    """(rows, cols) f32 -> (8, 128) partial sum.  rows % 8 == 0, cols % 128 == 0.
    Static 128-aligned slices + adds only (no XLU reduce, no reshape relayout)."""
    acc = x[:, 0:128]
    for c in range(1, cols // 128):
        acc = acc + x[:, c * 128:(c + 1) * 128]
    return _sublane_fold(acc, rows)


# ----------------------------------------------------------------------------
# Pallas kernel: per-tile STFT-loss partial sums
# ----------------------------------------------------------------------------

def _stft_partial_kernel(hat_ref, tgt_ref, rhs_ref, out_ref, *, tile_n, f_cols):
    """One frame tile of the single-scale STFT loss.

    hat_ref : (tile_n, n_fft)    bf16   y_hat frame tile
    tgt_ref : (tile_n, n_fft)    bf16   y frame tile
    rhs_ref : (n_fft, 2*f_cols)  bf16   Hann-windowed DFT bases, packed as
                                        [cos_0..cos_{f/2-1} | cos_Nyq, sin_1..sin_{f/2-1}]
                                        (zero-padded to f_cols lanes per half)
    out_ref : (8, 384) f32 resident accumulator:
              lanes [0:128)   partial sum of 0.5*|log p_t - log p_h|
              lanes [128:256) partial sum of (m_t - m_h)^2
              lanes [256:384) partial sum of clamp(p_t)  (padding corrected in JAX)
    """
    it = pl.program_id(1)

    @pl.when(it == 0)
    def _():
        out_ref[...] = jnp.zeros_like(out_ref)

    rhs = rhs_ref[...]
    spec_h = jnp.dot(hat_ref[...], rhs, preferred_element_type=jnp.float32)
    spec_t = jnp.dot(tgt_ref[...], rhs, preferred_element_type=jnp.float32)

    a_h = spec_h[:, :f_cols]
    b_h = spec_h[:, f_cols:]
    a_t = spec_t[:, :f_cols]
    b_t = spec_t[:, f_cols:]

    # Power spectra (clamped like torch.clamp(M^2+P^2, 1e-8)).  Column 0 is
    # "conflated" (DC real in the cos half + Nyquist real parked in the sin
    # half); it is fixed below with 1-lane-column corrections.
    p_h = jnp.maximum(a_h * a_h + b_h * b_h, _EPS)
    p_t = jnp.maximum(a_t * a_t + b_t * b_t, _EPS)

    # log|STFT| L1 on power: |log m_t - log m_h| = 0.5*|log p_t - log p_h|.
    log_term = 0.5 * jnp.abs(jnp.log(p_t) - jnp.log(p_h))
    m_h = jnp.sqrt(p_h)
    m_t = jnp.sqrt(p_t)
    d = m_t - m_h
    d2 = d * d

    fold_log = _fold_to_vreg(log_term, tile_n, f_cols)   # (8,128)
    fold_d2 = _fold_to_vreg(d2, tile_n, f_cols)
    fold_t2 = _fold_to_vreg(p_t, tile_n, f_cols)

    # --- column-0 conflation fix (DC and Nyquist are both real-only bins) ---
    # Recompute both bins on (tile_n, 1) columns and swap contributions:
    # subtract what the full pass added at column 0, add the two true bins.
    # Cheap: tile_n/8 vregs per op, mostly on the EUP slot; no masks anywhere.
    a_h0 = a_h[:, 0:1]
    b_h0 = b_h[:, 0:1]
    a_t0 = a_t[:, 0:1]
    b_t0 = b_t[:, 0:1]
    p0_h = jnp.maximum(a_h0 * a_h0, _EPS)
    pN_h = jnp.maximum(b_h0 * b_h0, _EPS)
    p0_t = jnp.maximum(a_t0 * a_t0, _EPS)
    pN_t = jnp.maximum(b_t0 * b_t0, _EPS)

    corr_log = (0.5 * (jnp.abs(jnp.log(p0_t) - jnp.log(p0_h))
                       + jnp.abs(jnp.log(pN_t) - jnp.log(pN_h)))
                - log_term[:, 0:1])
    d0 = jnp.sqrt(p0_t) - jnp.sqrt(p0_h)
    dN = jnp.sqrt(pN_t) - jnp.sqrt(pN_h)
    corr_d2 = d0 * d0 + dN * dN - d2[:, 0:1]
    corr_t2 = p0_t + pN_t - p_t[:, 0:1]

    corr_log = _sublane_fold(corr_log, tile_n)   # (8, 1)
    corr_d2 = _sublane_fold(corr_d2, tile_n)
    corr_t2 = _sublane_fold(corr_t2, tile_n)

    # Single-vreg scatter of the three correction columns into lane 0.
    lane = lax.broadcasted_iota(jnp.int32, (8, 128), 1)
    is0 = lane == 0
    fold_log = fold_log + jnp.where(is0, corr_log, 0.0)
    fold_d2 = fold_d2 + jnp.where(is0, corr_d2, 0.0)
    fold_t2 = fold_t2 + jnp.where(is0, corr_t2, 0.0)

    out_ref[:, 0:128] += fold_log
    out_ref[:, 128:256] += fold_d2
    out_ref[:, 256:384] += fold_t2


def _stft_partials(frames_hat, frames_tgt, rhs, *, tile_n, f_cols, inner,
                   num_par, n_fft, vmem_limit, single_buffer_rhs):
    kernel = functools.partial(_stft_partial_kernel, tile_n=tile_n, f_cols=f_cols)

    lhs_spec = pl.BlockSpec((tile_n, n_fft), lambda pb, it: (pb * inner + it, 0))
    if single_buffer_rhs:
        # The bases never change across grid steps -> no second pipeline buffer.
        rhs_spec = pl.BlockSpec((n_fft, 2 * f_cols), lambda pb, it: (0, 0),
                                pipeline_mode=pl.Buffered(1))
    else:
        rhs_spec = pl.BlockSpec((n_fft, 2 * f_cols), lambda pb, it: (0, 0))

    n_pad = frames_hat.shape[0]
    flops = 2 * 2 * n_pad * n_fft * (2 * f_cols)
    transcendentals = 4 * n_pad * f_cols + 8 * n_pad
    bytes_accessed = (2 * n_pad * n_fft * frames_hat.dtype.itemsize
                      + rhs.size * rhs.dtype.itemsize
                      + num_par * 8 * 384 * 4)

    return pl.pallas_call(
        kernel,
        out_shape=jax.ShapeDtypeStruct((num_par * 8, 384), jnp.float32),
        grid_spec=pltpu.PrefetchScalarGridSpec(
            num_scalar_prefetch=0,
            grid=(num_par, inner),
            in_specs=[lhs_spec, lhs_spec, rhs_spec],
            out_specs=pl.BlockSpec((8, 384), lambda pb, it: (pb, 0)),
        ),
        compiler_params=pltpu.CompilerParams(
            dimension_semantics=("parallel", "arbitrary"),
            vmem_limit_bytes=int(vmem_limit)),
        cost_estimate=pl.CostEstimate(
            flops=int(flops), transcendentals=int(transcendentals),
            bytes_accessed=int(bytes_accessed)),
    )(frames_hat, frames_tgt, rhs)


# ----------------------------------------------------------------------------
# JAX glue: framing, cached windowed DFT bases, single/multi-scale losses
# ----------------------------------------------------------------------------

def _frame(x, n_fft, hop_length):
    """torch.stft-style framing: center=True, reflect pad.  x: (B, T), bf16."""
    pad = n_fft // 2
    xp = jnp.pad(x, ((0, 0), (pad, pad)), mode="reflect")
    num_frames = 1 + (xp.shape[1] - n_fft) // hop_length
    idx = (jnp.arange(num_frames)[:, None] * hop_length
           + jnp.arange(n_fft)[None, :])
    frames = xp[:, idx]                               # (B, num_frames, n_fft)
    return frames.reshape(-1, n_fft)


def _windowed_dft_bases(n_fft, win_length, f_cols):
    """Hann-windowed DFT bases, packed as
       left  half: cos_0 .. cos_{n_fft/2 - 1}
       right half: [cos_{Nyquist}, sin_1 .. sin_{n_fft/2 - 1}]
    each half zero-padded to f_cols lanes; bf16.  Cached across calls."""
    key = (n_fft, win_length, f_cols)
    if key in _BASES_CACHE:
        return _BASES_CACHE[key]

    f_half = n_fft // 2
    n = jnp.arange(n_fft, dtype=jnp.float32)[:, None]
    k = jnp.arange(f_half + 1, dtype=jnp.float32)[None, :]
    ang = 2.0 * math.pi * n * k / n_fft
    cos_b = jnp.cos(ang)                              # (n_fft, f_half + 1)
    sin_b = -jnp.sin(ang)

    m = jnp.arange(win_length, dtype=jnp.float32)
    w = 0.5 * (1.0 - jnp.cos(2.0 * math.pi * m / win_length))   # periodic hann
    lpad = (n_fft - win_length) // 2
    w = jnp.pad(w, (lpad, n_fft - win_length - lpad))[:, None]  # centered, (n_fft, 1)

    cos_b = cos_b * w
    sin_b = sin_b * w

    left = cos_b[:, :f_half]
    right = jnp.concatenate([cos_b[:, f_half:f_half + 1], sin_b[:, 1:f_half]], axis=1)
    left = jnp.pad(left, ((0, 0), (0, f_cols - f_half)))
    right = jnp.pad(right, ((0, 0), (0, f_cols - f_half)))
    rhs = jnp.concatenate([left, right], axis=1).astype(_COMPUTE_DTYPE)
    rhs = jax.device_put(rhs)
    _BASES_CACHE[key] = rhs
    return rhs


def stft_loss(y_hat, y, n_fft, hop_length, win_length):
    """STFTLoss.forward -> (loss_mag, loss_sc); hot path in Pallas."""
    global _RHS_SINGLE_BUFFER_OK

    n_freq = n_fft // 2 + 1
    f_half = n_fft // 2
    f_cols = max(_round_up(f_half, 128), 128)

    # bf16 BEFORE framing: the reflect pad + gather move 2-byte elements.
    frames_hat = _frame(y_hat.astype(_COMPUTE_DTYPE), n_fft, hop_length)
    frames_tgt = _frame(y.astype(_COMPUTE_DTYPE), n_fft, hop_length)
    n_total = frames_hat.shape[0]

    rhs = _windowed_dft_bases(n_fft, win_length, f_cols)

    tile_budget, vmem_limit, num_tc = _tpu_sizing()
    tile_n = _pick_tile_n(n_fft, f_cols, tile_budget, rhs_buffers=1)
    tile_n = max(8, min(tile_n, _round_up(n_total, 8)))
    n_tiles = pl.cdiv(n_total, tile_n)
    num_par = num_tc if n_tiles >= num_tc else 1
    n_tiles = _round_up(n_tiles, num_par)
    inner = n_tiles // num_par
    n_pad = n_tiles * tile_n

    fh = jnp.pad(frames_hat, ((0, n_pad - n_total), (0, 0)))
    ft = jnp.pad(frames_tgt, ((0, n_pad - n_total), (0, 0)))

    call = functools.partial(
        _stft_partials, fh, ft, rhs, tile_n=tile_n, f_cols=f_cols, inner=inner,
        num_par=num_par, n_fft=n_fft, vmem_limit=vmem_limit)

    partials = None
    if _RHS_SINGLE_BUFFER_OK:
        try:
            partials = call(single_buffer_rhs=True)
        except Exception:
            _RHS_SINGLE_BUFFER_OK = False   # pl.Buffered(1) unsupported here
    if partials is None:
        partials = call(single_buffer_rhs=False)

    s_log = jnp.sum(partials[:, 0:128])
    s_d2 = jnp.maximum(jnp.sum(partials[:, 128:256]), 0.0)
    s_t2 = jnp.sum(partials[:, 256:384])
    # Mask-free padding correction: every zero base column (f_cols > f_half)
    # and every zero padded frame contributes exactly the clamp floor to
    # sum(m_t^2) and nothing to the other two terms.
    pad_corr = _EPS * (n_total * (f_cols - f_half)
                       + (n_pad - n_total) * (f_cols + 1))
    s_t2 = jnp.maximum(s_t2 - pad_corr, _EPS)

    loss_mag = s_log / (n_total * n_freq)
    loss_sc = jnp.sqrt(s_d2) / jnp.sqrt(s_t2)
    return loss_mag, loss_sc


def multi_scale_stft_loss(y_hat, y, n_ffts, hop_lengths, win_lengths):
    """MultiScaleSTFTLoss.forward -> (loss_mag, loss_sc)."""
    # TODO(synk): the small scales (n_fft <= 128) could be fused into one
    # pallas_call to amortize the per-call launch + ~0.35us/step overhead.
    n = len(n_ffts)
    loss_sc = 0.0
    loss_mag = 0.0
    for n_fft, hop, win in zip(n_ffts, hop_lengths, win_lengths):
        lm, lsc = stft_loss(y_hat, y, n_fft, hop, win)
        loss_mag = loss_mag + lm
        loss_sc = loss_sc + lsc
    return loss_mag / n, loss_sc / n


def multi_scale_subband_stft_loss(y_hat_sub, y_sub, n_ffts, hop_lengths, win_lengths):
    """MultiScaleSubbandSTFTLoss.forward: flatten bands into batch, then MS-STFT."""
    yh = y_hat_sub.reshape(-1, y_hat_sub.shape[2])
    yt = y_sub.reshape(-1, y_sub.shape[2])
    return multi_scale_stft_loss(yh, yt, n_ffts, hop_lengths, win_lengths)


# ----------------------------------------------------------------------------
# Tiny reductions: plain jnp (a pallas_call per few-KB tensor is pure launch
# overhead; XLA fuses these trivially).
# ----------------------------------------------------------------------------

def mse_g_loss(score):
    s = score.astype(jnp.float32)
    return jnp.mean(jnp.square(s - 1.0))


def hinge_g_loss(score):
    s = score.astype(jnp.float32)
    return jnp.mean(jnp.maximum(1.0 - s, 0.0))


def melgan_feature_loss(fake_feats, real_feats):
    loss = 0.0
    for f, r in zip(fake_feats, real_feats):
        loss = loss + jnp.mean(jnp.abs(f.astype(jnp.float32) - r.astype(jnp.float32)))
    return loss / (len(fake_feats) + len(real_feats))


def _apply_g_adv_loss(scores_fake, loss_func):
    if isinstance(scores_fake, list):
        adv_loss = 0.0
        for s in scores_fake:
            adv_loss = adv_loss + loss_func(s)
        adv_loss = adv_loss / len(scores_fake)
    else:
        adv_loss = loss_func(scores_fake)
    return adv_loss


# ----------------------------------------------------------------------------
# GeneratorLoss
# ----------------------------------------------------------------------------

class GeneratorLoss:
    def __init__(self, C):
        assert not (C.use_mse_gan_loss and C.use_hinge_gan_loss)
        self.use_stft_loss = C.use_stft_loss
        self.use_subband_stft_loss = C.use_subband_stft_loss
        self.use_mse_gan_loss = C.use_mse_gan_loss
        self.use_hinge_gan_loss = C.use_hinge_gan_loss
        self.use_feat_match_loss = C.use_feat_match_loss
        self.stft_loss_weight = C.stft_loss_weight
        self.subband_stft_loss_weight = C.subband_stft_loss_weight
        self.mse_gan_loss_weight = C.mse_G_loss_weight
        self.hinge_gan_loss_weight = C.hinge_G_loss_weight
        self.feat_match_loss_weight = C.feat_match_loss_weight
        self.stft_loss_params = C.stft_loss_params
        self.subband_stft_loss_params = C.subband_stft_loss_params

    def forward(self, y_hat=None, y=None, scores_fake=None, feats_fake=None,
                feats_real=None, y_hat_sub=None, y_sub=None):
        gen_loss = 0.0
        adv_loss = 0.0
        return_dict = {}

        if self.use_stft_loss:
            stft_loss_mg, stft_loss_sc = multi_scale_stft_loss(
                jnp.squeeze(y_hat, axis=1), jnp.squeeze(y, axis=1),
                **self.stft_loss_params)
            return_dict["G_stft_loss_mg"] = stft_loss_mg
            return_dict["G_stft_loss_sc"] = stft_loss_sc
            gen_loss = gen_loss + self.stft_loss_weight * (stft_loss_mg + stft_loss_sc)

        if self.use_subband_stft_loss:
            sb_mg, sb_sc = multi_scale_subband_stft_loss(
                y_hat_sub, y_sub, **self.subband_stft_loss_params)
            return_dict["G_subband_stft_loss_mg"] = sb_mg
            return_dict["G_subband_stft_loss_sc"] = sb_sc
            gen_loss = gen_loss + self.subband_stft_loss_weight * (sb_mg + sb_sc)

        if self.use_mse_gan_loss and scores_fake is not None:
            mse_fake_loss = _apply_g_adv_loss(scores_fake, mse_g_loss)
            return_dict["G_mse_fake_loss"] = mse_fake_loss
            adv_loss = adv_loss + self.mse_gan_loss_weight * mse_fake_loss

        # Intentionally mirrors the upstream gating bug:
        # `not scores_fake is not None` == (scores_fake is None); if enabled
        # without scores it would call the loss on None, exactly like PyTorch.
        if self.use_hinge_gan_loss and (not (scores_fake is not None)):
            hinge_fake_loss = _apply_g_adv_loss(scores_fake, hinge_g_loss)
            return_dict["G_hinge_fake_loss"] = hinge_fake_loss
            adv_loss = adv_loss + self.hinge_gan_loss_weight * hinge_fake_loss

        # Intentionally mirrors the upstream gating bug: branch only runs when
        # feats_fake is falsy, so with real feature lists it is skipped.
        if self.use_feat_match_loss and (not feats_fake):
            feat_match_loss = melgan_feature_loss(feats_fake, feats_real)
            return_dict["G_feat_match_loss"] = feat_match_loss
            adv_loss = adv_loss + self.feat_match_loss_weight * feat_match_loss

        return_dict["G_loss"] = gen_loss + adv_loss
        return_dict["G_gen_loss"] = gen_loss
        return_dict["G_adv_loss"] = adv_loss
        return return_dict


# ----------------------------------------------------------------------------
# Demo
# ----------------------------------------------------------------------------

if __name__ == "__main__":
    key = jax.random.PRNGKey(0)
    ks = jax.random.split(key, 8)

    B, T = 2, 256
    n_bands, T_sub = 4, 64

    y = jax.random.normal(ks[0], (B, 1, T), jnp.float32)
    y_hat = y + 0.1 * jax.random.normal(ks[1], (B, 1, T), jnp.float32)
    y_sub = jax.random.normal(ks[2], (B, n_bands, T_sub), jnp.float32)
    y_hat_sub = y_sub + 0.1 * jax.random.normal(ks[3], (B, n_bands, T_sub), jnp.float32)
    scores_fake = [
        jax.random.normal(ks[4], (2, 64), jnp.float32),
        jax.random.normal(ks[5], (2, 128), jnp.float32),
    ]
    feats_fake = [jax.random.normal(ks[6], (2, 8, 32), jnp.float32)]
    feats_real = [jax.random.normal(ks[7], (2, 8, 32), jnp.float32)]

    # Small deterministic training config (keeps STFT scales TPU-friendly & tiny).
    C = SimpleNamespace(
        use_stft_loss=True,
        use_subband_stft_loss=True,
        use_mse_gan_loss=True,
        use_hinge_gan_loss=False,
        use_feat_match_loss=True,
        stft_loss_weight=0.5,
        subband_stft_loss_weight=0.5,
        mse_G_loss_weight=2.5,
        hinge_G_loss_weight=2.5,
        feat_match_loss_weight=10.8,
        stft_loss_params=dict(
            n_ffts=(64, 128, 32), hop_lengths=(16, 32, 8), win_lengths=(48, 96, 24)),
        subband_stft_loss_params=dict(
            n_ffts=(32, 64, 16), hop_lengths=(8, 16, 4), win_lengths=(24, 48, 12)),
    )

    gl = GeneratorLoss(C)
    out = gl.forward(y_hat=y_hat, y=y, scores_fake=scores_fake,
                     feats_fake=feats_fake, feats_real=feats_real,
                     y_hat_sub=y_hat_sub, y_sub=y_sub)
    jax.block_until_ready(out["G_loss"])
    assert jnp.isfinite(out["G_loss"])
    print("KERNEL_OK")
</pallas_src>

<mosaic_0001>
module attributes {stable_mosaic.version = 11 : i64} {
  func.func @_stft_partial_kernel(%arg0: i32, %arg1: i32, %arg2: memref<40x64xbf16, #tpu.memory_space<vmem>>, %arg3: memref<40x64xbf16, #tpu.memory_space<vmem>>, %arg4: memref<64x256xbf16, #tpu.memory_space<vmem>>, %arg5: memref<8x384xf32, #tpu.memory_space<vmem>>) attributes {dimension_semantics = [#tpu.dimension_semantics<parallel>, #tpu.dimension_semantics<arbitrary>], iteration_bounds = array<i64: 1, 1>, scalar_prefetch = 0 : i64, scratch_operands = 0 : i64, tpu.core_type = #tpu.core_type<tc>, window_params = [{transform_indices = @transform_0, window_bounds = array<i64: 40, 64>}, {transform_indices = @transform_1, window_bounds = array<i64: 40, 64>}, {pipeline_mode = #tpu.pipeline_mode<synchronous>, transform_indices = @transform_2, window_bounds = array<i64: 64, 256>}, {transform_indices = @transform_3, window_bounds = array<i64: 8, 384>}]} {
    %c0_i32 = arith.constant 0 : i32
    %0 = arith.cmpi eq, %arg1, %c0_i32 : i32
    %1 = arith.extui %0 : i1 to i32
    %c0_i32_0 = arith.constant 0 : i32
    %2 = arith.cmpi ne, %1, %c0_i32_0 : i32
    scf.if %2 {
      %cst_29 = arith.constant 0.000000e+00 : f32
      %156 = vector.broadcast %cst_29 : f32 to vector<8x384xf32>
      %c0_30 = arith.constant 0 : index
      %c0_31 = arith.constant 0 : index
      %157 = vector.load %arg5[%c0_30, %c0_31] : memref<8x384xf32, #tpu.memory_space<vmem>>, vector<8x384xf32>
      tpu.vector_store %arg5[%c0_30, %c0_31], %156 {strides = array<i32>} : memref<8x384xf32, #tpu.memory_space<vmem>>, vector<8x384xf32>,
    } else {
    }
    %c0 = arith.constant 0 : index
    %c0_1 = arith.constant 0 : index
    %3 = vector.load %arg4[%c0, %c0_1] : memref<64x256xbf16, #tpu.memory_space<vmem>>, vector<64x256xbf16>
    %c0_2 = arith.constant 0 : index
    %c0_3 = arith.constant 0 : index
    %4 = vector.load %arg2[%c0_2, %c0_3] : memref<40x64xbf16, #tpu.memory_space<vmem>>, vector<40x64xbf16>
    %cst = arith.constant dense<0.000000e+00> : vector<40x256xf32>
    %5 = tpu.matmul %4, %3, %cst {dimension_numbers = #tpu.dot_dimension_numbers<[1], [0], [0], [1], [0, 0, 1, 1], [], []>} : vector<40x64xbf16>, vector<64x256xbf16>, vector<40x256xf32> -> vector<40x256xf32>
    %c0_4 = arith.constant 0 : index
    %c0_5 = arith.constant 0 : index
    %6 = vector.load %arg3[%c0_4, %c0_5] : memref<40x64xbf16, #tpu.memory_space<vmem>>, vector<40x64xbf16>
    %cst_6 = arith.constant dense<0.000000e+00> : vector<40x256xf32>
    %7 = tpu.matmul %6, %3, %cst_6 {dimension_numbers = #tpu.dot_dimension_numbers<[1], [0], [0], [1], [0, 0, 1, 1], [], []>} : vector<40x64xbf16>, vector<64x256xbf16>, vector<40x256xf32> -> vector<40x256xf32>
    %8 = vector.extract_strided_slice %5 {offsets = [0, 0], sizes = [40, 128], strides = [1, 1]} : vector<40x256xf32> to vector<40x128xf32>
    %9 = vector.extract_strided_slice %5 {offsets = [0, 128], sizes = [40, 128], strides = [1, 1]} : vector<40x256xf32> to vector<40x128xf32>
    %10 = vector.extract_strided_slice %7 {offsets = [0, 0], sizes = [40, 128], strides = [1, 1]} : vector<40x256xf32> to vector<40x128xf32>
    %11 = vector.extract_strided_slice %7 {offsets = [0, 128], sizes = [40, 128], strides = [1, 1]} : vector<40x256xf32> to vector<40x128xf32>
    %12 = arith.mulf %8, %8 : vector<40x128xf32>
    %13 = arith.mulf %9, %9 : vector<40x128xf32>
    %14 = arith.addf %12, %13 : vector<40x128xf32>
    %cst_7 = arith.constant 9.99999993E-9 : f32
    %15 = vector.broadcast %cst_7 : f32 to vector<40x128xf32>
    %16 = arith.maximumf %14, %15 : vector<40x128xf32>
    %17 = arith.mulf %10, %10 : vector<40x128xf32>
    %18 = arith.mulf %11, %11 : vector<40x128xf32>
    %19 = arith.addf %17, %18 : vector<40x128xf32>
    %cst_8 = arith.constant 9.99999993E-9 : f32
    %20 = vector.broadcast %cst_8 : f32 to vector<40x128xf32>
    %21 = arith.maximumf %19, %20 : vector<40x128xf32>
    %22 = math.log %21 : vector<40x128xf32>
    %23 = math.log %16 : vector<40x128xf32>
    %24 = arith.subf %22, %23 : vector<40x128xf32>
    %25 = math.absf %24 : vector<40x128xf32>
    %cst_9 = arith.constant 5.000000e-01 : f32
    %26 = vector.broadcast %cst_9 : f32 to vector<40x128xf32>
    %27 = arith.mulf %26, %25 : vector<40x128xf32>
    %28 = math.sqrt %16 : vector<40x128xf32>
    %29 = math.sqrt %21 : vector<40x128xf32>
    %30 = arith.subf %29, %28 : vector<40x128xf32>
    %31 = arith.mulf %30, %30 : vector<40x128xf32>
    %32 = vector.extract_strided_slice %27 {offsets = [0, 0], sizes = [8, 128], strides = [1, 1]} : vector<40x128xf32> to vector<8x128xf32>
    %33 = vector.extract_strided_slice %27 {offsets = [8, 0], sizes = [8, 128], strides = [1, 1]} : vector<40x128xf32> to vector<8x128xf32>
    %34 = arith.addf %32, %33 : vector<8x128xf32>
    %35 = vector.extract_strided_slice %27 {offsets = [16, 0], sizes = [8, 128], strides = [1, 1]} : vector<40x128xf32> to vector<8x128xf32>
    %36 = arith.addf %34, %35 : vector<8x128xf32>
    %37 = vector.extract_strided_slice %27 {offsets = [24, 0], sizes = [8, 128], strides = [1, 1]} : vector<40x128xf32> to vector<8x128xf32>
    %38 = arith.addf %36, %37 : vector<8x128xf32>
    %39 = vector.extract_strided_slice %27 {offsets = [32, 0], sizes = [8, 128], strides = [1, 1]} : vector<40x128xf32> to vector<8x128xf32>
    %40 = arith.addf %38, %39 : vector<8x128xf32>
    %41 = vector.extract_strided_slice %31 {offsets = [0, 0], sizes = [8, 128], strides = [1, 1]} : vector<40x128xf32> to vector<8x128xf32>
    %42 = vector.extract_strided_slice %31 {offsets = [8, 0], sizes = [8, 128], strides = [1, 1]} : vector<40x128xf32> to vector<8x128xf32>
    %43 = arith.addf %41, %42 : vector<8x128xf32>
    %44 = vector.extract_strided_slice %31 {offsets = [16, 0], sizes = [8, 128], strides = [1, 1]} : vector<40x128xf32> to vector<8x128xf32>
    %45 = arith.addf %43, %44 : vector<8x128xf32>
    %46 = vector.extract_strided_slice %31 {offsets = [24, 0], sizes = [8, 128], strides = [1, 1]} : vector<40x128xf32> to vector<8x128xf32>
    %47 = arith.addf %45, %46 : vector<8x128xf32>
    %48 = vector.extract_strided_slice %31 {offsets = [32, 0], sizes = [8, 128], strides = [1, 1]} : vector<40x128xf32> to vector<8x128xf32>
    %49 = arith.addf %47, %48 : vector<8x128xf32>
    %50 = vector.extract_strided_slice %21 {offsets = [0, 0], sizes = [8, 128], strides = [1, 1]} : vector<40x128xf32> to vector<8x128xf32>
    %51 = vector.extract_strided_slice %21 {offsets = [8, 0], sizes = [8, 128], strides = [1, 1]} : vector<40x128xf32> to vector<8x128xf32>
    %52 = arith.addf %50, %51 : vector<8x128xf32>
    %53 = vector.extract_strided_slice %21 {offsets = [16, 0], sizes = [8, 128], strides = [1, 1]} : vector<40x128xf32> to vector<8x128xf32>
    %54 = arith.addf %52, %53 : vector<8x128xf32>
    %55 = vector.extract_strided_slice %21 {offsets = [24, 0], sizes = [8, 128], strides = [1, 1]} : vector<40x128xf32> to vector<8x128xf32>
    %56 = arith.addf %54, %55 : vector<8x128xf32>
    %57 = vector.extract_strided_slice %21 {offsets = [32, 0], sizes = [8, 128], strides = [1, 1]} : vector<40x128xf32> to vector<8x128xf32>
    %58 = arith.addf %56, %57 : vector<8x128xf32>
    %59 = vector.extract_strided_slice %8 {offsets = [0, 0], sizes = [40, 1], strides = [1, 1]} : vector<40x128xf32> to vector<40x1xf32>
    %60 = vector.extract_strided_slice %9 {offsets = [0, 0], sizes = [40, 1], strides = [1, 1]} : vector<40x128xf32> to vector<40x1xf32>
    %61 = vector.extract_strided_slice %10 {offsets = [0, 0], sizes = [40, 1], strides = [1, 1]} : vector<40x128xf32> to vector<40x1xf32>
    %62 = vector.extract_strided_slice %11 {offsets = [0, 0], sizes = [40, 1], strides = [1, 1]} : vector<40x128xf32> to vector<40x1xf32>
    %63 = arith.mulf %59, %59 : vector<40x1xf32>
    %cst_10 = arith.constant 9.99999993E-9 : f32
    %64 = vector.broadcast %cst_10 : f32 to vector<40x1xf32>
    %65 = arith.maximumf %63, %64 : vector<40x1xf32>
    %66 = arith.mulf %60, %60 : vector<40x1xf32>
    %cst_11 = arith.constant 9.99999993E-9 : f32
    %67 = vector.broadcast %cst_11 : f32 to vector<40x1xf32>
    %68 = arith.maximumf %66, %67 : vector<40x1xf32>
    %69 = arith.mulf %61, %61 : vector<40x1xf32>
    %cst_12 = arith.constant 9.99999993E-9 : f32
    %70 = vector.broadcast %cst_12 : f32 to vector<40x1xf32>
    %71 = arith.maximumf %69, %70 : vector<40x1xf32>
    %72 = arith.mulf %62, %62 : vector<40x1xf32>
    %cst_13 = arith.constant 9.99999993E-9 : f32
    %73 = vector.broadcast %cst_13 : f32 to vector<40x1xf32>
    %74 = arith.maximumf %72, %73 : vector<40x1xf32>
    %75 = math.log %71 : vector<40x1xf32>
    %76 = math.log %65 : vector<40x1xf32>
    %77 = arith.subf %75, %76 : vector<40x1xf32>
    %78 = math.absf %77 : vector<40x1xf32>
    %79 = math.log %74 : vector<40x1xf32>
    %80 = math.log %68 : vector<40x1xf32>
    %81 = arith.subf %79, %80 : vector<40x1xf32>
    %82 = math.absf %81 : vector<40x1xf32>
    %83 = arith.addf %78, %82 : vector<40x1xf32>
    %cst_14 = arith.constant 5.000000e-01 : f32
    %84 = vector.broadcast %cst_14 : f32 to vector<40x1xf32>
    %85 = arith.mulf %84, %83 : vector<40x1xf32>
    %86 = vector.extract_strided_slice %27 {offsets = [0, 0], sizes = [40, 1], strides = [1, 1]} : vector<40x128xf32> to vector<40x1xf32>
    %87 = arith.subf %85, %86 : vector<40x1xf32>
    %88 = math.sqrt %71 : vector<40x1xf32>
    %89 = math.sqrt %65 : vector<40x1xf32>
    %90 = arith.subf %88, %89 : vector<40x1xf32>
    %91 = math.sqrt %74 : vector<40x1xf32>
    %92 = math.sqrt %68 : vector<40x1xf32>
    %93 = arith.subf %91, %92 : vector<40x1xf32>
    %94 = arith.mulf %90, %90 : vector<40x1xf32>
    %95 = arith.mulf %93, %93 : vector<40x1xf32>
    %96 = arith.addf %94, %95 : vector<40x1xf32>
    %97 = vector.extract_strided_slice %31 {offsets = [0, 0], sizes = [40, 1], strides = [1, 1]} : vector<40x128xf32> to vector<40x1xf32>
    %98 = arith.subf %96, %97 : vector<40x1xf32>
    %99 = arith.addf %71, %74 : vector<40x1xf32>
    %100 = vector.extract_strided_slice %21 {offsets = [0, 0], sizes = [40, 1], strides = [1, 1]} : vector<40x128xf32> to vector<40x1xf32>
    %101 = arith.subf %99, %100 : vector<40x1xf32>
    %102 = vector.extract_strided_slice %87 {offsets = [0, 0], sizes = [8, 1], strides = [1, 1]} : vector<40x1xf32> to vector<8x1xf32>
    %103 = vector.extract_strided_slice %87 {offsets = [8, 0], sizes = [8, 1], strides = [1, 1]} : vector<40x1xf32> to vector<8x1xf32>
    %104 = arith.addf %102, %103 : vector<8x1xf32>
    %105 = vector.extract_strided_slice %87 {offsets = [16, 0], sizes = [8, 1], strides = [1, 1]} : vector<40x1xf32> to vector<8x1xf32>
    %106 = arith.addf %104, %105 : vector<8x1xf32>
    %107 = vector.extract_strided_slice %87 {offsets = [24, 0], sizes = [8, 1], strides = [1, 1]} : vector<40x1xf32> to vector<8x1xf32>
    %108 = arith.addf %106, %107 : vector<8x1xf32>
    %109 = vector.extract_strided_slice %87 {offsets = [32, 0], sizes = [8, 1], strides = [1, 1]} : vector<40x1xf32> to vector<8x1xf32>
    %110 = arith.addf %108, %109 : vector<8x1xf32>
    %111 = vector.extract_strided_slice %98 {offsets = [0, 0], sizes = [8, 1], strides = [1, 1]} : vector<40x1xf32> to vector<8x1xf32>
    %112 = vector.extract_strided_slice %98 {offsets = [8, 0], sizes = [8, 1], strides = [1, 1]} : vector<40x1xf32> to vector<8x1xf32>
    %113 = arith.addf %111, %112 : vector<8x1xf32>
    %114 = vector.extract_strided_slice %98 {offsets = [16, 0], sizes = [8, 1], strides = [1, 1]} : vector<40x1xf32> to vector<8x1xf32>
    %115 = arith.addf %113, %114 : vector<8x1xf32>
    %116 = vector.extract_strided_slice %98 {offsets = [24, 0], sizes = [8, 1], strides = [1, 1]} : vector<40x1xf32> to vector<8x1xf32>
    %117 = arith.addf %115, %116 : vector<8x1xf32>
    %118 = vector.extract_strided_slice %98 {offsets = [32, 0], sizes = [8, 1], strides = [1, 1]} : vector<40x1xf32> to vector<8x1xf32>
    %119 = arith.addf %117, %118 : vector<8x1xf32>
    %120 = vector.extract_strided_slice %101 {offsets = [0, 0], sizes = [8, 1], strides = [1, 1]} : vector<40x1xf32> to vector<8x1xf32>
    %121 = vector.extract_strided_slice %101 {offsets = [8, 0], sizes = [8, 1], strides = [1, 1]} : vector<40x1xf32> to vector<8x1xf32>
    %122 = arith.addf %120, %121 : vector<8x1xf32>
    %123 = vector.extract_strided_slice %101 {offsets = [16, 0], sizes = [8, 1], strides = [1, 1]} : vector<40x1xf32> to vector<8x1xf32>
    %124 = arith.addf %122, %123 : vector<8x1xf32>
    %125 = vector.extract_strided_slice %101 {offsets = [24, 0], sizes = [8, 1], strides = [1, 1]} : vector<40x1xf32> to vector<8x1xf32>
    %126 = arith.addf %124, %125 : vector<8x1xf32>
    %127 = vector.extract_strided_slice %101 {offsets = [32, 0], sizes = [8, 1], strides = [1, 1]} : vector<40x1xf32> to vector<8x1xf32>
    %128 = arith.addf %126, %127 : vector<8x1xf32>
    %129 = tpu.iota {dimensions = array<i32: 1>} : vector<8x128xi32>
    %c0_i32_15 = arith.constant 0 : i32
    %130 = vector.broadcast %c0_i32_15 : i32 to vector<8x128xi32>
    %131 = arith.cmpi eq, %129, %130 : vector<8x128xi32>
    %cst_16 = arith.constant 0.000000e+00 : f32
    %132 = vector.shape_cast %110 : vector<8x1xf32> to vector<8x1xf32>
    %133 = vector.broadcast %132 : vector<8x1xf32> to vector<8x128xf32>
    %134 = vector.broadcast %cst_16 : f32 to vector<8x128xf32>
    %135 = arith.select %131, %133, %134 : vector<8x128xi1>, vector<8x128xf32>
    %136 = arith.addf %40, %135 : vector<8x128xf32>
    %cst_17 = arith.constant 0.000000e+00 : f32
    %137 = vector.shape_cast %119 : vector<8x1xf32> to vector<8x1xf32>
    %138 = vector.broadcast %137 : vector<8x1xf32> to vector<8x128xf32>
    %139 = vector.broadcast %cst_17 : f32 to vector<8x128xf32>
    %140 = arith.select %131, %138, %139 : vector<8x128xi1>, vector<8x128xf32>
    %141 = arith.addf %49, %140 : vector<8x128xf32>
    %cst_18 = arith.constant 0.000000e+00 : f32
    %142 = vector.shape_cast %128 : vector<8x1xf32> to vector<8x1xf32>
    %143 = vector.broadcast %142 : vector<8x1xf32> to vector<8x128xf32>
    %144 = vector.broadcast %cst_18 : f32 to vector<8x128xf32>
    %145 = arith.select %131, %143, %144 : vector<8x128xi1>, vector<8x128xf32>
    %146 = arith.addf %58, %145 : vector<8x128xf32>
    %c0_19 = arith.constant 0 : index
    %c0_20 = arith.constant 0 : index
    %147 = vector.load %arg5[%c0_19, %c0_20] : memref<8x384xf32, #tpu.memory_space<vmem>>, vector<8x128xf32>
    %148 = arith.addf %147, %136 : vector<8x128xf32>
    %c0_21 = arith.constant 0 : index
    %c0_22 = arith.constant 0 : index
    %149 = vector.load %arg5[%c0_21, %c0_22] : memref<8x384xf32, #tpu.memory_space<vmem>>, vector<8x128xf32>
    tpu.vector_store %arg5[%c0_21, %c0_22], %148 {strides = array<i32>} : memref<8x384xf32, #tpu.memory_space<vmem>>, vector<8x128xf32>,
    %c0_23 = arith.constant 0 : index
    %c128 = arith.constant 128 : index
    %150 = vector.load %arg5[%c0_23, %c128] : memref<8x384xf32, #tpu.memory_space<vmem>>, vector<8x128xf32>
    %151 = arith.addf %150, %141 : vector<8x128xf32>
    %c0_24 = arith.constant 0 : index
    %c128_25 = arith.constant 128 : index
    %152 = vector.load %arg5[%c0_24, %c128_25] : memref<8x384xf32, #tpu.memory_space<vmem>>, vector<8x128xf32>
    tpu.vector_store %arg5[%c0_24, %c128_25], %151 {strides = array<i32>} : memref<8x384xf32, #tpu.memory_space<vmem>>, vector<8x128xf32>,
    %c0_26 = arith.constant 0 : index
    %c256 = arith.constant 256 : index
    %153 = vector.load %arg5[%c0_26, %c256] : memref<8x384xf32, #tpu.memory_space<vmem>>, vector<8x128xf32>
    %154 = arith.addf %153, %146 : vector<8x128xf32>
    %c0_27 = arith.constant 0 : index
    %c256_28 = arith.constant 256 : index
    %155 = vector.load %arg5[%c0_27, %c256_28] : memref<8x384xf32, #tpu.memory_space<vmem>>, vector<8x128xf32>
    tpu.vector_store %arg5[%c0_27, %c256_28], %154 {strides = array<i32>} : memref<8x384xf32, #tpu.memory_space<vmem>>, vector<8x128xf32>,
    return
  }
  func.func @transform_0(%arg0: i32, %arg1: i32) -> (i32, i32) {
    %c1_i32 = arith.constant 1 : i32
    %0 = arith.muli %arg0, %c1_i32 : i32
    %1 = arith.addi %0, %arg1 : i32
    %c0_i32 = arith.constant 0 : i32
    %c0_i32_0 = arith.constant 0 : i32
    return %1, %c0_i32 : i32, i32
  }
  func.func @transform_1(%arg0: i32, %arg1: i32) -> (i32, i32) {
    %c1_i32 = arith.constant 1 : i32
    %0 = arith.muli %arg0, %c1_i32 : i32
    %1 = arith.addi %0, %arg1 : i32
    %c0_i32 = arith.constant 0 : i32
    %c0_i32_0 = arith.constant 0 : i32
    return %1, %c0_i32 : i32, i32
  }
  func.func @transform_2(%arg0: i32, %arg1: i32) -> (i32, i32) {
    %c0_i32 = arith.constant 0 : i32
    %c0_i32_0 = arith.constant 0 : i32
    %c0_i32_1 = arith.constant 0 : i32
    return %c0_i32, %c0_i32_0 : i32, i32
  }
  func.func @transform_3(%arg0: i32, %arg1: i32) -> (i32, i32) {
    %c0_i32 = arith.constant 0 : i32
    %c0_i32_0 = arith.constant 0 : i32
    return %arg0, %c0_i32 : i32, i32
  }
}

module attributes {stable_mosaic.version = 11 : i64} {
  func.func @_stft_partial_kernel(%arg0: i32, %arg1: i32, %arg2: memref<40x64xbf16, #tpu.memory_space<vmem>>, %arg3: memref<40x64xbf16, #tpu.memory_space<vmem>>, %arg4: memref<64x256xbf16, #tpu.memory_space<vmem>>, %arg5: memref<8x384xf32, #tpu.memory_space<vmem>>) attributes {dimension_semantics = [#tpu.dimension_semantics<parallel>, #tpu.dimension_semantics<arbitrary>], iteration_bounds = array<i64: 1, 1>, scalar_prefetch = 0 : i64, scratch_operands = 0 : i64, tpu.core_type = #tpu.core_type<tc>, window_params = [{transform_indices = @transform_0, window_bounds = array<i64: 40, 64>}, {transform_indices = @transform_1, window_bounds = array<i64: 40, 64>}, {pipeline_mode = #tpu.pipeline_mode<synchronous>, transform_indices = @transform_2, window_bounds = array<i64: 64, 256>}, {transform_indices = @transform_3, window_bounds = array<i64: 8, 384>}]} {
    %c0_i32 = arith.constant 0 : i32
    %0 = arith.cmpi eq, %arg1, %c0_i32 : i32
    %1 = arith.extui %0 : i1 to i32
    %c0_i32_0 = arith.constant 0 : i32
    %2 = arith.cmpi ne, %1, %c0_i32_0 : i32
    scf.if %2 {
      %cst_29 = arith.constant 0.000000e+00 : f32
      %156 = vector.broadcast %cst_29 : f32 to vector<8x384xf32>
      %c0_30 = arith.constant 0 : index
      %c0_31 = arith.constant 0 : index
      %157 = vector.load %arg5[%c0_30, %c0_31] : memref<8x384xf32, #tpu.memory_space<vmem>>, vector<8x384xf32>
      tpu.vector_store %arg5[%c0_30, %c0_31], %156 {strides = array<i32>} : memref<8x384xf32, #tpu.memory_space<vmem>>, vector<8x384xf32>,
    } else {
    }
    %c0 = arith.constant 0 : index
    %c0_1 = arith.constant 0 : index
    %3 = vector.load %arg4[%c0, %c0_1] : memref<64x256xbf16, #tpu.memory_space<vmem>>, vector<64x256xbf16>
    %c0_2 = arith.constant 0 : index
    %c0_3 = arith.constant 0 : index
    %4 = vector.load %arg2[%c0_2, %c0_3] : memref<40x64xbf16, #tpu.memory_space<vmem>>, vector<40x64xbf16>
    %cst = arith.constant dense<0.000000e+00> : vector<40x256xf32>
    %5 = tpu.matmul %4, %3, %cst {dimension_numbers = #tpu.dot_dimension_numbers<[1], [0], [0], [1], [0, 0, 1, 1], [], []>} : vector<40x64xbf16>, vector<64x256xbf16>, vector<40x256xf32> -> vector<40x256xf32>
    %c0_4 = arith.constant 0 : index
    %c0_5 = arith.constant 0 : index
    %6 = vector.load %arg3[%c0_4, %c0_5] : memref<40x64xbf16, #tpu.memory_space<vmem>>, vector<40x64xbf16>
    %cst_6 = arith.constant dense<0.000000e+00> : vector<40x256xf32>
    %7 = tpu.matmul %6, %3, %cst_6 {dimension_numbers = #tpu.dot_dimension_numbers<[1], [0], [0], [1], [0, 0, 1, 1], [], []>} : vector<40x64xbf16>, vector<64x256xbf16>, vector<40x256xf32> -> vector<40x256xf32>
    %8 = vector.extract_strided_slice %5 {offsets = [0, 0], sizes = [40, 128], strides = [1, 1]} : vector<40x256xf32> to vector<40x128xf32>
    %9 = vector.extract_strided_slice %5 {offsets = [0, 128], sizes = [40, 128], strides = [1, 1]} : vector<40x256xf32> to vector<40x128xf32>
    %10 = vector.extract_strided_slice %7 {offsets = [0, 0], sizes = [40, 128], strides = [1, 1]} : vector<40x256xf32> to vector<40x128xf32>
    %11 = vector.extract_strided_slice %7 {offsets = [0, 128], sizes = [40, 128], strides = [1, 1]} : vector<40x256xf32> to vector<40x128xf32>
    %12 = arith.mulf %8, %8 : vector<40x128xf32>
    %13 = arith.mulf %9, %9 : vector<40x128xf32>
    %14 = arith.addf %12, %13 : vector<40x128xf32>
    %cst_7 = arith.constant 9.99999993E-9 : f32
    %15 = vector.broadcast %cst_7 : f32 to vector<40x128xf32>
    %16 = arith.maximumf %14, %15 : vector<40x128xf32>
    %17 = arith.mulf %10, %10 : vector<40x128xf32>
    %18 = arith.mulf %11, %11 : vector<40x128xf32>
    %19 = arith.addf %17, %18 : vector<40x128xf32>
    %cst_8 = arith.constant 9.99999993E-9 : f32
    %20 = vector.broadcast %cst_8 : f32 to vector<40x128xf32>
    %21 = arith.maximumf %19, %20 : vector<40x128xf32>
    %22 = math.log %21 : vector<40x128xf32>
    %23 = math.log %16 : vector<40x128xf32>
    %24 = arith.subf %22, %23 : vector<40x128xf32>
    %25 = math.absf %24 : vector<40x128xf32>
    %cst_9 = arith.constant 5.000000e-01 : f32
    %26 = vector.broadcast %cst_9 : f32 to vector<40x128xf32>
    %27 = arith.mulf %26, %25 : vector<40x128xf32>
    %28 = math.sqrt %16 : vector<40x128xf32>
    %29 = math.sqrt %21 : vector<40x128xf32>
    %30 = arith.subf %29, %28 : vector<40x128xf32>
    %31 = arith.mulf %30, %30 : vector<40x128xf32>
    %32 = vector.extract_strided_slice %27 {offsets = [0, 0], sizes = [8, 128], strides = [1, 1]} : vector<40x128xf32> to vector<8x128xf32>
    %33 = vector.extract_strided_slice %27 {offsets = [8, 0], sizes = [8, 128], strides = [1, 1]} : vector<40x128xf32> to vector<8x128xf32>
    %34 = arith.addf %32, %33 : vector<8x128xf32>
    %35 = vector.extract_strided_slice %27 {offsets = [16, 0], sizes = [8, 128], strides = [1, 1]} : vector<40x128xf32> to vector<8x128xf32>
    %36 = arith.addf %34, %35 : vector<8x128xf32>
    %37 = vector.extract_strided_slice %27 {offsets = [24, 0], sizes = [8, 128], strides = [1, 1]} : vector<40x128xf32> to vector<8x128xf32>
    %38 = arith.addf %36, %37 : vector<8x128xf32>
    %39 = vector.extract_strided_slice %27 {offsets = [32, 0], sizes = [8, 128], strides = [1, 1]} : vector<40x128xf32> to vector<8x128xf32>
    %40 = arith.addf %38, %39 : vector<8x128xf32>
    %41 = vector.extract_strided_slice %31 {offsets = [0, 0], sizes = [8, 128], strides = [1, 1]} : vector<40x128xf32> to vector<8x128xf32>
    %42 = vector.extract_strided_slice %31 {offsets = [8, 0], sizes = [8, 128], strides = [1, 1]} : vector<40x128xf32> to vector<8x128xf32>
    %43 = arith.addf %41, %42 : vector<8x128xf32>
    %44 = vector.extract_strided_slice %31 {offsets = [16, 0], sizes = [8, 128], strides = [1, 1]} : vector<40x128xf32> to vector<8x128xf32>
    %45 = arith.addf %43, %44 : vector<8x128xf32>
    %46 = vector.extract_strided_slice %31 {offsets = [24, 0], sizes = [8, 128], strides = [1, 1]} : vector<40x128xf32> to vector<8x128xf32>
    %47 = arith.addf %45, %46 : vector<8x128xf32>
    %48 = vector.extract_strided_slice %31 {offsets = [32, 0], sizes = [8, 128], strides = [1, 1]} : vector<40x128xf32> to vector<8x128xf32>
    %49 = arith.addf %47, %48 : vector<8x128xf32>
    %50 = vector.extract_strided_slice %21 {offsets = [0, 0], sizes = [8, 128], strides = [1, 1]} : vector<40x128xf32> to vector<8x128xf32>
    %51 = vector.extract_strided_slice %21 {offsets = [8, 0], sizes = [8, 128], strides = [1, 1]} : vector<40x128xf32> to vector<8x128xf32>
    %52 = arith.addf %50, %51 : vector<8x128xf32>
    %53 = vector.extract_strided_slice %21 {offsets = [16, 0], sizes = [8, 128], strides = [1, 1]} : vector<40x128xf32> to vector<8x128xf32>
    %54 = arith.addf %52, %53 : vector<8x128xf32>
    %55 = vector.extract_strided_slice %21 {offsets = [24, 0], sizes = [8, 128], strides = [1, 1]} : vector<40x128xf32> to vector<8x128xf32>
    %56 = arith.addf %54, %55 : vector<8x128xf32>
    %57 = vector.extract_strided_slice %21 {offsets = [32, 0], sizes = [8, 128], strides = [1, 1]} : vector<40x128xf32> to vector<8x128xf32>
    %58 = arith.addf %56, %57 : vector<8x128xf32>
    %59 = vector.extract_strided_slice %8 {offsets = [0, 0], sizes = [40, 1], strides = [1, 1]} : vector<40x128xf32> to vector<40x1xf32>
    %60 = vector.extract_strided_slice %9 {offsets = [0, 0], sizes = [40, 1], strides = [1, 1]} : vector<40x128xf32> to vector<40x1xf32>
    %61 = vector.extract_strided_slice %10 {offsets = [0, 0], sizes = [40, 1], strides = [1, 1]} : vector<40x128xf32> to vector<40x1xf32>
    %62 = vector.extract_strided_slice %11 {offsets = [0, 0], sizes = [40, 1], strides = [1, 1]} : vector<40x128xf32> to vector<40x1xf32>
    %63 = arith.mulf %59, %59 : vector<40x1xf32>
    %cst_10 = arith.constant 9.99999993E-9 : f32
    %64 = vector.broadcast %cst_10 : f32 to vector<40x1xf32>
    %65 = arith.maximumf %63, %64 : vector<40x1xf32>
    %66 = arith.mulf %60, %60 : vector<40x1xf32>
    %cst_11 = arith.constant 9.99999993E-9 : f32
    %67 = vector.broadcast %cst_11 : f32 to vector<40x1xf32>
    %68 = arith.maximumf %66, %67 : vector<40x1xf32>
    %69 = arith.mulf %61, %61 : vector<40x1xf32>
    %cst_12 = arith.constant 9.99999993E-9 : f32
    %70 = vector.broadcast %cst_12 : f32 to vector<40x1xf32>
    %71 = arith.maximumf %69, %70 : vector<40x1xf32>
    %72 = arith.mulf %62, %62 : vector<40x1xf32>
    %cst_13 = arith.constant 9.99999993E-9 : f32
    %73 = vector.broadcast %cst_13 : f32 to vector<40x1xf32>
    %74 = arith.maximumf %72, %73 : vector<40x1xf32>
    %75 = math.log %71 : vector<40x1xf32>
    %76 = math.log %65 : vector<40x1xf32>
    %77 = arith.subf %75, %76 : vector<40x1xf32>
    %78 = math.absf %77 : vector<40x1xf32>
    %79 = math.log %74 : vector<40x1xf32>
    %80 = math.log %68 : vector<40x1xf32>
    %81 = arith.subf %79, %80 : vector<40x1xf32>
    %82 = math.absf %81 : vector<40x1xf32>
    %83 = arith.addf %78, %82 : vector<40x1xf32>
    %cst_14 = arith.constant 5.000000e-01 : f32
    %84 = vector.broadcast %cst_14 : f32 to vector<40x1xf32>
    %85 = arith.mulf %84, %83 : vector<40x1xf32>
    %86 = vector.extract_strided_slice %27 {offsets = [0, 0], sizes = [40, 1], strides = [1, 1]} : vector<40x128xf32> to vector<40x1xf32>
    %87 = arith.subf %85, %86 : vector<40x1xf32>
    %88 = math.sqrt %71 : vector<40x1xf32>
    %89 = math.sqrt %65 : vector<40x1xf32>
    %90 = arith.subf %88, %89 : vector<40x1xf32>
    %91 = math.sqrt %74 : vector<40x1xf32>
    %92 = math.sqrt %68 : vector<40x1xf32>
    %93 = arith.subf %91, %92 : vector<40x1xf32>
    %94 = arith.mulf %90, %90 : vector<40x1xf32>
    %95 = arith.mulf %93, %93 : vector<40x1xf32>
    %96 = arith.addf %94, %95 : vector<40x1xf32>
    %97 = vector.extract_strided_slice %31 {offsets = [0, 0], sizes = [40, 1], strides = [1, 1]} : vector<40x128xf32> to vector<40x1xf32>
    %98 = arith.subf %96, %97 : vector<40x1xf32>
    %99 = arith.addf %71, %74 : vector<40x1xf32>
    %100 = vector.extract_strided_slice %21 {offsets = [0, 0], sizes = [40, 1], strides = [1, 1]} : vector<40x128xf32> to vector<40x1xf32>
    %101 = arith.subf %99, %100 : vector<40x1xf32>
    %102 = vector.extract_strided_slice %87 {offsets = [0, 0], sizes = [8, 1], strides = [1, 1]} : vector<40x1xf32> to vector<8x1xf32>
    %103 = vector.extract_strided_slice %87 {offsets = [8, 0], sizes = [8, 1], strides = [1, 1]} : vector<40x1xf32> to vector<8x1xf32>
    %104 = arith.addf %102, %103 : vector<8x1xf32>
    %105 = vector.extract_strided_slice %87 {offsets = [16, 0], sizes = [8, 1], strides = [1, 1]} : vector<40x1xf32> to vector<8x1xf32>
    %106 = arith.addf %104, %105 : vector<8x1xf32>
    %107 = vector.extract_strided_slice %87 {offsets = [24, 0], sizes = [8, 1], strides = [1, 1]} : vector<40x1xf32> to vector<8x1xf32>
    %108 = arith.addf %106, %107 : vector<8x1xf32>
    %109 = vector.extract_strided_slice %87 {offsets = [32, 0], sizes = [8, 1], strides = [1, 1]} : vector<40x1xf32> to vector<8x1xf32>
    %110 = arith.addf %108, %109 : vector<8x1xf32>
    %111 = vector.extract_strided_slice %98 {offsets = [0, 0], sizes = [8, 1], strides = [1, 1]} : vector<40x1xf32> to vector<8x1xf32>
    %112 = vector.extract_strided_slice %98 {offsets = [8, 0], sizes = [8, 1], strides = [1, 1]} : vector<40x1xf32> to vector<8x1xf32>
    %113 = arith.addf %111, %112 : vector<8x1xf32>
    %114 = vector.extract_strided_slice %98 {offsets = [16, 0], sizes = [8, 1], strides = [1, 1]} : vector<40x1xf32> to vector<8x1xf32>
    %115 = arith.addf %113, %114 : vector<8x1xf32>
    %116 = vector.extract_strided_slice %98 {offsets = [24, 0], sizes = [8, 1], strides = [1, 1]} : vector<40x1xf32> to vector<8x1xf32>
    %117 = arith.addf %115, %116 : vector<8x1xf32>
    %118 = vector.extract_strided_slice %98 {offsets = [32, 0], sizes = [8, 1], strides = [1, 1]} : vector<40x1xf32> to vector<8x1xf32>
    %119 = arith.addf %117, %118 : vector<8x1xf32>
    %120 = vector.extract_strided_slice %101 {offsets = [0, 0], sizes = [8, 1], strides = [1, 1]} : vector<40x1xf32> to vector<8x1xf32>
    %121 = vector.extract_strided_slice %101 {offsets = [8, 0], sizes = [8, 1], strides = [1, 1]} : vector<40x1xf32> to vector<8x1xf32>
    %122 = arith.addf %120, %121 : vector<8x1xf32>
    %123 = vector.extract_strided_slice %101 {offsets = [16, 0], sizes = [8, 1], strides = [1, 1]} : vector<40x1xf32> to vector<8x1xf32>
    %124 = arith.addf %122, %123 : vector<8x1xf32>
    %125 = vector.extract_strided_slice %101 {offsets = [24, 0], sizes = [8, 1], strides = [1, 1]} : vector<40x1xf32> to vector<8x1xf32>
    %126 = arith.addf %124, %125 : vector<8x1xf32>
    %127 = vector.extract_strided_slice %101 {offsets = [32, 0], sizes = [8, 1], strides = [1, 1]} : vector<40x1xf32> to vector<8x1xf32>
    %128 = arith.addf %126, %127 : vector<8x1xf32>
    %129 = tpu.iota {dimensions = array<i32: 1>} : vector<8x128xi32>
    %c0_i32_15 = arith.constant 0 : i32
    %130 = vector.broadcast %c0_i32_15 : i32 to vector<8x128xi32>
    %131 = arith.cmpi eq, %129, %130 : vector<8x128xi32>
    %cst_16 = arith.constant 0.000000e+00 : f32
    %132 = vector.shape_cast %110 : vector<8x1xf32> to vector<8x1xf32>
    %133 = vector.broadcast %132 : vector<8x1xf32> to vector<8x128xf32>
    %134 = vector.broadcast %cst_16 : f32 to vector<8x128xf32>
    %135 = arith.select %131, %133, %134 : vector<8x128xi1>, vector<8x128xf32>
    %136 = arith.addf %40, %135 : vector<8x128xf32>
    %cst_17 = arith.constant 0.000000e+00 : f32
    %137 = vector.shape_cast %119 : vector<8x1xf32> to vector<8x1xf32>
    %138 = vector.broadcast %137 : vector<8x1xf32> to vector<8x128xf32>
    %139 = vector.broadcast %cst_17 : f32 to vector<8x128xf32>
    %140 = arith.select %131, %138, %139 : vector<8x128xi1>, vector<8x128xf32>
    %141 = arith.addf %49, %140 : vector<8x128xf32>
    %cst_18 = arith.constant 0.000000e+00 : f32
    %142 = vector.shape_cast %128 : vector<8x1xf32> to vector<8x1xf32>
    %143 = vector.broadcast %142 : vector<8x1xf32> to vector<8x128xf32>
    %144 = vector.broadcast %cst_18 : f32 to vector<8x128xf32>
    %145 = arith.select %131, %143, %144 : vector<8x128xi1>, vector<8x128xf32>
    %146 = arith.addf %58, %145 : vector<8x128xf32>
    %c0_19 = arith.constant 0 : index
    %c0_20 = arith.constant 0 : index
    %147 = vector.load %arg5[%c0_19, %c0_20] : memref<8x384xf32, #tpu.memory_space<vmem>>, vector<8x128xf32>
    %148 = arith.addf %147, %136 : vector<8x128xf32>
    %c0_21 = arith.constant 0 : index
    %c0_22 = arith.constant 0 : index
    %149 = vector.load %arg5[%c0_21, %c0_22] : memref<8x384xf32, #tpu.memory_space<vmem>>, vector<8x128xf32>
    tpu.vector_store %arg5[%c0_21, %c0_22], %148 {strides = array<i32>} : memref<8x384xf32, #tpu.memory_space<vmem>>, vector<8x128xf32>,
    %c0_23 = arith.constant 0 : index
    %c128 = arith.constant 128 : index
    %150 = vector.load %arg5[%c0_23, %c128] : memref<8x384xf32, #tpu.memory_space<vmem>>, vector<8x128xf32>
    %151 = arith.addf %150, %141 : vector<8x128xf32>
    %c0_24 = arith.constant 0 : index
    %c128_25 = arith.constant 128 : index
    %152 = vector.load %arg5[%c0_24, %c128_25] : memref<8x384xf32, #tpu.memory_space<vmem>>, vector<8x128xf32>
    tpu.vector_store %arg5[%c0_24, %c128_25], %151 {strides = array<i32>} : memref<8x384xf32, #tpu.memory_space<vmem>>, vector<8x128xf32>,
    %c0_26 = arith.constant 0 : index
    %c256 = arith.constant 256 : index
    %153 = vector.load %arg5[%c0_26, %c256] : memref<8x384xf32, #tpu.memory_space<vmem>>, vector<8x128xf32>
    %154 = arith.addf %153, %146 : vector<8x128xf32>
    %c0_27 = arith.constant 0 : index
    %c256_28 = arith.constant 256 : index
    %155 = vector.load %arg5[%c0_27, %c256_28] : memref<8x384xf32, #tpu.memory_space<vmem>>, vector<8x128xf32>
    tpu.vector_store %arg5[%c0_27, %c256_28], %154 {strides = array<i32>} : memref<8x384xf32, #tpu.memory_space<vmem>>, vector<8x128xf32>,
    return
  }
  func.func @transform_0(%arg0: i32, %arg1: i32) -> (i32, i32) {
    %c1_i32 = arith.constant 1 : i32
    %0 = arith.muli %arg0, %c1_i32 : i32
    %1 = arith.addi %0, %arg1 : i32
    %c0_i32 = arith.constant 0 : i32
    %c0_i32_0 = arith.constant 0 : i32
    return %1, %c0_i32 : i32, i32
  }
  func.func @transform_1(%arg0: i32, %arg1: i32) -> (i32, i32) {
    %c1_i32 = arith.constant 1 : i32
    %0 = arith.muli %arg0, %c1_i32 : i32
    %1 = arith.addi %0, %arg1 : i32
    %c0_i32 = arith.constant 0 : i32
    %c0_i32_0 = arith.constant 0 : i32
    return %1, %c0_i32 : i32, i32
  }
  func.func @transform_2(%arg0: i32, %arg1: i32) -> (i32, i32) {
    %c0_i32 = arith.constant 0 : i32
    %c0_i32_0 = arith.constant 0 : i32
    %c0_i32_1 = arith.constant 0 : i32
    return %c0_i32, %c0_i32_0 : i32, i32
  }
  func.func @transform_3(%arg0: i32, %arg1: i32) -> (i32, i32) {
    %c0_i32 = arith.constant 0 : i32
    %c0_i32_0 = arith.constant 0 : i32
    return %arg0, %c0_i32 : i32, i32
  }
}

</mosaic_0001>

<bundles_post_ra>
// kernel: tpu_custom_call.1
= control target key start
LH: loop header
LB: loop body
LE: loop exit
PB: predicated region body
PF: predicated region fallthrough
CT: control target
= control target key end

     0   :  { %8 = vsyncpa [#allocation3], 0  ;;  %s1907_s0 = inlined_call_operand.hbm [shape: bf16[40,64], index: 0, kind: input, shape index: {}]   ;;  %s1908_s1 = inlined_call_operand.hbm [shape: bf16[40,64], index: 1, kind: input, shape index: {}]   ;;  %s1909_s2 = inlined_call_operand.hbm [shape: bf16[64,256], index: 2, kind: input, shape index: {}]   ;;  %s1910_s3 = inlined_call_operand.hbm [shape: f32[8,384], index: 3, kind: output, shape index: {}]  }
   0x1   :  { %9 = vsyncpa [#allocation6], 0 }
   0x2   :  { %10 = vsyncpa [#allocation4], 0  ;;  %s36_s14 = sshll.u32 %s1908_s1, 4  ;;  %s1238_s15 = smov [#allocation5]   ;;  %s37_s14 = int_to_ptr.hbm [resolvable:$true] %s36_s14 }
   0x3   :  { %s38_s16 = sshll.u32 %s1238_s15, 4  ;;  %s19_s19 = sshll.u32 %s1907_s0, 4  ;;  %s39_s16 = int_to_ptr.vmem [resolvable:$true] %s38_s16  ;;  %s20_s19 = int_to_ptr.hbm [resolvable:$true] %s19_s19 }
   0x4   :  { %s1239_s20 = smov 64   ;;  %s1240_s21 = smov 4  }
   0x5   :  { %44 = dma.hbm_to_vmem [thread:$0]  %s37_s14, 320, %s39_s16, [#allocation6], %s1239_s20, %s1239_s20, %s1240_s21  }
   0x6   :  { %s1241_s22 = smov [#allocation2]   ;;  %s49_s26 = sshll.u32 %s1909_s2, 4  ;;  %s50_s26 = int_to_ptr.hbm [resolvable:$true] %s49_s26 }
   0x7   :  { %s21_s23 = sshll.u32 %s1241_s22, 4  ;;  %s1242_s1 = smov [#allocation7]   ;;  %s22_s23 = int_to_ptr.vmem [resolvable:$true] %s21_s23 }
   0x8   :  { %27 = dma.hbm_to_vmem [thread:$0]  %s20_s19, 320, %s22_s23, [#allocation3], %s1239_s20, %s1239_s20, %s1240_s21  }
   0x9   :  { %s51_s27 = sshll.u32 %s1242_s1, 4  ;;  %s1243_s28 = smov 128   ;;  %s52_s27 = int_to_ptr.vmem [resolvable:$true] %s51_s27 }
   0xa   :  { %s1244_s29 = smov 8  }
   0xb   :  { %57 = dma.hbm_to_vmem [thread:$0]  %s50_s26, 1024, %s52_s27, [#allocation6], %s1243_s28, %s1243_s28, %s1244_s29  }
   0xc   :  { %1232 = dma.done.wait [#allocation3], 320  }
   0xd   :  { %1233 = vsyncadd [#allocation3], 4294966976 }
   0xe   :  { %1234 = dma.done.wait [#allocation6], 1344  }
   0xf   :  { %1235 = vsyncadd [#allocation6], 4294965952  ;;  %v966_v0 = vld [vmem:[#allocation7 + $0x30] sm:$0xf]  ;;  %v999_v1 = vld [vmem:[#allocation7 + $0x34] sm:$0xf0] }
  0x10   :  { %v998_v2 = vld [vmem:[#allocation7 + $0x34] sm:$0xf]  ;;  %v967_v3 = vor.u32 %v999_v1, %v966_v0  ;;  %v968_v4 = vld [vmem:[#allocation7 + $0x38] sm:$0xf0]  ;;  %v958_v5 = vld [vmem:[#allocation7 + $0x20] sm:$0xf] }
  0x11   :  { %v997_v6 = vld [vmem:[#allocation7 + $0x24] sm:$0xf0]  ;;  %v971_v7 = vor.u32 %v998_v2, %v968_v4  ;;  %v996_v8 = vld [vmem:[#allocation7 + $0x24] sm:$0xf]  ;;  %v960_v9 = vld [vmem:[#allocation7 + $0x28] sm:$0xf0] }
  0x12   :  { %162 = vmatpush.bf16.msra.mxu0 %v967_v3  ;;  %235 = vmatpush.bf16.msra.mxu2 %v967_v3  ;;  %v959_v10 = vor.u32 %v997_v6, %v958_v5  ;;  %v963_v11 = vor.u32 %v996_v8, %v960_v9  ;;  %v950_v12 = vld [vmem:[#allocation7 + $0x10] sm:$0xf]  ;;  %v995_v13 = vld [vmem:[#allocation7 + $0x14] sm:$0xf0]  ;;  %v994_v14 = vld [vmem:[#allocation7 + $0x14] sm:$0xf] }
  0x13   :  { %185 = vmatpush.bf16.msra.mxu1 %v971_v7  ;;  %258 = vmatpush.bf16.msra.mxu3 %v971_v7  ;;  %v952_v15 = vld [vmem:[#allocation7 + $0x18] sm:$0xf0]  ;;  %v951_v16 = vor.u32 %v995_v13, %v950_v12  ;;  %v942_v18 = vld [vmem:[#allocation7] sm:$0xf]  ;;  %v993_v19 = vld [vmem:[#allocation7 + $0x4] sm:$0xf0] }
  0x14   :  { %v955_v17 = vor.u32 %v994_v14, %v952_v15  ;;  %v992_v20 = vld [vmem:[#allocation7 + $0x4] sm:$0xf]  ;;  %v944_v21 = vld [vmem:[#allocation7 + $0x8] sm:$0xf0]  ;;  %v943_v22 = vor.u32 %v993_v19, %v942_v18  ;;  %v1000_v24 = vld [vmem:[#allocation2] sm:$0xff]  ;;  %vm148_vm0 = vcmask 523264  }
  0x15   :  { %v947_v23 = vor.u32 %v992_v20, %v944_v21  ;;  %v1002_v25 = vld [vmem:[#allocation5] sm:$0xff]  ;;  %v1001_v26 = vld [vmem:[#allocation2 + $0x8] sm:$0xff]  ;;  %v1003_v27 = vld [vmem:[#allocation5 + $0x8] sm:$0xff]  ;;  %v1245_v56 = vmov 0   ;;  %s1246_s0 = smov [#allocation8]   ;;  %s921_s5 = sshll.u32 %s1910_s3, 4  ;;  %s922_s5 = int_to_ptr.hbm [resolvable:$true] %s921_s5 }
  0x16   :  { %163 = vmatpush.bf16.msra.mxu0 %v959_v10  ;;  %236 = vmatpush.bf16.msra.mxu2 %v959_v10  ;;  %v94_v28 = vld [vmem:[#allocation2 + $0x10] sm:$0xf]  ;;  %v208_v29 = vld [vmem:[#allocation5 + $0x10] sm:$0xf]  ;;  %s919_s2 = sshll.u32 %s1246_s0, 4  ;;  %s920_s2 = int_to_ptr.vmem [resolvable:$true] %s919_s2 }
  0x17   :  { %186 = vmatpush.bf16.msra.mxu1 %v963_v11  ;;  %259 = vmatpush.bf16.msra.mxu3 %v963_v11  ;;  %v104_v30 = vunpack.c.l.b16 %v94_v28  ;;  %v218_v31 = vunpack.c.l.b16 %v208_v29 }
  0x18   :  { %1015 = vset.pattern.permute.xlu1 %v1245_v56  ;;  %1014 = vset.pattern.permute.xlu0 %v1245_v56 }
  0x19   :  { %v107_v32 = vpack.c.b16 %v104_v30, %v104_v30  ;;  %v221_v33 = vpack.c.b16 %v218_v31, %v218_v31 }
  0x1a   :  { %164 = vmatpush.bf16.msra.mxu0 %v951_v16  ;;  %237 = vmatpush.bf16.msra.mxu2 %v951_v16 }
  0x1b   :  { %187 = vmatpush.bf16.msra.mxu1 %v955_v17  ;;  %260 = vmatpush.bf16.msra.mxu3 %v955_v17 }
  0x1e   :  { %165 = vmatpush.bf16.msra.mxu0 %v943_v22  ;;  %238 = vmatpush.bf16.msra.mxu2 %v943_v22 }
  0x1f   :  { %188 = vmatpush.bf16.msra.mxu1 %v947_v23  ;;  %261 = vmatpush.bf16.msra.mxu3 %v947_v23 }
  0x21   :  { %972 = vmatmul.msk.bf16.vlgmr.msra.gmra.mxu0 %vm148_vm0, %v1000_v24  ;;  %986 = vmatmul.msk.bf16.vlgmr.msra.gmra.mxu2 %vm148_vm0, %v1002_v25 }
  0x22   :  { %975 = vmatmul.msk.bf16.vlgmr.msra.gmra.mxu1 %vm148_vm0, %v1000_v24  ;;  %989 = vmatmul.msk.bf16.vlgmr.msra.gmra.mxu3 %vm148_vm0, %v1002_v25 }
  0x31   :  { %973 = vmatmul.msk.bf16.gmra.mxu0 %vm148_vm0, %v1001_v26  ;;  %987 = vmatmul.msk.bf16.gmra.mxu2 %vm148_vm0, %v1003_v27 }
  0x32   :  { %976 = vmatmul.msk.bf16.gmra.mxu1 %vm148_vm0, %v1001_v26  ;;  %990 = vmatmul.msk.bf16.gmra.mxu3 %vm148_vm0, %v1003_v27 }
  0x41   :  { %974 = vmatmul.msk.bf16.gmra.mxu0 %vm148_vm0, %v107_v32  ;;  %988 = vmatmul.msk.bf16.gmra.mxu2 %vm148_vm0, %v221_v33 }
  0x42   :  { %977 = vmatmul.msk.bf16.gmra.mxu1 %vm148_vm0, %v107_v32  ;;  %991 = vmatmul.msk.bf16.gmra.mxu3 %vm148_vm0, %v221_v33 }
  0x9e   :  { %v167_v34 = vpop.f32.mrf.mxu0 }
  0x9f   :  { %v190_v35 = vpop.f32.mrf.mxu1  ;;  %v277_v36 = vmul.f32 %v167_v34, %v167_v34 }
  0xa0   :  { %v282_v37 = vmul.f32 %v190_v35, %v190_v35 }
  0xa1   :  { %v1288_v43 = vmax.f32 %v277_v36, 1e-08 }
  0xa2   :  { %v287_v42 = vadd.f32 %v282_v37, %v277_v36  ;;  %v1290_v46 = vmax.f32 %v282_v37, 1e-08 }
  0xa3   :  { %1016 = vrsqrt.f32 %v1288_v43 }
  0xa4   :  { %v240_v38 = vpop.f32.mrf.mxu2  ;;  %1940 = vst [vmem:[#allocation12_spill] sm:$0xff] %v1290_v46  ;;  %v1292_v49 = vmax.f32 %v287_v42, 1e-08  ;;  %1018 = vrsqrt.f32 %v1290_v46 }
  0xa5   :  { %v263_v39 = vpop.f32.mrf.mxu3  ;;  %v297_v44 = vmul.f32 %v240_v38, %v240_v38  ;;  %1020 = vlog2.f32 %v1288_v43 }
  0xa6   :  { %v169_v40 = vpop.f32.mrf.mxu0  ;;  %v302_v45 = vmul.f32 %v263_v39, %v263_v39  ;;  %1022 = vrsqrt.f32 %v1292_v49  ;;  %vm359_vm1 = vcmp.eq.f32.partialorder %v1292_v49, inf  ;;  %vm361_vm2 = vcmp.eq.f32.partialorder %v1292_v49, 0.0 }
  0xa7   :  { %v192_v41 = vpop.f32.mrf.mxu1  ;;  %v278_v47 = vmul.f32 %v169_v40, %v169_v40  ;;  %v1296_v53 = vmax.f32 %v297_v44, 1e-08  ;;  %1024 = vlog2.f32 %v1292_v49 }
  0xa8   :  { %v283_v48 = vmul.f32 %v192_v41, %v192_v41  ;;  %v307_v51 = vadd.f32 %v302_v45, %v297_v44  ;;  %v1331_v21 = vmax.f32 %v302_v45, 1e-08 }
  0xa9   :  { %v1298_v57 = vmax.f32 %v278_v47, 1e-08  ;;  %1026 = vlog2.f32 %v1296_v53  ;;  %v1310_v2 = vpop.eup %1016 }
  0xaa   :  { %v288_v54 = vadd.f32 %v283_v48, %v278_v47  ;;  %v1302_v61 = vmax.f32 %v283_v48, 1e-08  ;;  %v1304_v0 = vmax.f32 %v307_v51, 1e-08  ;;  %1943 = vst [vmem:[#allocation15_spill] sm:$0xff] %v1310_v2  ;;  %v1313_v4 = vpop.eup %1018  ;;  %v859_v34 = vadd.f32 %v1331_v21, %v1296_v53 }
  0xab   :  { %1941 = vst [vmem:[#allocation13_spill] sm:$0xff] %v1298_v57  ;;  %1028 = vrsqrt.f32 %v1298_v57  ;;  %v1318_v8 = vpop.eup %1020 }
  0xac   :  { %v242_v50 = vpop.f32.mrf.mxu2  ;;  %1942 = vst [vmem:[#allocation14_spill] sm:$0xff] %v1302_v61  ;;  %v1307_v1 = vmax.f32 %v288_v54, 1e-08  ;;  %1030 = vrsqrt.f32 %v1302_v61  ;;  %v1323_v12 = vpop.eup %1022  ;;  %vm419_vm9 = vcmp.eq.f32.partialorder %v1304_v0, inf  ;;  %vm421_vm11 = vcmp.eq.f32.partialorder %v1304_v0, 0.0 }
  0xad   :  { %v265_v52 = vpop.f32.mrf.mxu3  ;;  %v298_v58 = vmul.f32 %v242_v50, %v242_v50  ;;  %1944 = vst [vmem:[#allocation16_spill] sm:$0xff] %v1313_v4  ;;  %1032 = vlog2.f32 %v1304_v0  ;;  %v1025_v16 = vpop.eup %1024  ;;  %v353_v35 = vmul.f32 %v1323_v12, %v1292_v49 }
  0xae   :  { %v172_v55 = vpop.f32.mrf.mxu0  ;;  %v303_v59 = vmul.f32 %v265_v52, %v265_v52  ;;  %1034 = vrsqrt.f32 %v1307_v1  ;;  %1947 = vst [vmem:[#allocation19_spill] sm:$0xff] %v1331_v21  ;;  %vm371_vm3 = vcmp.eq.f32.partialorder %v1307_v1, inf  ;;  %vm373_vm4 = vcmp.eq.f32.partialorder %v1307_v1, 0.0 }
  0xaf   :  { %v195_v60 = vpop.f32.mrf.mxu1  ;;  %v279_v62 = vmul.f32 %v172_v55, %v172_v55  ;;  %v1316_v5 = vmax.f32 %v298_v58, 1e-08  ;;  %1036 = vlog2.f32 %v1307_v1  ;;  %v1027_v20 = vpop.eup %1026 }
  0xb0   :  { %v284_v63 = vmul.f32 %v195_v60, %v195_v60  ;;  %v308_v3 = vadd.f32 %v303_v59, %v298_v58  ;;  %v1343_v27 = vmax.f32 %v303_v59, 1e-08 }
  0xb1   :  { %v1320_v9 = vmax.f32 %v279_v62, 1e-08  ;;  %1038 = vlog2.f32 %v1316_v5  ;;  %v1338_v24 = vpop.eup %1028 }
  0xb2   :  { %v289_v6 = vadd.f32 %v284_v63, %v279_v62  ;;  %v1326_v13 = vmax.f32 %v284_v63, 1e-08  ;;  %v1328_v17 = vmax.f32 %v308_v3, 1e-08  ;;  %1948 = vst [vmem:[#allocation20_spill] sm:$0xff] %v1338_v24  ;;  %v1341_v26 = vpop.eup %1030  ;;  %v860_v47 = vadd.f32 %v1343_v27, %v1316_v5 }
  0xb3   :  { %1945 = vst [vmem:[#allocation17_spill] sm:$0xff] %v1320_v9  ;;  %1040 = vrsqrt.f32 %v1320_v9  ;;  %v1033_v30 = vpop.eup %1032  ;;  %v864_v62 = vsub.f32 %v859_v34, %v1304_v0  ;;  %v354_v63 = vmul.f32 %v1323_v12, %v353_v35  ;;  %v515_v34 = vmul.f32 0.6931472, %v1027_v20 }
  0xb4   :  { %v245_v7 = vpop.f32.mrf.mxu2  ;;  %1946 = vst [vmem:[#allocation18_spill] sm:$0xff] %v1326_v13  ;;  %v1333_v22 = vmax.f32 %v289_v6, 1e-08  ;;  %1042 = vrsqrt.f32 %v1326_v13  ;;  %v1352_v32 = vpop.eup %1034  ;;  %vm431_vm13 = vcmp.eq.f32.partialorder %v1328_v17, inf  ;;  %vm433_vm14 = vcmp.eq.f32.partialorder %v1328_v17, 0.0 }
  0xb5   :  { %v299_v10 = vmul.f32 %v245_v7, %v245_v7  ;;  %v268_v11 = vpop.f32.mrf.mxu3  ;;  %1949 = vst [vmem:[#allocation21_spill] sm:$0xff] %v1341_v26  ;;  %1044 = vlog2.f32 %v1328_v17  ;;  %v1037_v36 = vpop.eup %1036 }
  0xb6   :  { %v304_v14 = vmul.f32 %v268_v11, %v268_v11  ;;  %v174_v15 = vpop.f32.mrf.mxu0  ;;  %1950 = vst [vmem:[#allocation22_spill] sm:$0xff] %v1343_v27  ;;  %1046 = vrsqrt.f32 %v1333_v22  ;;  %vm383_vm5 = vcmp.eq.f32.partialorder %v1333_v22, inf  ;;  %vm385_vm6 = vcmp.eq.f32.partialorder %v1333_v22, 0.0 }
  0xb7   :  { %v280_v18 = vmul.f32 %v174_v15, %v174_v15  ;;  %v197_v19 = vpop.f32.mrf.mxu1  ;;  %v1346_v28 = vmax.f32 %v299_v10, 1e-08  ;;  %1048 = vlog2.f32 %v1333_v22  ;;  %v1364_v41 = vpop.eup %1038  ;;  %v328_v15 = vmul.f32 0.6931472, %v1025_v16 }
  0xb8   :  { %v1335_v23 = vmul.f32 %v197_v19, %v197_v19  ;;  %v309_v25 = vadd.f32 %v304_v14, %v299_v10  ;;  %v1361_v38 = vmax.f32 %v304_v14, 1e-08  ;;  %v865_v10 = vsub.f32 %v860_v47, %v1328_v17 }
  0xb9   :  { %v1349_v31 = vmax.f32 %v280_v18, 1e-08  ;;  %1050 = vlog2.f32 %v1346_v28  ;;  %v1371_v48 = vpop.eup %1040  ;;  %v318_v14 = vmul.f32 0.6931472, %v1033_v30 }
  0xba   :  { %v290_v29 = vadd.f32 %v1335_v23, %v280_v18  ;;  %v1359_v37 = vmax.f32 %v309_v25, 1e-08  ;;  %1952 = vst [vmem:[#allocation24_spill] sm:$0xff] %v1361_v38  ;;  %v1374_v52 = vpop.eup %1042  ;;  %v861_v60 = vadd.f32 %v1361_v38, %v1346_v28  ;;  %v525_v18 = vmul.f32 0.6931472, %v1318_v8 }
  0xbb   :  { %1951 = vst [vmem:[#allocation23_spill] sm:$0xff] %v1349_v31  ;;  %1052 = vrsqrt.f32 %v1349_v31  ;;  %v1045_v59 = vpop.eup %1044  ;;  %v355_v8 = vmul.f32 0.5, %v354_v63 }
  0xbc   :  { %v247_v33 = vpop.f32.mrf.mxu2  ;;  %v1366_v42 = vmax.f32 %v290_v29, 1e-08  ;;  %1953 = vst [vmem:[#allocation25_spill] sm:$0xff] %v1371_v48  ;;  %1054 = vlog2.f32 %v1359_v37  ;;  %v1387_v3 = vpop.eup %1046  ;;  %v866_v16 = vsub.f32 %v861_v60, %v1359_v37  ;;  %v320_v47 = vmul.f32 0.6931472, %v1045_v59 }
  0xbd   :  { %v300_v39 = vmul.f32 %v247_v33, %v247_v33  ;;  %v270_v40 = vpop.f32.mrf.mxu3  ;;  %1954 = vst [vmem:[#allocation26_spill] sm:$0xff] %v1374_v52  ;;  %v1049_v11 = vpop.eup %1048  ;;  %v337_v52 = vsub.f32 %v318_v14, %v328_v15  ;;  %vm443_vm15 = vcmp.eq.f32.partialorder %v1359_v37, inf  ;;  %vm445_vm0 = vcmp.eq.f32.partialorder %v1359_v37, 0.0 }
  0xbe   :  { %v305_v44 = vmul.f32 %v270_v40, %v270_v40  ;;  %v177_v45 = vpop.f32.mrf.mxu0  ;;  %1056 = vrsqrt.f32 %v1366_v42  ;;  %vm395_vm7 = vcmp.eq.f32.partialorder %v1366_v42, inf  ;;  %vm397_vm8 = vcmp.eq.f32.partialorder %v1366_v42, 0.0 }
  0xbf   :  { %v281_v50 = vmul.f32 %v177_v45, %v177_v45  ;;  %v200_v51 = vpop.f32.mrf.mxu1  ;;  %v1376_v54 = vmax.f32 %v300_v39, 1e-08  ;;  %1058 = vlog2.f32 %v1366_v42  ;;  %v1396_v19 = vpop.eup %1050  ;;  %v877_v45 = vadd.f32 %v865_v10, %v864_v62 }
  0xc0   :  { %v310_v55 = vadd.f32 %v305_v44, %v300_v39  ;;  %v1378_v56 = vmax.f32 %v305_v44, 1e-08  ;;  %v1380_v58 = vmul.f32 %v200_v51, %v200_v51 }
  0xc1   :  { %1060 = vlog2.f32 %v1376_v54  ;;  %v1403_v35 = vpop.eup %1052  ;;  %v1417_v62 = vmax.f32 %v281_v50, 1e-08  ;;  %v878_v10 = vadd.f32 %v877_v45, %v866_v16 }
  0xc2   :  { %1955 = vst [vmem:[#allocation27_spill] sm:$0xff] %v1378_v56  ;;  %v1390_v6 = vmax.f32 %v310_v55, 1e-08  ;;  %v291_v7 = vadd.f32 %v1380_v58, %v281_v50  ;;  %v862_v33 = vadd.f32 %v1378_v56, %v1376_v54  ;;  %v1055_v51 = vpop.eup %1054  ;;  %v365_v50 = vmul.f32 %v1352_v32, %v1307_v1 }
  0xc3   :  { %1956 = vst [vmem:[#allocation28_spill] sm:$0xff] %v1403_v35 }
  0xc4   :  { %v1398_v25 = vmax.f32 %v291_v7, 1e-08  ;;  %v250_v29 = vpop.f32.mrf.mxu2  ;;  %1062 = vlog2.f32 %v1390_v6  ;;  %v330_v7 = vmul.f32 0.6931472, %v1037_v36  ;;  %v867_v63 = vsub.f32 %v862_v33, %v1390_v6 }
  0xc5   :  { %v301_v39 = vmul.f32 %v250_v29, %v250_v29  ;;  %v273_v30 = vpop.f32.mrf.mxu3  ;;  %v1411_v29 = vpop.eup %1056  ;;  %v534_v33 = vsub.f32 %v515_v34, %v525_v18 }
  0xc6   :  { %v306_v40 = vmul.f32 %v273_v30, %v273_v30  ;;  %v179_v44 = vpop.f32.mrf.mxu0  ;;  %1064 = vlog2.f32 %v1398_v25  ;;  %v1059_v59 = vpop.eup %1058  ;;  %v356_v30 = vsub.f32 1.5, %v355_v8  ;;  %v879_v45 = vadd.f32 %v878_v10, %v867_v63 }
  0xc7   :  { %v1408_v55 = vmax.f32 %v301_v39, 1e-08  ;;  %v202_v20 = vpop.f32.mrf.mxu1  ;;  %1066 = vlog2.f32 %v1298_v57  ;;  %v1061_v36 = vpop.eup %1060  ;;  %v1434_v63 = vand.u32 2147483647, %v534_v33  ;;  %vm407_vm10 = vcmp.eq.f32.partialorder %v1398_v25, inf }
  0xc8   :  { %v311_v60 = vadd.f32 %v306_v40, %v301_v39  ;;  %v1413_v26 = vmax.f32 %v306_v40, 1e-08  ;;  %1068 = vlog2.f32 %v1320_v9  ;;  %v338_v39 = vsub.f32 %v320_v47, %v330_v7 }
  0xc9   :  { %1070 = vlog2.f32 %v1408_v55  ;;  %v342_v20 = vand.u32 2147483647, %v337_v52  ;;  %v322_v47 = vmul.f32 0.6931472, %v1055_v51  ;;  %v332_v7 = vmul.f32 0.6931472, %v1049_v11 }
  0xca   :  { %1957 = vst [vmem:[#allocation29_spill] sm:$0xff] %v1413_v26  ;;  %v1420_v14 = vmax.f32 %v311_v60, 1e-08  ;;  %v863_v15 = vadd.f32 %v1413_v26, %v1408_v55  ;;  %1072 = vlog2.f32 %v1349_v31  ;;  %v1063_v40 = vpop.eup %1062  ;;  %v343_v18 = vand.u32 2147483647, %v338_v39 }
  0xcb   :  { %1074 = vlog2.f32 %v1417_v62  ;;  %v357_v34 = vmul.f32 %v1323_v12, %v356_v30  ;;  %v1439_v11 = vmax.f32 %v1335_v23, 1e-08  ;;  %v324_v51 = vmul.f32 0.6931472, %v1063_v40 }
  0xcc   :  { %v1065_v16 = vpop.eup %1064  ;;  %v252_v44 = vpop.f32.mrf.mxu2  ;;  %v868_v8 = vsub.f32 %v863_v15, %v1420_v14  ;;  %1076 = vlog2.f32 %v1420_v14  ;;  %v517_v15 = vmul.f32 0.6931472, %v1364_v41  ;;  %v1441_v10 = vmul.f32 0.5, %v342_v20 }
  0xcd   :  { %v1067_v60 = vpop.eup %1066  ;;  %v275_v4 = vpop.f32.mrf.mxu3  ;;  %1078 = vlog2.f32 %v1331_v21  ;;  %v1445_v30 = vmax.f32 %v1380_v58, 1e-08  ;;  %v339_v41 = vsub.f32 %v322_v47, %v332_v7  ;;  %v519_v39 = vmul.f32 0.6931472, %v1396_v19 }
  0xce   :  { %v1069_v35 = vpop.eup %1068  ;;  %v880_v31 = vadd.f32 %v879_v45, %v868_v8  ;;  %1080 = vlog2.f32 %v1343_v27  ;;  %v366_v4 = vmul.f32 %v1352_v32, %v365_v50  ;;  %v334_v50 = vmul.f32 0.6931472, %v1059_v59 }
  0xcf   :  { %v1071_v44 = vpop.eup %1070  ;;  %1082 = vlog2.f32 %v1361_v38  ;;  %v1449_v8 = vmul.f32 0.5, %v343_v18  ;;  %v1453_v23 = vmul.f32 %v357_v34, %v1292_v49  ;;  %v527_v40 = vmul.f32 0.6931472, %v1067_v60 }
  0xd0   :  { %v1073_v52 = vpop.eup %1072  ;;  %900 = vperm.xlu1 %1015, %v880_v31   ;;  %1084 = vlog2.f32 %v1378_v56  ;;  %v529_v45 = vmul.f32 0.6931472, %v1069_v35  ;;  %v1456_v58 = vmul.f32 0.5, %v366_v4  ;;  %v340_v19 = vsub.f32 %v324_v51, %v334_v50 }
  0xd1   :  { %v1075_v12 = vpop.eup %1074  ;;  %1086 = vlog2.f32 %v1413_v26  ;;  %v521_v47 = vmul.f32 0.6931472, %v1061_v36  ;;  %v377_v59 = vmul.f32 %v1387_v3, %v1333_v22  ;;  %v336_v18 = vmul.f32 0.6931472, %v1065_v16 }
  0xd2   :  { %v1077_v33 = vpop.eup %1076  ;;  %1088 = vlog2.f32 %v1290_v46  ;;  %v344_v46 = vand.u32 2147483647, %v339_v41  ;;  %v535_v34 = vsub.f32 %v517_v15, %v527_v40  ;;  %v523_v26 = vmul.f32 0.6931472, %v1071_v44 }
  0xd3   :  { %v1079_v31 = vpop.eup %1078  ;;  %1090 = vlog2.f32 %v1302_v61  ;;  %v326_v35 = vmul.f32 0.6931472, %v1077_v33  ;;  %v533_v61 = vmul.f32 0.6931472, %v1075_v12  ;;  %v531_v51 = vmul.f32 0.6931472, %v1073_v52 }
  0xd4   :  { %v1081_v20 = vpop.eup %1080  ;;  %1092 = vlog2.f32 %v1326_v13  ;;  %v536_v36 = vsub.f32 %v519_v39, %v529_v45  ;;  %v545_v50 = vmul.f32 0.6931472, %v1079_v31  ;;  %v368_v13 = vsub.f32 1.5, %v1456_v58 }
  0xd5   :  { %v1083_v7 = vpop.eup %1082  ;;  %1094 = vlog2.f32 %v1439_v11  ;;  %v345_v38 = vand.u32 2147483647, %v340_v19  ;;  %v547_v27 = vmul.f32 0.6931472, %v1081_v20  ;;  %v378_v16 = vmul.f32 %v1387_v3, %v377_v59 }
  0xd6   :  { %v1085_v60 = vpop.eup %1084  ;;  %1096 = vlog2.f32 %v1445_v30  ;;  %v389_v15 = vmul.f32 %v1411_v29, %v1366_v42  ;;  %v537_v33 = vsub.f32 %v521_v47, %v531_v51  ;;  %v540_v44 = vand.u32 2147483647, %v535_v34 }
  0xd7   :  { %v1087_v4 = vpop.eup %1086  ;;  %v549_v12 = vmul.f32 0.6931472, %v1083_v7  ;;  %v341_v48 = vsub.f32 %v326_v35, %v336_v18  ;;  %v538_v52 = vsub.f32 %v523_v26, %v533_v61  ;;  %v551_v39 = vmul.f32 0.6931472, %v1085_v60 }
  0xd8   :  { %v1089_v56 = vpop.eup %1088  ;;  %v541_v58 = vand.u32 2147483647, %v536_v36  ;;  %v553_v9 = vmul.f32 0.6931472, %v1087_v4  ;;  %v390_v2 = vmul.f32 %v1411_v29, %v389_v15  ;;  %1098 = vrsqrt.f32 %v1398_v25 }
  0xd9   :  { %v1091_v41 = vpop.eup %1090  ;;  %v555_v40 = vmul.f32 0.6931472, %v1089_v56  ;;  %v542_v47 = vand.u32 2147483647, %v537_v33  ;;  %v346_v18 = vand.u32 2147483647, %v341_v48  ;;  %v369_v48 = vmul.f32 %v1352_v32, %v368_v13 }
  0xda   :  { %v1093_v21 = vpop.eup %1092  ;;  %v557_v31 = vmul.f32 0.6931472, %v1091_v41  ;;  %v543_v61 = vand.u32 2147483647, %v538_v52  ;;  %v379_v51 = vmul.f32 0.5, %v378_v16  ;;  %v391_v15 = vmul.f32 0.5, %v390_v2 }
  0xdb   :  { %v1095_v45 = vpop.eup %1094  ;;  %v559_v19 = vmul.f32 0.6931472, %v1093_v21  ;;  %v564_v20 = vsub.f32 %v545_v50, %v555_v40  ;;  %1100 = vrsqrt.f32 %v1304_v0  ;;  %vm409_vm12 = vcmp.eq.f32.partialorder %v1398_v25, 0.0 }
  0xdc   :  { %v1097_v24 = vpop.eup %1096  ;;  %v561_v59 = vmul.f32 0.6931472, %v1095_v45  ;;  %v565_v57 = vsub.f32 %v547_v27, %v557_v31  ;;  %v1471_v27 = vmul.f32 0.5, %v344_v46  ;;  %v380_v52 = vsub.f32 1.5, %v379_v51 }
  0xdd   :  { %v563_v7 = vmul.f32 0.6931472, %v1097_v24  ;;  %v566_v56 = vsub.f32 %v549_v12, %v559_v19  ;;  %v569_v34 = vand.u32 2147483647, %v564_v20  ;;  %v392_v31 = vsub.f32 1.5, %v391_v15 }
  0xde   :  { %v567_v26 = vsub.f32 %v551_v39, %v561_v59  ;;  %v570_v60 = vand.u32 2147483647, %v565_v57  ;;  %v1474_v12 = vpop.eup %1098  ;;  %v1476_v57 = vmul.f32 0.5, %v345_v38  ;;  %1102 = vrsqrt.f32 %v1439_v11 }
  0xdf   :  { %v568_v35 = vsub.f32 %v553_v9, %v563_v7  ;;  %v571_v21 = vand.u32 2147483647, %v566_v56  ;;  %v574_v4 = vadd.f32 %v569_v34, %v1434_v63  ;;  %v1479_v63 = vmul.f32 0.5, %v346_v18 }
  0xe0   :  { %v572_v36 = vand.u32 2147483647, %v567_v26  ;;  %v575_v50 = vadd.f32 %v570_v60, %v540_v44  ;;  %v401_v38 = vmul.f32 %v1474_v12, %v1398_v25  ;;  %1104 = vrsqrt.f32 %v1417_v62 }
  0xe1   :  { %v573_v41 = vand.u32 2147483647, %v568_v35  ;;  %v576_v24 = vadd.f32 %v571_v21, %v541_v58  ;;  %v579_v33 = vmul.f32 0.5, %v574_v4  ;;  %v362_v19 = vand.u32 2147483648, %v1292_v49  ;;  %v1101_v7 = vpop.eup %1100 }
  0xe2   :  { %v577_v40 = vadd.f32 %v572_v36, %v542_v47  ;;  %v580_v9 = vmul.f32 0.5, %v575_v50  ;;  %v360_v20 = vsel %vm359_vm1, %v1292_v49, %v1453_v23  ;;  %v370_v59 = vmul.f32 %v369_v48, %v1307_v1 }
  0xe3   :  { %v578_v46 = vadd.f32 %v573_v41, %v543_v61  ;;  %v581_v16 = vmul.f32 0.5, %v576_v24  ;;  %v584_v2 = vsub.f32 %v579_v33, %v1441_v10  ;;  %v381_v47 = vmul.f32 %v1387_v3, %v380_v52 }
  0xe4   :  { %v582_v44 = vmul.f32 0.5, %v577_v40  ;;  %v585_v39 = vsub.f32 %v580_v9, %v1449_v8  ;;  %1106 = vrsqrt.f32 %v1328_v17  ;;  %v393_v18 = vmul.f32 %v1411_v29, %v392_v31  ;;  %v1508_v60 = vpop.eup %1102 }
  0xe5   :  { %v583_v13 = vmul.f32 0.5, %v578_v46  ;;  %v586_v32 = vsub.f32 %v581_v16, %v1471_v27  ;;  %1108 = vrsqrt.f32 %v1359_v37  ;;  %v402_v23 = vmul.f32 %v1474_v12, %v401_v38 }
  0xe6   :  { %v587_v45 = vsub.f32 %v582_v44, %v1476_v57  ;;  %v869_v58 = vadd.f32 %v585_v39, %v584_v2  ;;  %1110 = vrsqrt.f32 %v1445_v30  ;;  %v413_v61 = vmul.f32 %v1101_v7, %v1304_v0  ;;  %v1513_v21 = vpop.eup %1104 }
  0xe7   :  { %v588_v56 = vsub.f32 %v583_v13, %v1479_v63  ;;  %v1504_v3 = vsel %vm361_vm2, %v362_v19, %v360_v20  ;;  %1112 = vrsqrt.f32 %v1390_v6  ;;  %v372_v29 = vsel %vm371_vm3, %v1307_v1, %v370_v59 }
  0xe8   :  { %v870_v34 = vadd.f32 %v869_v58, %v586_v32  ;;  %v382_v35 = vmul.f32 %v381_v47, %v1333_v22  ;;  %v414_v49 = vmul.f32 %v1101_v7, %v413_v61  ;;  %v374_v51 = vand.u32 2147483648, %v1307_v1 }
  0xe9   :  { %v394_v36 = vmul.f32 %v393_v18, %v1366_v42  ;;  %1114 = vrsqrt.f32 %v1420_v14  ;;  %v403_v15 = vmul.f32 0.5, %v402_v23  ;;  %v386_v48 = vand.u32 2147483648, %v1333_v22 }
  0xea   :  { %v871_v26 = vadd.f32 %v870_v34, %v587_v45  ;;  %v1107_v50 = vpop.eup %1106  ;;  %v415_v41 = vmul.f32 0.5, %v414_v49  ;;  %1116 = vrsqrt.f32 %v1296_v53  ;;  %v1520_v33 = vsel %vm373_vm4, %v374_v51, %v372_v29 }
  0xeb   :  { %v1109_v24 = vpop.eup %1108  ;;  %v425_v1 = vmul.f32 %v1107_v50, %v1328_v17  ;;  %v384_v9 = vsel %vm383_vm5, %v1333_v22, %v382_v35  ;;  %1118 = vrsqrt.f32 %v1316_v5  ;;  %v396_v52 = vsel %vm395_vm7, %v1366_v42, %v394_v36 }
  0xec   :  { %v872_v4 = vadd.f32 %v871_v26, %v588_v56  ;;  %v1525_v40 = vpop.eup %1110  ;;  %v437_v46 = vmul.f32 %v1109_v24, %v1359_v37  ;;  %v416_v44 = vsub.f32 1.5, %v415_v41  ;;  %v404_v39 = vsub.f32 1.5, %v403_v15 }
  0xed   :  { %v1113_v16 = vpop.eup %1112  ;;  %v426_v2 = vmul.f32 %v1107_v50, %v425_v1  ;;  %1120 = vrsqrt.f32 %v1346_v28  ;;  %v1537_v38 = vsel %vm385_vm6, %v386_v48, %v384_v9  ;;  %v398_v45 = vand.u32 2147483648, %v1366_v42 }
  0xee   :  { %886 = vperm.xlu0 %1014, %v872_v4   ;;  %v438_v31 = vmul.f32 %v1109_v24, %v437_v46  ;;  %v449_v13 = vmul.f32 %v1113_v16, %v1390_v6  ;;  %v410_v58 = vand.u32 2147483648, %v1398_v25  ;;  %v417_v22 = vmul.f32 %v1101_v7, %v416_v44 }
  0xef   :  { %v1115_v32 = vpop.eup %1114  ;;  %v427_v19 = vmul.f32 0.5, %v426_v2  ;;  %v1547_v34 = vsel %vm397_vm8, %v398_v45, %v396_v52  ;;  %v405_v26 = vmul.f32 %v1474_v12, %v404_v39  ;;  %1122 = vrsqrt.f32 %v1376_v54 }
  0xf0   :  { %v1541_v20 = vpop.eup %1116  ;;  %v439_v59 = vmul.f32 0.5, %v438_v31  ;;  %v450_v47 = vmul.f32 %v1113_v16, %v449_v13  ;;  %v461_v56 = vmul.f32 %v1115_v32, %v1420_v14  ;;  %v418_v12 = vmul.f32 %v417_v22, %v1304_v0 }
  0xf1   :  { %v428_v18 = vsub.f32 1.5, %v427_v19  ;;  %v590_v23 = vmul.f32 %v1541_v20, %v1296_v53  ;;  %v1552_v61 = vpop.eup %1118  ;;  %v422_v48 = vand.u32 2147483648, %v1304_v0  ;;  %v406_v1 = vmul.f32 %v405_v26, %v1398_v25 }
  0xf2   :  { %v440_v29 = vsub.f32 1.5, %v439_v59  ;;  %v451_v35 = vmul.f32 0.5, %v450_v47  ;;  %v462_v49 = vmul.f32 %v1115_v32, %v461_v56  ;;  %v602_v51 = vmul.f32 %v1552_v61, %v1316_v5 }
  0xf3   :  { %v429_v4 = vmul.f32 %v1107_v50, %v428_v18  ;;  %v591_v42 = vmul.f32 %v1541_v20, %v590_v23  ;;  %v1559_v7 = vpop.eup %1120  ;;  %v434_v39 = vand.u32 2147483648, %v1328_v17  ;;  %v420_v13 = vsel %vm419_vm9, %v1304_v0, %v418_v12 }
  0xf4   :  { %v441_v36 = vmul.f32 %v1109_v24, %v440_v29  ;;  %v452_v15 = vsub.f32 1.5, %v451_v35  ;;  %v463_v41 = vmul.f32 0.5, %v462_v49  ;;  %v614_v50 = vmul.f32 %v1559_v7, %v1346_v28 }
  0xf5   :  { %v430_v9 = vmul.f32 %v429_v4, %v1328_v17  ;;  %v603_v24 = vmul.f32 %v1552_v61, %v602_v51  ;;  %v592_v2 = vmul.f32 0.5, %v591_v42  ;;  %v446_v45 = vand.u32 2147483648, %v1359_v37 }
  0xf6   :  { %v464_v46 = vsub.f32 1.5, %v463_v41  ;;  %v442_v52 = vmul.f32 %v441_v36, %v1359_v37  ;;  %v453_v44 = vmul.f32 %v1113_v16, %v452_v15  ;;  %v615_v31 = vmul.f32 %v1559_v7, %v614_v50  ;;  %v1583_v16 = vpop.eup %1122 }
  0xf7   :  { %vm455_vm1 = vcmp.eq.f32.partialorder %v1390_v6, inf  ;;  %vm457_vm2 = vcmp.eq.f32.partialorder %v1390_v6, 0.0  ;;  %v408_v19 = vsel %vm407_vm10, %v1398_v25, %v406_v1  ;;  %v432_v59 = vsel %vm431_vm13, %v1328_v17, %v430_v9 }
  0xf8   :  { %v465_v47 = vmul.f32 %v1115_v32, %v464_v46  ;;  %v604_v56 = vmul.f32 0.5, %v603_v24  ;;  %v444_v22 = vsel %vm443_vm15, %v1359_v37, %v442_v52  ;;  %v454_v18 = vmul.f32 %v453_v44, %v1390_v6  ;;  %v1958_v52 = vld [vmem:[#allocation15_spill] sm:$0xff] }
  0xf9   :  { %v458_v23 = vand.u32 2147483648, %v1390_v6  ;;  %v593_v26 = vsub.f32 1.5, %v592_v2  ;;  %v423_v29 = vsel %vm421_vm11, %v422_v48, %v420_v13  ;;  %vm467_vm3 = vcmp.eq.f32.partialorder %v1420_v14, inf  ;;  %v1960_v13 = vld [vmem:[#allocation20_spill] sm:$0xff] }
  0xfa   :  { %vm469_vm4 = vcmp.eq.f32.partialorder %v1420_v14, 0.0  ;;  %v616_v35 = vmul.f32 0.5, %v615_v31  ;;  %v411_v49 = vsel %vm409_vm12, %v410_v58, %v408_v19  ;;  %v435_v32 = vsel %vm433_vm14, %v434_v39, %v432_v59  ;;  %v1959_v31 = vld [vmem:[#allocation13_spill] sm:$0xff] }
  0xfb   :  { %v470_v4 = vand.u32 2147483648, %v1420_v14  ;;  %v626_v42 = vmul.f32 %v1583_v16, %v1376_v54  ;;  %v447_v51 = vsel %vm445_vm0, %v446_v45, %v444_v22  ;;  %v466_v36 = vmul.f32 %v465_v47, %v1420_v14 }
  0xfc   :  { %vm596_vm5 = vcmp.eq.f32.partialorder %v1296_v53, inf  ;;  %v605_v15 = vsub.f32 1.5, %v604_v56  ;;  %v456_v25 = vsel %vm455_vm1, %v1390_v6, %v454_v18  ;;  %v472_v58 = vsub.f32 %v423_v29, %v1504_v3 }
  0xfd   :  { %v594_v41 = vmul.f32 %v1541_v20, %v593_v26  ;;  %v627_v12 = vmul.f32 %v1583_v16, %v626_v42  ;;  %v473_v48 = vsub.f32 %v435_v32, %v1520_v33  ;;  %v599_v50 = vand.u32 2147483648, %v1296_v53  ;;  %v1962_v26 = vld [vmem:[#allocation25_spill] sm:$0xff] }
  0xfe   :  { %v617_v1 = vsub.f32 1.5, %v616_v35  ;;  %1124 = vrsqrt.f32 %v1408_v55  ;;  %v474_v9 = vsub.f32 %v447_v51, %v1537_v38  ;;  %vm598_vm6 = vcmp.eq.f32.partialorder %v1296_v53, 0.0  ;;  %v1963_v51 = vld [vmem:[#allocation23_spill] sm:$0xff] }
  0xff   :  { %vm608_vm7 = vcmp.eq.f32.partialorder %v1316_v5, inf  ;;  %v611_v46 = vand.u32 2147483648, %v1316_v5  ;;  %v628_v3 = vmul.f32 0.5, %v627_v12  ;;  %v459_v20 = vsel %vm457_vm2, %v458_v23, %v456_v25  ;;  %v1961_v23 = vld [vmem:[#allocation17_spill] sm:$0xff] }
 0x100   :  { %v468_v33 = vsel %vm467_vm3, %v1420_v14, %v466_v36  ;;  %v606_v24 = vmul.f32 %v1552_v61, %v605_v15  ;;  %v650_v44 = vmul.f32 %v1958_v52, %v1288_v43  ;;  %v1630_v38 = vmul.f32 %v472_v58, %v472_v58  ;;  %v1964_v36 = vld [vmem:[#allocation28_spill] sm:$0xff] }
 0x101   :  { %v595_v2 = vmul.f32 %v594_v41, %v1296_v53  ;;  %vm620_vm8 = vcmp.eq.f32.partialorder %v1346_v28, inf  ;;  %v623_v39 = vand.u32 2147483648, %v1346_v28  ;;  %v662_v45 = vmul.f32 %v1960_v13, %v1959_v31 }
 0x102   :  { %v1637_v19 = vmul.f32 %v473_v48, %v473_v48  ;;  %v618_v59 = vmul.f32 %v1559_v7, %v617_v1  ;;  %v629_v47 = vsub.f32 1.5, %v628_v3  ;;  %v651_v61 = vmul.f32 %v1958_v52, %v650_v44 }
 0x103   :  { %v471_v56 = vsel %vm469_vm4, %v470_v4, %v468_v33  ;;  %v475_v22 = vsub.f32 %v459_v20, %v1547_v34  ;;  %vm610_vm9 = vcmp.eq.f32.partialorder %v1316_v5, 0.0  ;;  %v663_v18 = vmul.f32 %v1960_v13, %v662_v45 }
 0x104   :  { %v674_v29 = vmul.f32 %v1962_v26, %v1961_v23  ;;  %v1125_v35 = vpop.eup %1124  ;;  %v1648_v32 = vmul.f32 %v474_v9, %v474_v9  ;;  %v607_v7 = vmul.f32 %v606_v24, %v1316_v5  ;;  %vm622_vm10 = vcmp.eq.f32.partialorder %v1346_v28, 0.0 }
 0x105   :  { %v652_v42 = vmul.f32 0.5, %v651_v61  ;;  %v686_v4 = vmul.f32 %v1964_v36, %v1963_v51  ;;  %v597_v34 = vsel %vm596_vm5, %v1296_v53, %v595_v2  ;;  %v638_v15 = vmul.f32 %v1125_v35, %v1408_v55 }
 0x106   :  { %v664_v25 = vmul.f32 0.5, %v663_v18  ;;  %v675_v58 = vmul.f32 %v1962_v26, %v674_v29  ;;  %v1659_v41 = vsub.f32 %v471_v56, %v411_v49  ;;  %v619_v12 = vmul.f32 %v618_v59, %v1346_v28 }
 0x107   :  { %v630_v48 = vmul.f32 %v1583_v16, %v629_v47  ;;  %vm632_vm11 = vcmp.eq.f32.partialorder %v1376_v54, inf  ;;  %v687_v1 = vmul.f32 %v1964_v36, %v686_v4  ;;  %v639_v9 = vmul.f32 %v1125_v35, %v638_v15 }
 0x108   :  { %v653_v3 = vsub.f32 1.5, %v652_v42  ;;  %v665_v20 = vsub.f32 1.5, %v664_v25  ;;  %v676_v33 = vmul.f32 0.5, %v675_v58  ;;  %v1665_v24 = vmul.f32 %v475_v22, %v475_v22 }
 0x109   :  { %v1669_v44 = vsel %vm598_vm6, %v599_v50, %v597_v34  ;;  %v609_v49 = vsel %vm608_vm7, %v1316_v5, %v607_v7  ;;  %v688_v2 = vmul.f32 0.5, %v687_v1  ;;  %vm634_vm12 = vcmp.eq.f32.partialorder %v1376_v54, 0.0  ;;  %v1965_v34 = vld [vmem:[#allocation19_spill] sm:$0xff] }
 0x10a   :  { %v640_v16 = vmul.f32 0.5, %v639_v9  ;;  %v677_v45 = vsub.f32 1.5, %v676_v33  ;;  %v698_v59 = vmul.f32 %v1513_v21, %v1417_v62  ;;  %v621_v47 = vsel %vm620_vm8, %v1346_v28, %v619_v12 }
 0x10b   :  { %v631_v53 = vmul.f32 %v630_v48, %v1376_v54  ;;  %v635_v50 = vand.u32 2147483648, %v1376_v54  ;;  %v689_v61 = vsub.f32 1.5, %v688_v2  ;;  %v654_v22 = vmul.f32 %v1958_v52, %v653_v3  ;;  %v1966_v3 = vld [vmem:[#allocation22_spill] sm:$0xff] }
 0x10c   :  { %v641_v56 = vsub.f32 1.5, %v640_v16  ;;  %v666_v18 = vmul.f32 %v1960_v13, %v665_v20  ;;  %v699_v29 = vmul.f32 %v1513_v21, %v698_v59  ;;  %v612_v7 = vsel %vm610_vm9, %v611_v46, %v609_v49 }
 0x10d   :  { %v647_v42 = vand.u32 2147483648, %v1408_v55  ;;  %v678_v4 = vmul.f32 %v1962_v26, %v677_v45  ;;  %1126 = vrsqrt.f32 %v1965_v34  ;;  %v624_v15 = vsel %vm622_vm10, %v623_v39, %v621_v47  ;;  %v1967_v45 = vld [vmem:[#allocation24_spill] sm:$0xff] }
 0x10e   :  { %vm644_vm13 = vcmp.eq.f32.partialorder %v1408_v55, inf  ;;  %vm656_vm14 = vcmp.eq.f32.partialorder %v1288_v43, inf  ;;  %vm658_vm15 = vcmp.eq.f32.partialorder %v1288_v43, 0.0  ;;  %v690_v52 = vmul.f32 %v1964_v36, %v689_v61 }
 0x10f   :  { %v642_v13 = vmul.f32 %v1125_v35, %v641_v56  ;;  %v659_v5 = vand.u32 2147483648, %v1288_v43  ;;  %vm668_vm0 = vcmp.eq.f32.partialorder %v1959_v31, inf  ;;  %v700_v46 = vmul.f32 0.5, %v699_v29 }
 0x110   :  { %v633_v26 = vsel %vm632_vm11, %v1376_v54, %v631_v53  ;;  %v655_v28 = vmul.f32 %v654_v22, %v1288_v43  ;;  %v667_v39 = vmul.f32 %v666_v18, %v1959_v31  ;;  %vm670_vm1 = vcmp.eq.f32.partialorder %v1959_v31, 0.0  ;;  %v1969_v18 = vld [vmem:[#allocation29_spill] sm:$0xff] }
 0x111   :  { %vm646_vm2 = vcmp.eq.f32.partialorder %v1408_v55, 0.0  ;;  %v671_v36 = vand.u32 2147483648, %v1959_v31  ;;  %v679_v35 = vmul.f32 %v678_v4, %v1961_v23  ;;  %vm680_vm3 = vcmp.eq.f32.partialorder %v1961_v23, inf }
 0x112   :  { %vm682_vm4 = vcmp.eq.f32.partialorder %v1961_v23, 0.0  ;;  %v683_v25 = vand.u32 2147483648, %v1961_v23  ;;  %v691_v58 = vmul.f32 %v690_v52, %v1963_v51  ;;  %vm692_vm5 = vcmp.eq.f32.partialorder %v1963_v51, inf }
 0x113   :  { %v701_v12 = vsub.f32 1.5, %v700_v46  ;;  %v1127_v48 = vpop.eup %1126  ;;  %v636_v1 = vsel %vm634_vm12, %v635_v50, %v633_v26  ;;  %v643_v9 = vmul.f32 %v642_v13, %v1408_v55  ;;  %vm694_vm6 = vcmp.eq.f32.partialorder %v1963_v51, 0.0  ;;  %v1968_v50 = vld [vmem:[#allocation27_spill] sm:$0xff]  ;;  %v1971_v26 = vld [vmem:[#allocation16_spill] sm:$0xff] }
 0x114   :  { %1128 = vrsqrt.f32 %v1966_v3  ;;  %v657_v20 = vsel %vm656_vm14, %v1288_v43, %v655_v28  ;;  %v669_v33 = vsel %vm668_vm0, %v1959_v31, %v667_v39  ;;  %v695_v49 = vand.u32 2147483648, %v1963_v51 }
 0x115   :  { %v715_v2 = vmul.f32 %v1127_v48, %v1965_v34  ;;  %v681_v54 = vsel %vm680_vm3, %v1961_v23, %v679_v35  ;;  %vm704_vm7 = vcmp.eq.f32.partialorder %v1417_v62, inf  ;;  %v707_v16 = vand.u32 2147483648, %v1417_v62 }
 0x116   :  { %1130 = vrsqrt.f32 %v1967_v45  ;;  %v693_v59 = vsel %vm692_vm5, %v1963_v51, %v691_v58  ;;  %v702_v47 = vmul.f32 %v1513_v21, %v701_v12  ;;  %v645_v61 = vsel %vm644_vm13, %v1408_v55, %v643_v9  ;;  %v1973_v58 = vld [vmem:[#allocation21_spill] sm:$0xff] }
 0x117   :  { %v716_v53 = vmul.f32 %v1127_v48, %v715_v2  ;;  %1132 = vrsqrt.f32 %v1968_v50  ;;  %v660_v56 = vsel %vm658_vm15, %v659_v5, %v657_v20  ;;  %v672_v22 = vsel %vm670_vm1, %v671_v36, %v669_v33  ;;  %v1970_v5 = vld [vmem:[#allocation12_spill] sm:$0xff] }
 0x118   :  { %1134 = vrsqrt.f32 %v1969_v18  ;;  %v684_v29 = vsel %vm682_vm4, %v683_v25, %v681_v54  ;;  %v1743_v21 = vsub.f32 %v1669_v44, %v660_v56  ;;  %v1745_v4 = vsub.f32 %v612_v7, %v672_v22  ;;  %v1972_v25 = vld [vmem:[#allocation14_spill] sm:$0xff] }
 0x119   :  { %v717_v52 = vmul.f32 0.5, %v716_v53  ;;  %v696_v46 = vsel %vm694_vm6, %v695_v49, %v693_v59  ;;  %v1749_v43 = vsub.f32 %v624_v15, %v684_v29  ;;  %v724_v31 = vand.u32 2147483648, %v1965_v34  ;;  %v1974_v59 = vld [vmem:[#allocation18_spill] sm:$0xff] }
 0x11a   :  { %v1129_v13 = vpop.eup %1128  ;;  %v775_v28 = vmul.f32 %v1971_v26, %v1970_v5  ;;  %v1756_v23 = vsel %vm646_vm2, %v647_v42, %v645_v61  ;;  %v703_v44 = vmul.f32 %v702_v47, %v1417_v62  ;;  %vm706_vm8 = vcmp.eq.f32.partialorder %v1417_v62, 0.0  ;;  %v1975_v47 = vld [vmem:[#allocation26_spill] sm:$0xff] }
 0x11b   :  { %v718_v7 = vsub.f32 1.5, %v717_v52  ;;  %v727_v39 = vmul.f32 %v1129_v13, %v1966_v3  ;;  %v1761_v36 = vsub.f32 %v636_v1, %v696_v46  ;;  %v736_v15 = vand.u32 2147483648, %v1966_v3 }
 0x11c   :  { %v1131_v51 = vpop.eup %1130  ;;  %v776_v35 = vmul.f32 %v1971_v26, %v775_v28  ;;  %v787_v12 = vmul.f32 %v1973_v58, %v1972_v25  ;;  %vm721_vm9 = vcmp.eq.f32.partialorder %v1965_v34, inf  ;;  %v799_v53 = vmul.f32 %v1975_v47, %v1974_v59 }
 0x11d   :  { %v1133_v55 = vpop.eup %1132  ;;  %v719_v42 = vmul.f32 %v1127_v48, %v718_v7  ;;  %v728_v9 = vmul.f32 %v1129_v13, %v727_v39  ;;  %v739_v20 = vmul.f32 %v1131_v51, %v1967_v45  ;;  %v705_v48 = vsel %vm704_vm7, %v1417_v62, %v703_v44 }
 0x11e   :  { %v1135_v49 = vpop.eup %1134  ;;  %v751_v1 = vmul.f32 %v1133_v55, %v1968_v50  ;;  %v777_v2 = vmul.f32 0.5, %v776_v35  ;;  %v788_v54 = vmul.f32 %v1973_v58, %v787_v12  ;;  %vm733_vm10 = vcmp.eq.f32.partialorder %v1966_v3, inf }
 0x11f   :  { %v729_v61 = vmul.f32 0.5, %v728_v9  ;;  %v740_v56 = vmul.f32 %v1131_v51, %v739_v20  ;;  %v763_v22 = vmul.f32 %v1135_v49, %v1969_v18  ;;  %vm745_vm11 = vcmp.eq.f32.partialorder %v1967_v45, inf }
 0x120   :  { %v752_v29 = vmul.f32 %v1133_v55, %v751_v1  ;;  %v778_v52 = vsub.f32 1.5, %v777_v2  ;;  %v789_v46 = vmul.f32 0.5, %v788_v54  ;;  %v800_v28 = vmul.f32 %v1975_v47, %v799_v53 }
 0x121   :  { %vm723_vm12 = vcmp.eq.f32.partialorder %v1965_v34, 0.0  ;;  %v730_v7 = vsub.f32 1.5, %v729_v61  ;;  %v741_v39 = vmul.f32 0.5, %v740_v56  ;;  %v760_v35 = vand.u32 2147483648, %v1968_v50 }
 0x122   :  { %v764_v44 = vmul.f32 %v1135_v49, %v763_v22  ;;  %v720_v12 = vmul.f32 %v719_v42, %v1965_v34  ;;  %vm735_vm13 = vcmp.eq.f32.partialorder %v1966_v3, 0.0  ;;  %v753_v9 = vmul.f32 0.5, %v752_v29 }
 0x123   :  { %v779_v20 = vmul.f32 %v1971_v26, %v778_v52  ;;  %v790_v33 = vsub.f32 1.5, %v789_v46  ;;  %v731_v1 = vmul.f32 %v1129_v13, %v730_v7  ;;  %v742_v2 = vsub.f32 1.5, %v741_v39 }
 0x124   :  { %vm747_vm14 = vcmp.eq.f32.partialorder %v1967_v45, 0.0  ;;  %v765_v54 = vmul.f32 0.5, %v764_v44  ;;  %v801_v53 = vmul.f32 0.5, %v800_v28  ;;  %v708_v61 = vsel %vm706_vm8, %v707_v16, %v705_v48 }
 0x125   :  { %v754_v56 = vsub.f32 1.5, %v753_v9  ;;  %vm757_vm15 = vcmp.eq.f32.partialorder %v1968_v50, inf  ;;  %v780_v42 = vmul.f32 %v779_v20, %v1970_v5  ;;  %v791_v22 = vmul.f32 %v1973_v58, %v790_v33 }
 0x126   :  { %v732_v26 = vmul.f32 %v731_v1, %v1966_v3  ;;  %v743_v13 = vmul.f32 %v1131_v51, %v742_v2  ;;  %v766_v29 = vsub.f32 1.5, %v765_v54  ;;  %v802_v52 = vsub.f32 1.5, %v801_v53 }
 0x127   :  { %v755_v46 = vmul.f32 %v1133_v55, %v754_v56  ;;  %vm781_vm0 = vcmp.eq.f32.partialorder %v1970_v5, inf  ;;  %vm783_vm1 = vcmp.eq.f32.partialorder %v1970_v5, 0.0  ;;  %v792_v62 = vmul.f32 %v791_v22, %v1972_v25 }
 0x128   :  { %v722_v16 = vsel %vm721_vm9, %v1965_v34, %v720_v12  ;;  %v744_v48 = vmul.f32 %v743_v13, %v1967_v45  ;;  %v784_v58 = vand.u32 2147483648, %v1970_v5  ;;  %vm793_vm2 = vcmp.eq.f32.partialorder %v1972_v25, inf }
 0x129   :  { %v734_v51 = vsel %vm733_vm10, %v1966_v3, %v732_v26  ;;  %v782_v55 = vsel %vm781_vm0, %v1970_v5, %v780_v42  ;;  %vm795_vm3 = vcmp.eq.f32.partialorder %v1972_v25, 0.0  ;;  %v803_v33 = vmul.f32 %v1975_v47, %v802_v52 }
 0x12a   :  { %v746_v28 = vsel %vm745_vm11, %v1967_v45, %v744_v48  ;;  %v756_v7 = vmul.f32 %v755_v46, %v1968_v50  ;;  %vm759_vm4 = vcmp.eq.f32.partialorder %v1968_v50, 0.0  ;;  %v767_v39 = vmul.f32 %v1135_v49, %v766_v29 }
 0x12b   :  { %vm769_vm5 = vcmp.eq.f32.partialorder %v1969_v18, inf  ;;  %v796_v44 = vand.u32 2147483648, %v1972_v25  ;;  %v725_v12 = vsel %vm723_vm12, %v724_v31, %v722_v16  ;;  %v794_v47 = vsel %vm793_vm2, %v1972_v25, %v792_v62 }
 0x12c   :  { %v804_v9 = vmul.f32 %v803_v33, %v1974_v59  ;;  %v811_v20 = vmul.f32 %v1508_v60, %v1439_v11  ;;  %v737_v49 = vsel %vm735_vm13, %v736_v15, %v734_v51  ;;  %v785_v1 = vsel %vm783_vm1, %v784_v58, %v782_v55 }
 0x12d   :  { %vm805_vm6 = vcmp.eq.f32.partialorder %v1974_v59, inf  ;;  %vm807_vm7 = vcmp.eq.f32.partialorder %v1974_v59, 0.0  ;;  %v1976_v34 = vand.u32 2147483648, %v1967_v45  ;;  %v808_v54 = vand.u32 2147483648, %v1974_v59 }
 0x12e   :  { %v806_v2 = vsel %vm805_vm6, %v1974_v59, %v804_v9  ;;  %v812_v53 = vmul.f32 %v1508_v60, %v811_v20  ;;  %v758_v3 = vsel %vm757_vm15, %v1968_v50, %v756_v7  ;;  %v768_v5 = vmul.f32 %v767_v39, %v1969_v18 }
 0x12f   :  { %v749_v31 = vsel %vm747_vm14, %v1976_v34, %v746_v28  ;;  %vm771_vm8 = vcmp.eq.f32.partialorder %v1969_v18, 0.0  ;;  %v797_v15 = vsel %vm795_vm3, %v796_v44, %v794_v47  ;;  %v823_v45 = vmul.f32 %v1525_v40, %v1445_v30 }
 0x130   :  { %v809_v56 = vsel %vm807_vm7, %v808_v54, %v806_v2  ;;  %v813_v42 = vmul.f32 0.5, %v812_v53  ;;  %v834_v22 = vsub.f32 %v725_v12, %v785_v1  ;;  %v835_v59 = vsub.f32 %v737_v49, %v797_v15 }
 0x131   :  { %v824_v26 = vmul.f32 %v1525_v40, %v823_v45  ;;  %v836_v13 = vsub.f32 %v749_v31, %v809_v56  ;;  %v839_v29 = vmul.f32 %v1743_v21, %v1743_v21  ;;  %v840_v52 = vmul.f32 %v1745_v4, %v1745_v4 }
 0x132   :  { %v713_v46 = vsub.f32 %v1756_v23, %v708_v61  ;;  %v772_v25 = vand.u32 2147483648, %v1969_v18  ;;  %v814_v62 = vsub.f32 1.5, %v813_v42  ;;  %v841_v16 = vmul.f32 %v1749_v43, %v1749_v43 }
 0x133   :  { %v825_v48 = vmul.f32 0.5, %v824_v26  ;;  %v844_v58 = vmul.f32 %v834_v22, %v834_v22  ;;  %v845_v51 = vmul.f32 %v835_v59, %v835_v59  ;;  %v846_v55 = vmul.f32 %v836_v13, %v836_v13 }
 0x134   :  { %v761_v21 = vsel %vm759_vm4, %v760_v35, %v758_v3  ;;  %v770_v4 = vsel %vm769_vm5, %v1969_v18, %v768_v5  ;;  %v815_v23 = vmul.f32 %v1508_v60, %v814_v62  ;;  %vm817_vm9 = vcmp.eq.f32.partialorder %v1439_v11, inf }
 0x135   :  { %v826_v61 = vsub.f32 1.5, %v825_v48  ;;  %v849_v33 = vadd.f32 %v844_v58, %v839_v29  ;;  %v850_v43 = vadd.f32 %v845_v51, %v840_v52  ;;  %v851_v28 = vadd.f32 %v846_v55, %v841_v16 }
 0x136   :  { %v816_v7 = vmul.f32 %v815_v23, %v1439_v11  ;;  %vm819_vm10 = vcmp.eq.f32.partialorder %v1439_v11, 0.0  ;;  %v820_v39 = vand.u32 2147483648, %v1439_v11  ;;  %v881_v50 = vlaneseq }
 0x137   :  { %v827_v35 = vmul.f32 %v1525_v40, %v826_v61  ;;  %v854_v44 = vsub.f32 %v849_v33, %v1630_v38  ;;  %v855_v12 = vsub.f32 %v850_v43, %v1637_v19  ;;  %v856_v60 = vsub.f32 %v851_v28, %v1648_v32 }
 0x138   :  { %v773_v47 = vsel %vm771_vm8, %v772_v25, %v770_v4  ;;  %v818_v9 = vsel %vm817_vm9, %v1439_v11, %v816_v7  ;;  %vm829_vm11 = vcmp.eq.f32.partialorder %v1445_v30, inf  ;;  %vm831_vm12 = vcmp.eq.f32.partialorder %v1445_v30, 0.0 }
 0x139   :  { %v821_v20 = vsel %vm819_vm10, %v820_v39, %v818_v9  ;;  %v828_v49 = vmul.f32 %v827_v35, %v1445_v30  ;;  %v873_v1 = vadd.f32 %v855_v12, %v854_v44  ;;  %v486_v40 = vadd.f32 %v1637_v19, %v1630_v38 }
 0x13a   :  { %v832_v34 = vand.u32 2147483648, %v1445_v30  ;;  %v837_v31 = vsub.f32 %v761_v21, %v821_v20  ;;  %v842_v18 = vmul.f32 %v1761_v36, %v1761_v36  ;;  %v490_v11 = vadd.f32 %v1328_v17, %v1304_v0 }
 0x13b   :  { %v830_v2 = vsel %vm829_vm11, %v1445_v30, %v828_v49  ;;  %v874_v54 = vadd.f32 %v873_v1, %v856_v60  ;;  %v882_v53 = vand.u32 127, %v881_v50  ;;  %v487_v3 = vadd.f32 %v486_v40, %v1648_v32 }
 0x13c   :  { %v833_v5 = vsel %vm831_vm12, %v832_v34, %v830_v2  ;;  %v847_v15 = vmul.f32 %v837_v31, %v837_v31  ;;  %v843_v56 = vmul.f32 %v713_v46, %v713_v46  ;;  %v491_v38 = vadd.f32 %v490_v11, %v1359_v37 }
 0x13d   :  { %v838_v45 = vsub.f32 %v773_v47, %v833_v5  ;;  %v488_v19 = vadd.f32 %v487_v3, %v1665_v24  ;;  %v481_v36 = vmul.f32 %v1659_v41, %v1659_v41  ;;  %vm883_vm13 = vcmp.eq.s32.totalorder %v882_v53, 0 }
 0x13e   :  { %v852_v42 = vadd.f32 %v847_v15, %v842_v18  ;;  %v492_v0 = vadd.f32 %v491_v38, %v1390_v6  ;;  %v482_v41 = vadd.f32 %v1449_v8, %v1441_v10 }
 0x13f   :  { %v848_v22 = vmul.f32 %v838_v45, %v838_v45  ;;  %v489_v46 = vadd.f32 %v488_v19, %v481_v36 }
 0x140   :  { %v857_v17 = vsub.f32 %v852_v42, %v1665_v24  ;;  %v493_v59 = vadd.f32 %v492_v0, %v1420_v14  ;;  %v483_v6 = vadd.f32 %v482_v41, %v1471_v27 }
 0x141   :  { %v853_v30 = vadd.f32 %v848_v22, %v843_v56 }
 0x142   :  { %v901_v32 = vpop.permute.xlu1 %900  ;;  %v875_v26 = vadd.f32 %v874_v54, %v857_v17  ;;  %v484_v24 = vadd.f32 %v483_v6, %v1476_v57 }
 0x143   :  { %v903_v13 = vsel %vm883_vm13, %v901_v32, 0.0  ;;  %v858_v37 = vsub.f32 %v853_v30, %v481_v36 }
 0x144   :  { %v904_v29 = vadd.f32 %v903_v13, %v493_v59  ;;  %v485_v62 = vadd.f32 %v484_v24, %v1479_v63 }
 0x145   :  { %v876_v52 = vadd.f32 %v875_v26, %v858_v37 }
 0x146   :  { %913 = vst [vmem:[#allocation8 + $0x10] sm:$0xff] %v904_v29 }
 0x147   :  { %893 = vperm.xlu0 %1014, %v876_v52  }
 0x160   :  { %v887_v25 = vpop.permute.xlu0 %886 }
 0x161   :  { %v889_v14 = vsel %vm883_vm13, %v887_v25, 0.0 }
 0x162   :  { %v890_v16 = vadd.f32 %v889_v14, %v485_v62 }
 0x164   :  { %907 = vst [vmem:[#allocation8] sm:$0xff] %v890_v16 }
 0x1b9   :  { %v894_v48 = vpop.permute.xlu0 %893 }
 0x1ba   :  { %v896_v58 = vsel %vm883_vm13, %v894_v48, 0.0 }
 0x1bb   :  { %v897_v10 = vadd.f32 %v896_v58, %v489_v46 }
 0x1bd   :  { %910 = vst [vmem:[#allocation8 + $0x8] sm:$0xff] %v897_v10 }
 0x1be   :  { %924 = dma.vmem_to_hbm [thread:$0]  %s920_s2, 384, %s922_s5, [#allocation4]  }
 0x1bf   :  { %1236 = dma.done.wait [#allocation4], 384  }
 0x1c0   :  { %1237 = vsyncadd [#allocation4], 4294966912 }
 0x1c1   :  { %929 = vsyncpa [#allocation3], 1 }
 0x1c2   :  { %930 = vsyncpa [#allocation6], 1 }
 0x1c3   :  { %931 = vsyncpa [#allocation4], 1 }

// kernel: tpu_custom_call.1
= control target key start
LH: loop header
LB: loop body
LE: loop exit
PB: predicated region body
PF: predicated region fallthrough
CT: control target
= control target key end

     0   :  { %8 = vsyncpa [#allocation3], 0  ;;  %s1907_s0 = inlined_call_operand.hbm [shape: bf16[40,64], index: 0, kind: input, shape index: {}]   ;;  %s1908_s1 = inlined_call_operand.hbm [shape: bf16[40,64], index: 1, kind: input, shape index: {}]   ;;  %s1909_s2 = inlined_call_operand.hbm [shape: bf16[64,256], index: 2, kind: input, shape index: {}]   ;;  %s1910_s3 = inlined_call_operand.hbm [shape: f32[8,384], index: 3, kind: output, shape index: {}]  }
   0x1   :  { %9 = vsyncpa [#allocation6], 0 }
   0x2   :  { %10 = vsyncpa [#allocation4], 0  ;;  %s36_s14 = sshll.u32 %s1908_s1, 4  ;;  %s1238_s15 = smov [#allocation5]   ;;  %s37_s14 = int_to_ptr.hbm [resolvable:$true] %s36_s14 }
   0x3   :  { %s38_s16 = sshll.u32 %s1238_s15, 4  ;;  %s19_s19 = sshll.u32 %s1907_s0, 4  ;;  %s39_s16 = int_to_ptr.vmem [resolvable:$true] %s38_s16  ;;  %s20_s19 = int_to_ptr.hbm [resolvable:$true] %s19_s19 }
   0x4   :  { %s1239_s20 = smov 64   ;;  %s1240_s21 = smov 4  }
   0x5   :  { %44 = dma.hbm_to_vmem [thread:$0]  %s37_s14, 320, %s39_s16, [#allocation6], %s1239_s20, %s1239_s20, %s1240_s21  }
   0x6   :  { %s1241_s22 = smov [#allocation2]   ;;  %s49_s26 = sshll.u32 %s1909_s2, 4  ;;  %s50_s26 = int_to_ptr.hbm [resolvable:$true] %s49_s26 }
   0x7   :  { %s21_s23 = sshll.u32 %s1241_s22, 4  ;;  %s1242_s1 = smov [#allocation7]   ;;  %s22_s23 = int_to_ptr.vmem [resolvable:$true] %s21_s23 }
   0x8   :  { %27 = dma.hbm_to_vmem [thread:$0]  %s20_s19, 320, %s22_s23, [#allocation3], %s1239_s20, %s1239_s20, %s1240_s21  }
   0x9   :  { %s51_s27 = sshll.u32 %s1242_s1, 4  ;;  %s1243_s28 = smov 128   ;;  %s52_s27 = int_to_ptr.vmem [resolvable:$true] %s51_s27 }
   0xa   :  { %s1244_s29 = smov 8  }
   0xb   :  { %57 = dma.hbm_to_vmem [thread:$0]  %s50_s26, 1024, %s52_s27, [#allocation6], %s1243_s28, %s1243_s28, %s1244_s29  }
   0xc   :  { %1232 = dma.done.wait [#allocation3], 320  }
   0xd   :  { %1233 = vsyncadd [#allocation3], 4294966976 }
   0xe   :  { %1234 = dma.done.wait [#allocation6], 1344  }
   0xf   :  { %1235 = vsyncadd [#allocation6], 4294965952  ;;  %v966_v0 = vld [vmem:[#allocation7 + $0x30] sm:$0xf]  ;;  %v999_v1 = vld [vmem:[#allocation7 + $0x34] sm:$0xf0] }
  0x10   :  { %v998_v2 = vld [vmem:[#allocation7 + $0x34] sm:$0xf]  ;;  %v967_v3 = vor.u32 %v999_v1, %v966_v0  ;;  %v968_v4 = vld [vmem:[#allocation7 + $0x38] sm:$0xf0]  ;;  %v958_v5 = vld [vmem:[#allocation7 + $0x20] sm:$0xf] }
  0x11   :  { %v997_v6 = vld [vmem:[#allocation7 + $0x24] sm:$0xf0]  ;;  %v971_v7 = vor.u32 %v998_v2, %v968_v4  ;;  %v996_v8 = vld [vmem:[#allocation7 + $0x24] sm:$0xf]  ;;  %v960_v9 = vld [vmem:[#allocation7 + $0x28] sm:$0xf0] }
  0x12   :  { %162 = vmatpush.bf16.msra.mxu0 %v967_v3  ;;  %235 = vmatpush.bf16.msra.mxu2 %v967_v3  ;;  %v959_v10 = vor.u32 %v997_v6, %v958_v5  ;;  %v963_v11 = vor.u32 %v996_v8, %v960_v9  ;;  %v950_v12 = vld [vmem:[#allocation7 + $0x10] sm:$0xf]  ;;  %v995_v13 = vld [vmem:[#allocation7 + $0x14] sm:$0xf0]  ;;  %v994_v14 = vld [vmem:[#allocation7 + $0x14] sm:$0xf] }
  0x13   :  { %185 = vmatpush.bf16.msra.mxu1 %v971_v7  ;;  %258 = vmatpush.bf16.msra.mxu3 %v971_v7  ;;  %v952_v15 = vld [vmem:[#allocation7 + $0x18] sm:$0xf0]  ;;  %v951_v16 = vor.u32 %v995_v13, %v950_v12  ;;  %v942_v18 = vld [vmem:[#allocation7] sm:$0xf]  ;;  %v993_v19 = vld [vmem:[#allocation7 + $0x4] sm:$0xf0] }
  0x14   :  { %v955_v17 = vor.u32 %v994_v14, %v952_v15  ;;  %v992_v20 = vld [vmem:[#allocation7 + $0x4] sm:$0xf]  ;;  %v944_v21 = vld [vmem:[#allocation7 + $0x8] sm:$0xf0]  ;;  %v943_v22 = vor.u32 %v993_v19, %v942_v18  ;;  %v1000_v24 = vld [vmem:[#allocation2] sm:$0xff]  ;;  %vm148_vm0 = vcmask 523264  }
  0x15   :  { %v947_v23 = vor.u32 %v992_v20, %v944_v21  ;;  %v1002_v25 = vld [vmem:[#allocation5] sm:$0xff]  ;;  %v1001_v26 = vld [vmem:[#allocation2 + $0x8] sm:$0xff]  ;;  %v1003_v27 = vld [vmem:[#allocation5 + $0x8] sm:$0xff]  ;;  %v1245_v56 = vmov 0   ;;  %s1246_s0 = smov [#allocation8]   ;;  %s921_s5 = sshll.u32 %s1910_s3, 4  ;;  %s922_s5 = int_to_ptr.hbm [resolvable:$true] %s921_s5 }
  0x16   :  { %163 = vmatpush.bf16.msra.mxu0 %v959_v10  ;;  %236 = vmatpush.bf16.msra.mxu2 %v959_v10  ;;  %v94_v28 = vld [vmem:[#allocation2 + $0x10] sm:$0xf]  ;;  %v208_v29 = vld [vmem:[#allocation5 + $0x10] sm:$0xf]  ;;  %s919_s2 = sshll.u32 %s1246_s0, 4  ;;  %s920_s2 = int_to_ptr.vmem [resolvable:$true] %s919_s2 }
  0x17   :  { %186 = vmatpush.bf16.msra.mxu1 %v963_v11  ;;  %259 = vmatpush.bf16.msra.mxu3 %v963_v11  ;;  %v104_v30 = vunpack.c.l.b16 %v94_v28  ;;  %v218_v31 = vunpack.c.l.b16 %v208_v29 }
  0x18   :  { %1015 = vset.pattern.permute.xlu1 %v1245_v56  ;;  %1014 = vset.pattern.permute.xlu0 %v1245_v56 }
  0x19   :  { %v107_v32 = vpack.c.b16 %v104_v30, %v104_v30  ;;  %v221_v33 = vpack.c.b16 %v218_v31, %v218_v31 }
  0x1a   :  { %164 = vmatpush.bf16.msra.mxu0 %v951_v16  ;;  %237 = vmatpush.bf16.msra.mxu2 %v951_v16 }
  0x1b   :  { %187 = vmatpush.bf16.msra.mxu1 %v955_v17  ;;  %260 = vmatpush.bf16.msra.mxu3 %v955_v17 }
  0x1e   :  { %165 = vmatpush.bf16.msra.mxu0 %v943_v22  ;;  %238 = vmatpush.bf16.msra.mxu2 %v943_v22 }
  0x1f   :  { %188 = vmatpush.bf16.msra.mxu1 %v947_v23  ;;  %261 = vmatpush.bf16.msra.mxu3 %v947_v23 }
  0x21   :  { %972 = vmatmul.msk.bf16.vlgmr.msra.gmra.mxu0 %vm148_vm0, %v1000_v24  ;;  %986 = vmatmul.msk.bf16.vlgmr.msra.gmra.mxu2 %vm148_vm0, %v1002_v25 }
  0x22   :  { %975 = vmatmul.msk.bf16.vlgmr.msra.gmra.mxu1 %vm148_vm0, %v1000_v24  ;;  %989 = vmatmul.msk.bf16.vlgmr.msra.gmra.mxu3 %vm148_vm0, %v1002_v25 }
  0x31   :  { %973 = vmatmul.msk.bf16.gmra.mxu0 %vm148_vm0, %v1001_v26  ;;  %987 = vmatmul.msk.bf16.gmra.mxu2 %vm148_vm0, %v1003_v27 }
  0x32   :  { %976 = vmatmul.msk.bf16.gmra.mxu1 %vm148_vm0, %v1001_v26  ;;  %990 = vmatmul.msk.bf16.gmra.mxu3 %vm148_vm0, %v1003_v27 }
  0x41   :  { %974 = vmatmul.msk.bf16.gmra.mxu0 %vm148_vm0, %v107_v32  ;;  %988 = vmatmul.msk.bf16.gmra.mxu2 %vm148_vm0, %v221_v33 }
  0x42   :  { %977 = vmatmul.msk.bf16.gmra.mxu1 %vm148_vm0, %v107_v32  ;;  %991 = vmatmul.msk.bf16.gmra.mxu3 %vm148_vm0, %v221_v33 }
  0x9e   :  { %v167_v34 = vpop.f32.mrf.mxu0 }
  0x9f   :  { %v190_v35 = vpop.f32.mrf.mxu1  ;;  %v277_v36 = vmul.f32 %v167_v34, %v167_v34 }
  0xa0   :  { %v282_v37 = vmul.f32 %v190_v35, %v190_v35 }
  0xa1   :  { %v1288_v43 = vmax.f32 %v277_v36, 1e-08 }
  0xa2   :  { %v287_v42 = vadd.f32 %v282_v37, %v277_v36  ;;  %v1290_v46 = vmax.f32 %v282_v37, 1e-08 }
  0xa3   :  { %1016 = vrsqrt.f32 %v1288_v43 }
  0xa4   :  { %v240_v38 = vpop.f32.mrf.mxu2  ;;  %1940 = vst [vmem:[#allocation12_spill] sm:$0xff] %v1290_v46  ;;  %v1292_v49 = vmax.f32 %v287_v42, 1e-08  ;;  %1018 = vrsqrt.f32 %v1290_v46 }
  0xa5   :  { %v263_v39 = vpop.f32.mrf.mxu3  ;;  %v297_v44 = vmul.f32 %v240_v38, %v240_v38  ;;  %1020 = vlog2.f32 %v1288_v43 }
  0xa6   :  { %v169_v40 = vpop.f32.mrf.mxu0  ;;  %v302_v45 = vmul.f32 %v263_v39, %v263_v39  ;;  %1022 = vrsqrt.f32 %v1292_v49  ;;  %vm359_vm1 = vcmp.eq.f32.partialorder %v1292_v49, inf  ;;  %vm361_vm2 = vcmp.eq.f32.partialorder %v1292_v49, 0.0 }
  0xa7   :  { %v192_v41 = vpop.f32.mrf.mxu1  ;;  %v278_v47 = vmul.f32 %v169_v40, %v169_v40  ;;  %v1296_v53 = vmax.f32 %v297_v44, 1e-08  ;;  %1024 = vlog2.f32 %v1292_v49 }
  0xa8   :  { %v283_v48 = vmul.f32 %v192_v41, %v192_v41  ;;  %v307_v51 = vadd.f32 %v302_v45, %v297_v44  ;;  %v1331_v21 = vmax.f32 %v302_v45, 1e-08 }
  0xa9   :  { %v1298_v57 = vmax.f32 %v278_v47, 1e-08  ;;  %1026 = vlog2.f32 %v1296_v53  ;;  %v1310_v2 = vpop.eup %1016 }
  0xaa   :  { %v288_v54 = vadd.f32 %v283_v48, %v278_v47  ;;  %v1302_v61 = vmax.f32 %v283_v48, 1e-08  ;;  %v1304_v0 = vmax.f32 %v307_v51, 1e-08  ;;  %1943 = vst [vmem:[#allocation15_spill] sm:$0xff] %v1310_v2  ;;  %v1313_v4 = vpop.eup %1018  ;;  %v859_v34 = vadd.f32 %v1331_v21, %v1296_v53 }
  0xab   :  { %1941 = vst [vmem:[#allocation13_spill] sm:$0xff] %v1298_v57  ;;  %1028 = vrsqrt.f32 %v1298_v57  ;;  %v1318_v8 = vpop.eup %1020 }
  0xac   :  { %v242_v50 = vpop.f32.mrf.mxu2  ;;  %1942 = vst [vmem:[#allocation14_spill] sm:$0xff] %v1302_v61  ;;  %v1307_v1 = vmax.f32 %v288_v54, 1e-08  ;;  %1030 = vrsqrt.f32 %v1302_v61  ;;  %v1323_v12 = vpop.eup %1022  ;;  %vm419_vm9 = vcmp.eq.f32.partialorder %v1304_v0, inf  ;;  %vm421_vm11 = vcmp.eq.f32.partialorder %v1304_v0, 0.0 }
  0xad   :  { %v265_v52 = vpop.f32.mrf.mxu3  ;;  %v298_v58 = vmul.f32 %v242_v50, %v242_v50  ;;  %1944 = vst [vmem:[#allocation16_spill] sm:$0xff] %v1313_v4  ;;  %1032 = vlog2.f32 %v1304_v0  ;;  %v1025_v16 = vpop.eup %1024  ;;  %v353_v35 = vmul.f32 %v1323_v12, %v1292_v49 }
  0xae   :  { %v172_v55 = vpop.f32.mrf.mxu0  ;;  %v303_v59 = vmul.f32 %v265_v52, %v265_v52  ;;  %1034 = vrsqrt.f32 %v1307_v1  ;;  %1947 = vst [vmem:[#allocation19_spill] sm:$0xff] %v1331_v21  ;;  %vm371_vm3 = vcmp.eq.f32.partialorder %v1307_v1, inf  ;;  %vm373_vm4 = vcmp.eq.f32.partialorder %v1307_v1, 0.0 }
  0xaf   :  { %v195_v60 = vpop.f32.mrf.mxu1  ;;  %v279_v62 = vmul.f32 %v172_v55, %v172_v55  ;;  %v1316_v5 = vmax.f32 %v298_v58, 1e-08  ;;  %1036 = vlog2.f32 %v1307_v1  ;;  %v1027_v20 = vpop.eup %1026 }
  0xb0   :  { %v284_v63 = vmul.f32 %v195_v60, %v195_v60  ;;  %v308_v3 = vadd.f32 %v303_v59, %v298_v58  ;;  %v1343_v27 = vmax.f32 %v303_v59, 1e-08 }
  0xb1   :  { %v1320_v9 = vmax.f32 %v279_v62, 1e-08  ;;  %1038 = vlog2.f32 %v1316_v5  ;;  %v1338_v24 = vpop.eup %1028 }
  0xb2   :  { %v289_v6 = vadd.f32 %v284_v63, %v279_v62  ;;  %v1326_v13 = vmax.f32 %v284_v63, 1e-08  ;;  %v1328_v17 = vmax.f32 %v308_v3, 1e-08  ;;  %1948 = vst [vmem:[#allocation20_spill] sm:$0xff] %v1338_v24  ;;  %v1341_v26 = vpop.eup %1030  ;;  %v860_v47 = vadd.f32 %v1343_v27, %v1316_v5 }
  0xb3   :  { %1945 = vst [vmem:[#allocation17_spill] sm:$0xff] %v1320_v9  ;;  %1040 = vrsqrt.f32 %v1320_v9  ;;  %v1033_v30 = vpop.eup %1032  ;;  %v864_v62 = vsub.f32 %v859_v34, %v1304_v0  ;;  %v354_v63 = vmul.f32 %v1323_v12, %v353_v35  ;;  %v515_v34 = vmul.f32 0.6931472, %v1027_v20 }
  0xb4   :  { %v245_v7 = vpop.f32.mrf.mxu2  ;;  %1946 = vst [vmem:[#allocation18_spill] sm:$0xff] %v1326_v13  ;;  %v1333_v22 = vmax.f32 %v289_v6, 1e-08  ;;  %1042 = vrsqrt.f32 %v1326_v13  ;;  %v1352_v32 = vpop.eup %1034  ;;  %vm431_vm13 = vcmp.eq.f32.partialorder %v1328_v17, inf  ;;  %vm433_vm14 = vcmp.eq.f32.partialorder %v1328_v17, 0.0 }
  0xb5   :  { %v299_v10 = vmul.f32 %v245_v7, %v245_v7  ;;  %v268_v11 = vpop.f32.mrf.mxu3  ;;  %1949 = vst [vmem:[#allocation21_spill] sm:$0xff] %v1341_v26  ;;  %1044 = vlog2.f32 %v1328_v17  ;;  %v1037_v36 = vpop.eup %1036 }
  0xb6   :  { %v304_v14 = vmul.f32 %v268_v11, %v268_v11  ;;  %v174_v15 = vpop.f32.mrf.mxu0  ;;  %1950 = vst [vmem:[#allocation22_spill] sm:$0xff] %v1343_v27  ;;  %1046 = vrsqrt.f32 %v1333_v22  ;;  %vm383_vm5 = vcmp.eq.f32.partialorder %v1333_v22, inf  ;;  %vm385_vm6 = vcmp.eq.f32.partialorder %v1333_v22, 0.0 }
  0xb7   :  { %v280_v18 = vmul.f32 %v174_v15, %v174_v15  ;;  %v197_v19 = vpop.f32.mrf.mxu1  ;;  %v1346_v28 = vmax.f32 %v299_v10, 1e-08  ;;  %1048 = vlog2.f32 %v1333_v22  ;;  %v1364_v41 = vpop.eup %1038  ;;  %v328_v15 = vmul.f32 0.6931472, %v1025_v16 }
  0xb8   :  { %v1335_v23 = vmul.f32 %v197_v19, %v197_v19  ;;  %v309_v25 = vadd.f32 %v304_v14, %v299_v10  ;;  %v1361_v38 = vmax.f32 %v304_v14, 1e-08  ;;  %v865_v10 = vsub.f32 %v860_v47, %v1328_v17 }
  0xb9   :  { %v1349_v31 = vmax.f32 %v280_v18, 1e-08  ;;  %1050 = vlog2.f32 %v1346_v28  ;;  %v1371_v48 = vpop.eup %1040  ;;  %v318_v14 = vmul.f32 0.6931472, %v1033_v30 }
  0xba   :  { %v290_v29 = vadd.f32 %v1335_v23, %v280_v18  ;;  %v1359_v37 = vmax.f32 %v309_v25, 1e-08  ;;  %1952 = vst [vmem:[#allocation24_spill] sm:$0xff] %v1361_v38  ;;  %v1374_v52 = vpop.eup %1042  ;;  %v861_v60 = vadd.f32 %v1361_v38, %v1346_v28  ;;  %v525_v18 = vmul.f32 0.6931472, %v1318_v8 }
  0xbb   :  { %1951 = vst [vmem:[#allocation23_spill] sm:$0xff] %v1349_v31  ;;  %1052 = vrsqrt.f32 %v1349_v31  ;;  %v1045_v59 = vpop.eup %1044  ;;  %v355_v8 = vmul.f32 0.5, %v354_v63 }
  0xbc   :  { %v247_v33 = vpop.f32.mrf.mxu2  ;;  %v1366_v42 = vmax.f32 %v290_v29, 1e-08  ;;  %1953 = vst [vmem:[#allocation25_spill] sm:$0xff] %v1371_v48  ;;  %1054 = vlog2.f32 %v1359_v37  ;;  %v1387_v3 = vpop.eup %1046  ;;  %v866_v16 = vsub.f32 %v861_v60, %v1359_v37  ;;  %v320_v47 = vmul.f32 0.6931472, %v1045_v59 }
  0xbd   :  { %v300_v39 = vmul.f32 %v247_v33, %v247_v33  ;;  %v270_v40 = vpop.f32.mrf.mxu3  ;;  %1954 = vst [vmem:[#allocation26_spill] sm:$0xff] %v1374_v52  ;;  %v1049_v11 = vpop.eup %1048  ;;  %v337_v52 = vsub.f32 %v318_v14, %v328_v15  ;;  %vm443_vm15 = vcmp.eq.f32.partialorder %v1359_v37, inf  ;;  %vm445_vm0 = vcmp.eq.f32.partialorder %v1359_v37, 0.0 }
  0xbe   :  { %v305_v44 = vmul.f32 %v270_v40, %v270_v40  ;;  %v177_v45 = vpop.f32.mrf.mxu0  ;;  %1056 = vrsqrt.f32 %v1366_v42  ;;  %vm395_vm7 = vcmp.eq.f32.partialorder %v1366_v42, inf  ;;  %vm397_vm8 = vcmp.eq.f32.partialorder %v1366_v42, 0.0 }
  0xbf   :  { %v281_v50 = vmul.f32 %v177_v45, %v177_v45  ;;  %v200_v51 = vpop.f32.mrf.mxu1  ;;  %v1376_v54 = vmax.f32 %v300_v39, 1e-08  ;;  %1058 = vlog2.f32 %v1366_v42  ;;  %v1396_v19 = vpop.eup %1050  ;;  %v877_v45 = vadd.f32 %v865_v10, %v864_v62 }
  0xc0   :  { %v310_v55 = vadd.f32 %v305_v44, %v300_v39  ;;  %v1378_v56 = vmax.f32 %v305_v44, 1e-08  ;;  %v1380_v58 = vmul.f32 %v200_v51, %v200_v51 }
  0xc1   :  { %1060 = vlog2.f32 %v1376_v54  ;;  %v1403_v35 = vpop.eup %1052  ;;  %v1417_v62 = vmax.f32 %v281_v50, 1e-08  ;;  %v878_v10 = vadd.f32 %v877_v45, %v866_v16 }
  0xc2   :  { %1955 = vst [vmem:[#allocation27_spill] sm:$0xff] %v1378_v56  ;;  %v1390_v6 = vmax.f32 %v310_v55, 1e-08  ;;  %v291_v7 = vadd.f32 %v1380_v58, %v281_v50  ;;  %v862_v33 = vadd.f32 %v1378_v56, %v1376_v54  ;;  %v1055_v51 = vpop.eup %1054  ;;  %v365_v50 = vmul.f32 %v1352_v32, %v1307_v1 }
  0xc3   :  { %1956 = vst [vmem:[#allocation28_spill] sm:$0xff] %v1403_v35 }
  0xc4   :  { %v1398_v25 = vmax.f32 %v291_v7, 1e-08  ;;  %v250_v29 = vpop.f32.mrf.mxu2  ;;  %1062 = vlog2.f32 %v1390_v6  ;;  %v330_v7 = vmul.f32 0.6931472, %v1037_v36  ;;  %v867_v63 = vsub.f32 %v862_v33, %v1390_v6 }
  0xc5   :  { %v301_v39 = vmul.f32 %v250_v29, %v250_v29  ;;  %v273_v30 = vpop.f32.mrf.mxu3  ;;  %v1411_v29 = vpop.eup %1056  ;;  %v534_v33 = vsub.f32 %v515_v34, %v525_v18 }
  0xc6   :  { %v306_v40 = vmul.f32 %v273_v30, %v273_v30  ;;  %v179_v44 = vpop.f32.mrf.mxu0  ;;  %1064 = vlog2.f32 %v1398_v25  ;;  %v1059_v59 = vpop.eup %1058  ;;  %v356_v30 = vsub.f32 1.5, %v355_v8  ;;  %v879_v45 = vadd.f32 %v878_v10, %v867_v63 }
  0xc7   :  { %v1408_v55 = vmax.f32 %v301_v39, 1e-08  ;;  %v202_v20 = vpop.f32.mrf.mxu1  ;;  %1066 = vlog2.f32 %v1298_v57  ;;  %v1061_v36 = vpop.eup %1060  ;;  %v1434_v63 = vand.u32 2147483647, %v534_v33  ;;  %vm407_vm10 = vcmp.eq.f32.partialorder %v1398_v25, inf }
  0xc8   :  { %v311_v60 = vadd.f32 %v306_v40, %v301_v39  ;;  %v1413_v26 = vmax.f32 %v306_v40, 1e-08  ;;  %1068 = vlog2.f32 %v1320_v9  ;;  %v338_v39 = vsub.f32 %v320_v47, %v330_v7 }
  0xc9   :  { %1070 = vlog2.f32 %v1408_v55  ;;  %v342_v20 = vand.u32 2147483647, %v337_v52  ;;  %v322_v47 = vmul.f32 0.6931472, %v1055_v51  ;;  %v332_v7 = vmul.f32 0.6931472, %v1049_v11 }
  0xca   :  { %1957 = vst [vmem:[#allocation29_spill] sm:$0xff] %v1413_v26  ;;  %v1420_v14 = vmax.f32 %v311_v60, 1e-08  ;;  %v863_v15 = vadd.f32 %v1413_v26, %v1408_v55  ;;  %1072 = vlog2.f32 %v1349_v31  ;;  %v1063_v40 = vpop.eup %1062  ;;  %v343_v18 = vand.u32 2147483647, %v338_v39 }
  0xcb   :  { %1074 = vlog2.f32 %v1417_v62  ;;  %v357_v34 = vmul.f32 %v1323_v12, %v356_v30  ;;  %v1439_v11 = vmax.f32 %v1335_v23, 1e-08  ;;  %v324_v51 = vmul.f32 0.6931472, %v1063_v40 }
  0xcc   :  { %v1065_v16 = vpop.eup %1064  ;;  %v252_v44 = vpop.f32.mrf.mxu2  ;;  %v868_v8 = vsub.f32 %v863_v15, %v1420_v14  ;;  %1076 = vlog2.f32 %v1420_v14  ;;  %v517_v15 = vmul.f32 0.6931472, %v1364_v41  ;;  %v1441_v10 = vmul.f32 0.5, %v342_v20 }
  0xcd   :  { %v1067_v60 = vpop.eup %1066  ;;  %v275_v4 = vpop.f32.mrf.mxu3  ;;  %1078 = vlog2.f32 %v1331_v21  ;;  %v1445_v30 = vmax.f32 %v1380_v58, 1e-08  ;;  %v339_v41 = vsub.f32 %v322_v47, %v332_v7  ;;  %v519_v39 = vmul.f32 0.6931472, %v1396_v19 }
  0xce   :  { %v1069_v35 = vpop.eup %1068  ;;  %v880_v31 = vadd.f32 %v879_v45, %v868_v8  ;;  %1080 = vlog2.f32 %v1343_v27  ;;  %v366_v4 = vmul.f32 %v1352_v32, %v365_v50  ;;  %v334_v50 = vmul.f32 0.6931472, %v1059_v59 }
  0xcf   :  { %v1071_v44 = vpop.eup %1070  ;;  %1082 = vlog2.f32 %v1361_v38  ;;  %v1449_v8 = vmul.f32 0.5, %v343_v18  ;;  %v1453_v23 = vmul.f32 %v357_v34, %v1292_v49  ;;  %v527_v40 = vmul.f32 0.6931472, %v1067_v60 }
  0xd0   :  { %v1073_v52 = vpop.eup %1072  ;;  %900 = vperm.xlu1 %1015, %v880_v31   ;;  %1084 = vlog2.f32 %v1378_v56  ;;  %v529_v45 = vmul.f32 0.6931472, %v1069_v35  ;;  %v1456_v58 = vmul.f32 0.5, %v366_v4  ;;  %v340_v19 = vsub.f32 %v324_v51, %v334_v50 }
  0xd1   :  { %v1075_v12 = vpop.eup %1074  ;;  %1086 = vlog2.f32 %v1413_v26  ;;  %v521_v47 = vmul.f32 0.6931472, %v1061_v36  ;;  %v377_v59 = vmul.f32 %v1387_v3, %v1333_v22  ;;  %v336_v18 = vmul.f32 0.6931472, %v1065_v16 }
  0xd2   :  { %v1077_v33 = vpop.eup %1076  ;;  %1088 = vlog2.f32 %v1290_v46  ;;  %v344_v46 = vand.u32 2147483647, %v339_v41  ;;  %v535_v34 = vsub.f32 %v517_v15, %v527_v40  ;;  %v523_v26 = vmul.f32 0.6931472, %v1071_v44 }
  0xd3   :  { %v1079_v31 = vpop.eup %1078  ;;  %1090 = vlog2.f32 %v1302_v61  ;;  %v326_v35 = vmul.f32 0.6931472, %v1077_v33  ;;  %v533_v61 = vmul.f32 0.6931472, %v1075_v12  ;;  %v531_v51 = vmul.f32 0.6931472, %v1073_v52 }
  0xd4   :  { %v1081_v20 = vpop.eup %1080  ;;  %1092 = vlog2.f32 %v1326_v13  ;;  %v536_v36 = vsub.f32 %v519_v39, %v529_v45  ;;  %v545_v50 = vmul.f32 0.6931472, %v1079_v31  ;;  %v368_v13 = vsub.f32 1.5, %v1456_v58 }
  0xd5   :  { %v1083_v7 = vpop.eup %1082  ;;  %1094 = vlog2.f32 %v1439_v11  ;;  %v345_v38 = vand.u32 2147483647, %v340_v19  ;;  %v547_v27 = vmul.f32 0.6931472, %v1081_v20  ;;  %v378_v16 = vmul.f32 %v1387_v3, %v377_v59 }
  0xd6   :  { %v1085_v60 = vpop.eup %1084  ;;  %1096 = vlog2.f32 %v1445_v30  ;;  %v389_v15 = vmul.f32 %v1411_v29, %v1366_v42  ;;  %v537_v33 = vsub.f32 %v521_v47, %v531_v51  ;;  %v540_v44 = vand.u32 2147483647, %v535_v34 }
  0xd7   :  { %v1087_v4 = vpop.eup %1086  ;;  %v549_v12 = vmul.f32 0.6931472, %v1083_v7  ;;  %v341_v48 = vsub.f32 %v326_v35, %v336_v18  ;;  %v538_v52 = vsub.f32 %v523_v26, %v533_v61  ;;  %v551_v39 = vmul.f32 0.6931472, %v1085_v60 }
  0xd8   :  { %v1089_v56 = vpop.eup %1088  ;;  %v541_v58 = vand.u32 2147483647, %v536_v36  ;;  %v553_v9 = vmul.f32 0.6931472, %v1087_v4  ;;  %v390_v2 = vmul.f32 %v1411_v29, %v389_v15  ;;  %1098 = vrsqrt.f32 %v1398_v25 }
  0xd9   :  { %v1091_v41 = vpop.eup %1090  ;;  %v555_v40 = vmul.f32 0.6931472, %v1089_v56  ;;  %v542_v47 = vand.u32 2147483647, %v537_v33  ;;  %v346_v18 = vand.u32 2147483647, %v341_v48  ;;  %v369_v48 = vmul.f32 %v1352_v32, %v368_v13 }
  0xda   :  { %v1093_v21 = vpop.eup %1092  ;;  %v557_v31 = vmul.f32 0.6931472, %v1091_v41  ;;  %v543_v61 = vand.u32 2147483647, %v538_v52  ;;  %v379_v51 = vmul.f32 0.5, %v378_v16  ;;  %v391_v15 = vmul.f32 0.5, %v390_v2 }
  0xdb   :  { %v1095_v45 = vpop.eup %1094  ;;  %v559_v19 = vmul.f32 0.6931472, %v1093_v21  ;;  %v564_v20 = vsub.f32 %v545_v50, %v555_v40  ;;  %1100 = vrsqrt.f32 %v1304_v0  ;;  %vm409_vm12 = vcmp.eq.f32.partialorder %v1398_v25, 0.0 }
  0xdc   :  { %v1097_v24 = vpop.eup %1096  ;;  %v561_v59 = vmul.f32 0.6931472, %v1095_v45  ;;  %v565_v57 = vsub.f32 %v547_v27, %v557_v31  ;;  %v1471_v27 = vmul.f32 0.5, %v344_v46  ;;  %v380_v52 = vsub.f32 1.5, %v379_v51 }
  0xdd   :  { %v563_v7 = vmul.f32 0.6931472, %v1097_v24  ;;  %v566_v56 = vsub.f32 %v549_v12, %v559_v19  ;;  %v569_v34 = vand.u32 2147483647, %v564_v20  ;;  %v392_v31 = vsub.f32 1.5, %v391_v15 }
  0xde   :  { %v567_v26 = vsub.f32 %v551_v39, %v561_v59  ;;  %v570_v60 = vand.u32 2147483647, %v565_v57  ;;  %v1474_v12 = vpop.eup %1098  ;;  %v1476_v57 = vmul.f32 0.5, %v345_v38  ;;  %1102 = vrsqrt.f32 %v1439_v11 }
  0xdf   :  { %v568_v35 = vsub.f32 %v553_v9, %v563_v7  ;;  %v571_v21 = vand.u32 2147483647, %v566_v56  ;;  %v574_v4 = vadd.f32 %v569_v34, %v1434_v63  ;;  %v1479_v63 = vmul.f32 0.5, %v346_v18 }
  0xe0   :  { %v572_v36 = vand.u32 2147483647, %v567_v26  ;;  %v575_v50 = vadd.f32 %v570_v60, %v540_v44  ;;  %v401_v38 = vmul.f32 %v1474_v12, %v1398_v25  ;;  %1104 = vrsqrt.f32 %v1417_v62 }
  0xe1   :  { %v573_v41 = vand.u32 2147483647, %v568_v35  ;;  %v576_v24 = vadd.f32 %v571_v21, %v541_v58  ;;  %v579_v33 = vmul.f32 0.5, %v574_v4  ;;  %v362_v19 = vand.u32 2147483648, %v1292_v49  ;;  %v1101_v7 = vpop.eup %1100 }
  0xe2   :  { %v577_v40 = vadd.f32 %v572_v36, %v542_v47  ;;  %v580_v9 = vmul.f32 0.5, %v575_v50  ;;  %v360_v20 = vsel %vm359_vm1, %v1292_v49, %v1453_v23  ;;  %v370_v59 = vmul.f32 %v369_v48, %v1307_v1 }
  0xe3   :  { %v578_v46 = vadd.f32 %v573_v41, %v543_v61  ;;  %v581_v16 = vmul.f32 0.5, %v576_v24  ;;  %v584_v2 = vsub.f32 %v579_v33, %v1441_v10  ;;  %v381_v47 = vmul.f32 %v1387_v3, %v380_v52 }
  0xe4   :  { %v582_v44 = vmul.f32 0.5, %v577_v40  ;;  %v585_v39 = vsub.f32 %v580_v9, %v1449_v8  ;;  %1106 = vrsqrt.f32 %v1328_v17  ;;  %v393_v18 = vmul.f32 %v1411_v29, %v392_v31  ;;  %v1508_v60 = vpop.eup %1102 }
  0xe5   :  { %v583_v13 = vmul.f32 0.5, %v578_v46  ;;  %v586_v32 = vsub.f32 %v581_v16, %v1471_v27  ;;  %1108 = vrsqrt.f32 %v1359_v37  ;;  %v402_v23 = vmul.f32 %v1474_v12, %v401_v38 }
  0xe6   :  { %v587_v45 = vsub.f32 %v582_v44, %v1476_v57  ;;  %v869_v58 = vadd.f32 %v585_v39, %v584_v2  ;;  %1110 = vrsqrt.f32 %v1445_v30  ;;  %v413_v61 = vmul.f32 %v1101_v7, %v1304_v0  ;;  %v1513_v21 = vpop.eup %1104 }
  0xe7   :  { %v588_v56 = vsub.f32 %v583_v13, %v1479_v63  ;;  %v1504_v3 = vsel %vm361_vm2, %v362_v19, %v360_v20  ;;  %1112 = vrsqrt.f32 %v1390_v6  ;;  %v372_v29 = vsel %vm371_vm3, %v1307_v1, %v370_v59 }
  0xe8   :  { %v870_v34 = vadd.f32 %v869_v58, %v586_v32  ;;  %v382_v35 = vmul.f32 %v381_v47, %v1333_v22  ;;  %v414_v49 = vmul.f32 %v1101_v7, %v413_v61  ;;  %v374_v51 = vand.u32 2147483648, %v1307_v1 }
  0xe9   :  { %v394_v36 = vmul.f32 %v393_v18, %v1366_v42  ;;  %1114 = vrsqrt.f32 %v1420_v14  ;;  %v403_v15 = vmul.f32 0.5, %v402_v23  ;;  %v386_v48 = vand.u32 2147483648, %v1333_v22 }
  0xea   :  { %v871_v26 = vadd.f32 %v870_v34, %v587_v45  ;;  %v1107_v50 = vpop.eup %1106  ;;  %v415_v41 = vmul.f32 0.5, %v414_v49  ;;  %1116 = vrsqrt.f32 %v1296_v53  ;;  %v1520_v33 = vsel %vm373_vm4, %v374_v51, %v372_v29 }
  0xeb   :  { %v1109_v24 = vpop.eup %1108  ;;  %v425_v1 = vmul.f32 %v1107_v50, %v1328_v17  ;;  %v384_v9 = vsel %vm383_vm5, %v1333_v22, %v382_v35  ;;  %1118 = vrsqrt.f32 %v1316_v5  ;;  %v396_v52 = vsel %vm395_vm7, %v1366_v42, %v394_v36 }
  0xec   :  { %v872_v4 = vadd.f32 %v871_v26, %v588_v56  ;;  %v1525_v40 = vpop.eup %1110  ;;  %v437_v46 = vmul.f32 %v1109_v24, %v1359_v37  ;;  %v416_v44 = vsub.f32 1.5, %v415_v41  ;;  %v404_v39 = vsub.f32 1.5, %v403_v15 }
  0xed   :  { %v1113_v16 = vpop.eup %1112  ;;  %v426_v2 = vmul.f32 %v1107_v50, %v425_v1  ;;  %1120 = vrsqrt.f32 %v1346_v28  ;;  %v1537_v38 = vsel %vm385_vm6, %v386_v48, %v384_v9  ;;  %v398_v45 = vand.u32 2147483648, %v1366_v42 }
  0xee   :  { %886 = vperm.xlu0 %1014, %v872_v4   ;;  %v438_v31 = vmul.f32 %v1109_v24, %v437_v46  ;;  %v449_v13 = vmul.f32 %v1113_v16, %v1390_v6  ;;  %v410_v58 = vand.u32 2147483648, %v1398_v25  ;;  %v417_v22 = vmul.f32 %v1101_v7, %v416_v44 }
  0xef   :  { %v1115_v32 = vpop.eup %1114  ;;  %v427_v19 = vmul.f32 0.5, %v426_v2  ;;  %v1547_v34 = vsel %vm397_vm8, %v398_v45, %v396_v52  ;;  %v405_v26 = vmul.f32 %v1474_v12, %v404_v39  ;;  %1122 = vrsqrt.f32 %v1376_v54 }
  0xf0   :  { %v1541_v20 = vpop.eup %1116  ;;  %v439_v59 = vmul.f32 0.5, %v438_v31  ;;  %v450_v47 = vmul.f32 %v1113_v16, %v449_v13  ;;  %v461_v56 = vmul.f32 %v1115_v32, %v1420_v14  ;;  %v418_v12 = vmul.f32 %v417_v22, %v1304_v0 }
  0xf1   :  { %v428_v18 = vsub.f32 1.5, %v427_v19  ;;  %v590_v23 = vmul.f32 %v1541_v20, %v1296_v53  ;;  %v1552_v61 = vpop.eup %1118  ;;  %v422_v48 = vand.u32 2147483648, %v1304_v0  ;;  %v406_v1 = vmul.f32 %v405_v26, %v1398_v25 }
  0xf2   :  { %v440_v29 = vsub.f32 1.5, %v439_v59  ;;  %v451_v35 = vmul.f32 0.5, %v450_v47  ;;  %v462_v49 = vmul.f32 %v1115_v32, %v461_v56  ;;  %v602_v51 = vmul.f32 %v1552_v61, %v1316_v5 }
  0xf3   :  { %v429_v4 = vmul.f32 %v1107_v50, %v428_v18  ;;  %v591_v42 = vmul.f32 %v1541_v20, %v590_v23  ;;  %v1559_v7 = vpop.eup %1120  ;;  %v434_v39 = vand.u32 2147483648, %v1328_v17  ;;  %v420_v13 = vsel %vm419_vm9, %v1304_v0, %v418_v12 }
  0xf4   :  { %v441_v36 = vmul.f32 %v1109_v24, %v440_v29  ;;  %v452_v15 = vsub.f32 1.5, %v451_v35  ;;  %v463_v41 = vmul.f32 0.5, %v462_v49  ;;  %v614_v50 = vmul.f32 %v1559_v7, %v1346_v28 }
  0xf5   :  { %v430_v9 = vmul.f32 %v429_v4, %v1328_v17  ;;  %v603_v24 = vmul.f32 %v1552_v61, %v602_v51  ;;  %v592_v2 = vmul.f32 0.5, %v591_v42  ;;  %v446_v45 = vand.u32 2147483648, %v1359_v37 }
  0xf6   :  { %v464_v46 = vsub.f32 1.5, %v463_v41  ;;  %v442_v52 = vmul.f32 %v441_v36, %v1359_v37  ;;  %v453_v44 = vmul.f32 %v1113_v16, %v452_v15  ;;  %v615_v31 = vmul.f32 %v1559_v7, %v614_v50  ;;  %v1583_v16 = vpop.eup %1122 }
  0xf7   :  { %vm455_vm1 = vcmp.eq.f32.partialorder %v1390_v6, inf  ;;  %vm457_vm2 = vcmp.eq.f32.partialorder %v1390_v6, 0.0  ;;  %v408_v19 = vsel %vm407_vm10, %v1398_v25, %v406_v1  ;;  %v432_v59 = vsel %vm431_vm13, %v1328_v17, %v430_v9 }
  0xf8   :  { %v465_v47 = vmul.f32 %v1115_v32, %v464_v46  ;;  %v604_v56 = vmul.f32 0.5, %v603_v24  ;;  %v444_v22 = vsel %vm443_vm15, %v1359_v37, %v442_v52  ;;  %v454_v18 = vmul.f32 %v453_v44, %v1390_v6  ;;  %v1958_v52 = vld [vmem:[#allocation15_spill] sm:$0xff] }
  0xf9   :  { %v458_v23 = vand.u32 2147483648, %v1390_v6  ;;  %v593_v26 = vsub.f32 1.5, %v592_v2  ;;  %v423_v29 = vsel %vm421_vm11, %v422_v48, %v420_v13  ;;  %vm467_vm3 = vcmp.eq.f32.partialorder %v1420_v14, inf  ;;  %v1960_v13 = vld [vmem:[#allocation20_spill] sm:$0xff] }
  0xfa   :  { %vm469_vm4 = vcmp.eq.f32.partialorder %v1420_v14, 0.0  ;;  %v616_v35 = vmul.f32 0.5, %v615_v31  ;;  %v411_v49 = vsel %vm409_vm12, %v410_v58, %v408_v19  ;;  %v435_v32 = vsel %vm433_vm14, %v434_v39, %v432_v59  ;;  %v1959_v31 = vld [vmem:[#allocation13_spill] sm:$0xff] }
  0xfb   :  { %v470_v4 = vand.u32 2147483648, %v1420_v14  ;;  %v626_v42 = vmul.f32 %v1583_v16, %v1376_v54  ;;  %v447_v51 = vsel %vm445_vm0, %v446_v45, %v444_v22  ;;  %v466_v36 = vmul.f32 %v465_v47, %v1420_v14 }
  0xfc   :  { %vm596_vm5 = vcmp.eq.f32.partialorder %v1296_v53, inf  ;;  %v605_v15 = vsub.f32 1.5, %v604_v56  ;;  %v456_v25 = vsel %vm455_vm1, %v1390_v6, %v454_v18  ;;  %v472_v58 = vsub.f32 %v423_v29, %v1504_v3 }
  0xfd   :  { %v594_v41 = vmul.f32 %v1541_v20, %v593_v26  ;;  %v627_v12 = vmul.f32 %v1583_v16, %v626_v42  ;;  %v473_v48 = vsub.f32 %v435_v32, %v1520_v33  ;;  %v599_v50 = vand.u32 2147483648, %v1296_v53  ;;  %v1962_v26 = vld [vmem:[#allocation25_spill] sm:$0xff] }
  0xfe   :  { %v617_v1 = vsub.f32 1.5, %v616_v35  ;;  %1124 = vrsqrt.f32 %v1408_v55  ;;  %v474_v9 = vsub.f32 %v447_v51, %v1537_v38  ;;  %vm598_vm6 = vcmp.eq.f32.partialorder %v1296_v53, 0.0  ;;  %v1963_v51 = vld [vmem:[#allocation23_spill] sm:$0xff] }
  0xff   :  { %vm608_vm7 = vcmp.eq.f32.partialorder %v1316_v5, inf  ;;  %v611_v46 = vand.u32 2147483648, %v1316_v5  ;;  %v628_v3 = vmul.f32 0.5, %v627_v12  ;;  %v459_v20 = vsel %vm457_vm2, %v458_v23, %v456_v25  ;;  %v1961_v23 = vld [vmem:[#allocation17_spill] sm:$0xff] }
 0x100   :  { %v468_v33 = vsel %vm467_vm3, %v1420_v14, %v466_v36  ;;  %v606_v24 = vmul.f32 %v1552_v61, %v605_v15  ;;  %v650_v44 = vmul.f32 %v1958_v52, %v1288_v43  ;;  %v1630_v38 = vmul.f32 %v472_v58, %v472_v58  ;;  %v1964_v36 = vld [vmem:[#allocation28_spill] sm:$0xff] }
 0x101   :  { %v595_v2 = vmul.f32 %v594_v41, %v1296_v53  ;;  %vm620_vm8 = vcmp.eq.f32.partialorder %v1346_v28, inf  ;;  %v623_v39 = vand.u32 2147483648, %v1346_v28  ;;  %v662_v45 = vmul.f32 %v1960_v13, %v1959_v31 }
 0x102   :  { %v1637_v19 = vmul.f32 %v473_v48, %v473_v48  ;;  %v618_v59 = vmul.f32 %v1559_v7, %v617_v1  ;;  %v629_v47 = vsub.f32 1.5, %v628_v3  ;;  %v651_v61 = vmul.f32 %v1958_v52, %v650_v44 }
 0x103   :  { %v471_v56 = vsel %vm469_vm4, %v470_v4, %v468_v33  ;;  %v475_v22 = vsub.f32 %v459_v20, %v1547_v34  ;;  %vm610_vm9 = vcmp.eq.f32.partialorder %v1316_v5, 0.0  ;;  %v663_v18 = vmul.f32 %v1960_v13, %v662_v45 }
 0x104   :  { %v674_v29 = vmul.f32 %v1962_v26, %v1961_v23  ;;  %v1125_v35 = vpop.eup %1124  ;;  %v1648_v32 = vmul.f32 %v474_v9, %v474_v9  ;;  %v607_v7 = vmul.f32 %v606_v24, %v1316_v5  ;;  %vm622_vm10 = vcmp.eq.f32.partialorder %v1346_v28, 0.0 }
 0x105   :  { %v652_v42 = vmul.f32 0.5, %v651_v61  ;;  %v686_v4 = vmul.f32 %v1964_v36, %v1963_v51  ;;  %v597_v34 = vsel %vm596_vm5, %v1296_v53, %v595_v2  ;;  %v638_v15 = vmul.f32 %v1125_v35, %v1408_v55 }
 0x106   :  { %v664_v25 = vmul.f32 0.5, %v663_v18  ;;  %v675_v58 = vmul.f32 %v1962_v26, %v674_v29  ;;  %v1659_v41 = vsub.f32 %v471_v56, %v411_v49  ;;  %v619_v12 = vmul.f32 %v618_v59, %v1346_v28 }
 0x107   :  { %v630_v48 = vmul.f32 %v1583_v16, %v629_v47  ;;  %vm632_vm11 = vcmp.eq.f32.partialorder %v1376_v54, inf  ;;  %v687_v1 = vmul.f32 %v1964_v36, %v686_v4  ;;  %v639_v9 = vmul.f32 %v1125_v35, %v638_v15 }
 0x108   :  { %v653_v3 = vsub.f32 1.5, %v652_v42  ;;  %v665_v20 = vsub.f32 1.5, %v664_v25  ;;  %v676_v33 = vmul.f32 0.5, %v675_v58  ;;  %v1665_v24 = vmul.f32 %v475_v22, %v475_v22 }
 0x109   :  { %v1669_v44 = vsel %vm598_vm6, %v599_v50, %v597_v34  ;;  %v609_v49 = vsel %vm608_vm7, %v1316_v5, %v607_v7  ;;  %v688_v2 = vmul.f32 0.5, %v687_v1  ;;  %vm634_vm12 = vcmp.eq.f32.partialorder %v1376_v54, 0.0  ;;  %v1965_v34 = vld [vmem:[#allocation19_spill] sm:$0xff] }
 0x10a   :  { %v640_v16 = vmul.f32 0.5, %v639_v9  ;;  %v677_v45 = vsub.f32 1.5, %v676_v33  ;;  %v698_v59 = vmul.f32 %v1513_v21, %v1417_v62  ;;  %v621_v47 = vsel %vm620_vm8, %v1346_v28, %v619_v12 }
 0x10b   :  { %v631_v53 = vmul.f32 %v630_v48, %v1376_v54  ;;  %v635_v50 = vand.u32 2147483648, %v1376_v54  ;;  %v689_v61 = vsub.f32 1.5, %v688_v2  ;;  %v654_v22 = vmul.f32 %v1958_v52, %v653_v3  ;;  %v1966_v3 = vld [vmem:[#allocation22_spill] sm:$0xff] }
 0x10c   :  { %v641_v56 = vsub.f32 1.5, %v640_v16  ;;  %v666_v18 = vmul.f32 %v1960_v13, %v665_v20  ;;  %v699_v29 = vmul.f32 %v1513_v21, %v698_v59  ;;  %v612_v7 = vsel %vm610_vm9, %v611_v46, %v609_v49 }
 0x10d   :  { %v647_v42 = vand.u32 2147483648, %v1408_v55  ;;  %v678_v4 = vmul.f32 %v1962_v26, %v677_v45  ;;  %1126 = vrsqrt.f32 %v1965_v34  ;;  %v624_v15 = vsel %vm622_vm10, %v623_v39, %v621_v47  ;;  %v1967_v45 = vld [vmem:[#allocation24_spill] sm:$0xff] }
 0x10e   :  { %vm644_vm13 = vcmp.eq.f32.partialorder %v1408_v55, inf  ;;  %vm656_vm14 = vcmp.eq.f32.partialorder %v1288_v43, inf  ;;  %vm658_vm15 = vcmp.eq.f32.partialorder %v1288_v43, 0.0  ;;  %v690_v52 = vmul.f32 %v1964_v36, %v689_v61 }
 0x10f   :  { %v642_v13 = vmul.f32 %v1125_v35, %v641_v56  ;;  %v659_v5 = vand.u32 2147483648, %v1288_v43  ;;  %vm668_vm0 = vcmp.eq.f32.partialorder %v1959_v31, inf  ;;  %v700_v46 = vmul.f32 0.5, %v699_v29 }
 0x110   :  { %v633_v26 = vsel %vm632_vm11, %v1376_v54, %v631_v53  ;;  %v655_v28 = vmul.f32 %v654_v22, %v1288_v43  ;;  %v667_v39 = vmul.f32 %v666_v18, %v1959_v31  ;;  %vm670_vm1 = vcmp.eq.f32.partialorder %v1959_v31, 0.0  ;;  %v1969_v18 = vld [vmem:[#allocation29_spill] sm:$0xff] }
 0x111   :  { %vm646_vm2 = vcmp.eq.f32.partialorder %v1408_v55, 0.0  ;;  %v671_v36 = vand.u32 2147483648, %v1959_v31  ;;  %v679_v35 = vmul.f32 %v678_v4, %v1961_v23  ;;  %vm680_vm3 = vcmp.eq.f32.partialorder %v1961_v23, inf }
 0x112   :  { %vm682_vm4 = vcmp.eq.f32.partialorder %v1961_v23, 0.0  ;;  %v683_v25 = vand.u32 2147483648, %v1961_v23  ;;  %v691_v58 = vmul.f32 %v690_v52, %v1963_v51  ;;  %vm692_vm5 = vcmp.eq.f32.partialorder %v1963_v51, inf }
 0x113   :  { %v701_v12 = vsub.f32 1.5, %v700_v46  ;;  %v1127_v48 = vpop.eup %1126  ;;  %v636_v1 = vsel %vm634_vm12, %v635_v50, %v633_v26  ;;  %v643_v9 = vmul.f32 %v642_v13, %v1408_v55  ;;  %vm694_vm6 = vcmp.eq.f32.partialorder %v1963_v51, 0.0  ;;  %v1968_v50 = vld [vmem:[#allocation27_spill] sm:$0xff]  ;;  %v1971_v26 = vld [vmem:[#allocation16_spill] sm:$0xff] }
 0x114   :  { %1128 = vrsqrt.f32 %v1966_v3  ;;  %v657_v20 = vsel %vm656_vm14, %v1288_v43, %v655_v28  ;;  %v669_v33 = vsel %vm668_vm0, %v1959_v31, %v667_v39  ;;  %v695_v49 = vand.u32 2147483648, %v1963_v51 }
 0x115   :  { %v715_v2 = vmul.f32 %v1127_v48, %v1965_v34  ;;  %v681_v54 = vsel %vm680_vm3, %v1961_v23, %v679_v35  ;;  %vm704_vm7 = vcmp.eq.f32.partialorder %v1417_v62, inf  ;;  %v707_v16 = vand.u32 2147483648, %v1417_v62 }
 0x116   :  { %1130 = vrsqrt.f32 %v1967_v45  ;;  %v693_v59 = vsel %vm692_vm5, %v1963_v51, %v691_v58  ;;  %v702_v47 = vmul.f32 %v1513_v21, %v701_v12  ;;  %v645_v61 = vsel %vm644_vm13, %v1408_v55, %v643_v9  ;;  %v1973_v58 = vld [vmem:[#allocation21_spill] sm:$0xff] }
 0x117   :  { %v716_v53 = vmul.f32 %v1127_v48, %v715_v2  ;;  %1132 = vrsqrt.f32 %v1968_v50  ;;  %v660_v56 = vsel %vm658_vm15, %v659_v5, %v657_v20  ;;  %v672_v22 = vsel %vm670_vm1, %v671_v36, %v669_v33  ;;  %v1970_v5 = vld [vmem:[#allocation12_spill] sm:$0xff] }
 0x118   :  { %1134 = vrsqrt.f32 %v1969_v18  ;;  %v684_v29 = vsel %vm682_vm4, %v683_v25, %v681_v54  ;;  %v1743_v21 = vsub.f32 %v1669_v44, %v660_v56  ;;  %v1745_v4 = vsub.f32 %v612_v7, %v672_v22  ;;  %v1972_v25 = vld [vmem:[#allocation14_spill] sm:$0xff] }
 0x119   :  { %v717_v52 = vmul.f32 0.5, %v716_v53  ;;  %v696_v46 = vsel %vm694_vm6, %v695_v49, %v693_v59  ;;  %v1749_v43 = vsub.f32 %v624_v15, %v684_v29  ;;  %v724_v31 = vand.u32 2147483648, %v1965_v34  ;;  %v1974_v59 = vld [vmem:[#allocation18_spill] sm:$0xff] }
 0x11a   :  { %v1129_v13 = vpop.eup %1128  ;;  %v775_v28 = vmul.f32 %v1971_v26, %v1970_v5  ;;  %v1756_v23 = vsel %vm646_vm2, %v647_v42, %v645_v61  ;;  %v703_v44 = vmul.f32 %v702_v47, %v1417_v62  ;;  %vm706_vm8 = vcmp.eq.f32.partialorder %v1417_v62, 0.0  ;;  %v1975_v47 = vld [vmem:[#allocation26_spill] sm:$0xff] }
 0x11b   :  { %v718_v7 = vsub.f32 1.5, %v717_v52  ;;  %v727_v39 = vmul.f32 %v1129_v13, %v1966_v3  ;;  %v1761_v36 = vsub.f32 %v636_v1, %v696_v46  ;;  %v736_v15 = vand.u32 2147483648, %v1966_v3 }
 0x11c   :  { %v1131_v51 = vpop.eup %1130  ;;  %v776_v35 = vmul.f32 %v1971_v26, %v775_v28  ;;  %v787_v12 = vmul.f32 %v1973_v58, %v1972_v25  ;;  %vm721_vm9 = vcmp.eq.f32.partialorder %v1965_v34, inf  ;;  %v799_v53 = vmul.f32 %v1975_v47, %v1974_v59 }
 0x11d   :  { %v1133_v55 = vpop.eup %1132  ;;  %v719_v42 = vmul.f32 %v1127_v48, %v718_v7  ;;  %v728_v9 = vmul.f32 %v1129_v13, %v727_v39  ;;  %v739_v20 = vmul.f32 %v1131_v51, %v1967_v45  ;;  %v705_v48 = vsel %vm704_vm7, %v1417_v62, %v703_v44 }
 0x11e   :  { %v1135_v49 = vpop.eup %1134  ;;  %v751_v1 = vmul.f32 %v1133_v55, %v1968_v50  ;;  %v777_v2 = vmul.f32 0.5, %v776_v35  ;;  %v788_v54 = vmul.f32 %v1973_v58, %v787_v12  ;;  %vm733_vm10 = vcmp.eq.f32.partialorder %v1966_v3, inf }
 0x11f   :  { %v729_v61 = vmul.f32 0.5, %v728_v9  ;;  %v740_v56 = vmul.f32 %v1131_v51, %v739_v20  ;;  %v763_v22 = vmul.f32 %v1135_v49, %v1969_v18  ;;  %vm745_vm11 = vcmp.eq.f32.partialorder %v1967_v45, inf }
 0x120   :  { %v752_v29 = vmul.f32 %v1133_v55, %v751_v1  ;;  %v778_v52 = vsub.f32 1.5, %v777_v2  ;;  %v789_v46 = vmul.f32 0.5, %v788_v54  ;;  %v800_v28 = vmul.f32 %v1975_v47, %v799_v53 }
 0x121   :  { %vm723_vm12 = vcmp.eq.f32.partialorder %v1965_v34, 0.0  ;;  %v730_v7 = vsub.f32 1.5, %v729_v61  ;;  %v741_v39 = vmul.f32 0.5, %v740_v56  ;;  %v760_v35 = vand.u32 2147483648, %v1968_v50 }
 0x122   :  { %v764_v44 = vmul.f32 %v1135_v49, %v763_v22  ;;  %v720_v12 = vmul.f32 %v719_v42, %v1965_v34  ;;  %vm735_vm13 = vcmp.eq.f32.partialorder %v1966_v3, 0.0  ;;  %v753_v9 = vmul.f32 0.5, %v752_v29 }
 0x123   :  { %v779_v20 = vmul.f32 %v1971_v26, %v778_v52  ;;  %v790_v33 = vsub.f32 1.5, %v789_v46  ;;  %v731_v1 = vmul.f32 %v1129_v13, %v730_v7  ;;  %v742_v2 = vsub.f32 1.5, %v741_v39 }
 0x124   :  { %vm747_vm14 = vcmp.eq.f32.partialorder %v1967_v45, 0.0  ;;  %v765_v54 = vmul.f32 0.5, %v764_v44  ;;  %v801_v53 = vmul.f32 0.5, %v800_v28  ;;  %v708_v61 = vsel %vm706_vm8, %v707_v16, %v705_v48 }
 0x125   :  { %v754_v56 = vsub.f32 1.5, %v753_v9  ;;  %vm757_vm15 = vcmp.eq.f32.partialorder %v1968_v50, inf  ;;  %v780_v42 = vmul.f32 %v779_v20, %v1970_v5  ;;  %v791_v22 = vmul.f32 %v1973_v58, %v790_v33 }
 0x126   :  { %v732_v26 = vmul.f32 %v731_v1, %v1966_v3  ;;  %v743_v13 = vmul.f32 %v1131_v51, %v742_v2  ;;  %v766_v29 = vsub.f32 1.5, %v765_v54  ;;  %v802_v52 = vsub.f32 1.5, %v801_v53 }
 0x127   :  { %v755_v46 = vmul.f32 %v1133_v55, %v754_v56  ;;  %vm781_vm0 = vcmp.eq.f32.partialorder %v1970_v5, inf  ;;  %vm783_vm1 = vcmp.eq.f32.partialorder %v1970_v5, 0.0  ;;  %v792_v62 = vmul.f32 %v791_v22, %v1972_v25 }
 0x128   :  { %v722_v16 = vsel %vm721_vm9, %v1965_v34, %v720_v12  ;;  %v744_v48 = vmul.f32 %v743_v13, %v1967_v45  ;;  %v784_v58 = vand.u32 2147483648, %v1970_v5  ;;  %vm793_vm2 = vcmp.eq.f32.partialorder %v1972_v25, inf }
 0x129   :  { %v734_v51 = vsel %vm733_vm10, %v1966_v3, %v732_v26  ;;  %v782_v55 = vsel %vm781_vm0, %v1970_v5, %v780_v42  ;;  %vm795_vm3 = vcmp.eq.f32.partialorder %v1972_v25, 0.0  ;;  %v803_v33 = vmul.f32 %v1975_v47, %v802_v52 }
 0x12a   :  { %v746_v28 = vsel %vm745_vm11, %v1967_v45, %v744_v48  ;;  %v756_v7 = vmul.f32 %v755_v46, %v1968_v50  ;;  %vm759_vm4 = vcmp.eq.f32.partialorder %v1968_v50, 0.0  ;;  %v767_v39 = vmul.f32 %v1135_v49, %v766_v29 }
 0x12b   :  { %vm769_vm5 = vcmp.eq.f32.partialorder %v1969_v18, inf  ;;  %v796_v44 = vand.u32 2147483648, %v1972_v25  ;;  %v725_v12 = vsel %vm723_vm12, %v724_v31, %v722_v16  ;;  %v794_v47 = vsel %vm793_vm2, %v1972_v25, %v792_v62 }
 0x12c   :  { %v804_v9 = vmul.f32 %v803_v33, %v1974_v59  ;;  %v811_v20 = vmul.f32 %v1508_v60, %v1439_v11  ;;  %v737_v49 = vsel %vm735_vm13, %v736_v15, %v734_v51  ;;  %v785_v1 = vsel %vm783_vm1, %v784_v58, %v782_v55 }
 0x12d   :  { %vm805_vm6 = vcmp.eq.f32.partialorder %v1974_v59, inf  ;;  %vm807_vm7 = vcmp.eq.f32.partialorder %v1974_v59, 0.0  ;;  %v1976_v34 = vand.u32 2147483648, %v1967_v45  ;;  %v808_v54 = vand.u32 2147483648, %v1974_v59 }
 0x12e   :  { %v806_v2 = vsel %vm805_vm6, %v1974_v59, %v804_v9  ;;  %v812_v53 = vmul.f32 %v1508_v60, %v811_v20  ;;  %v758_v3 = vsel %vm757_vm15, %v1968_v50, %v756_v7  ;;  %v768_v5 = vmul.f32 %v767_v39, %v1969_v18 }
 0x12f   :  { %v749_v31 = vsel %vm747_vm14, %v1976_v34, %v746_v28  ;;  %vm771_vm8 = vcmp.eq.f32.partialorder %v1969_v18, 0.0  ;;  %v797_v15 = vsel %vm795_vm3, %v796_v44, %v794_v47  ;;  %v823_v45 = vmul.f32 %v1525_v40, %v1445_v30 }
 0x130   :  { %v809_v56 = vsel %vm807_vm7, %v808_v54, %v806_v2  ;;  %v813_v42 = vmul.f32 0.5, %v812_v53  ;;  %v834_v22 = vsub.f32 %v725_v12, %v785_v1  ;;  %v835_v59 = vsub.f32 %v737_v49, %v797_v15 }
 0x131   :  { %v824_v26 = vmul.f32 %v1525_v40, %v823_v45  ;;  %v836_v13 = vsub.f32 %v749_v31, %v809_v56  ;;  %v839_v29 = vmul.f32 %v1743_v21, %v1743_v21  ;;  %v840_v52 = vmul.f32 %v1745_v4, %v1745_v4 }
 0x132   :  { %v713_v46 = vsub.f32 %v1756_v23, %v708_v61  ;;  %v772_v25 = vand.u32 2147483648, %v1969_v18  ;;  %v814_v62 = vsub.f32 1.5, %v813_v42  ;;  %v841_v16 = vmul.f32 %v1749_v43, %v1749_v43 }
 0x133   :  { %v825_v48 = vmul.f32 0.5, %v824_v26  ;;  %v844_v58 = vmul.f32 %v834_v22, %v834_v22  ;;  %v845_v51 = vmul.f32 %v835_v59, %v835_v59  ;;  %v846_v55 = vmul.f32 %v836_v13, %v836_v13 }
 0x134   :  { %v761_v21 = vsel %vm759_vm4, %v760_v35, %v758_v3  ;;  %v770_v4 = vsel %vm769_vm5, %v1969_v18, %v768_v5  ;;  %v815_v23 = vmul.f32 %v1508_v60, %v814_v62  ;;  %vm817_vm9 = vcmp.eq.f32.partialorder %v1439_v11, inf }
 0x135   :  { %v826_v61 = vsub.f32 1.5, %v825_v48  ;;  %v849_v33 = vadd.f32 %v844_v58, %v839_v29  ;;  %v850_v43 = vadd.f32 %v845_v51, %v840_v52  ;;  %v851_v28 = vadd.f32 %v846_v55, %v841_v16 }
 0x136   :  { %v816_v7 = vmul.f32 %v815_v23, %v1439_v11  ;;  %vm819_vm10 = vcmp.eq.f32.partialorder %v1439_v11, 0.0  ;;  %v820_v39 = vand.u32 2147483648, %v1439_v11  ;;  %v881_v50 = vlaneseq }
 0x137   :  { %v827_v35 = vmul.f32 %v1525_v40, %v826_v61  ;;  %v854_v44 = vsub.f32 %v849_v33, %v1630_v38  ;;  %v855_v12 = vsub.f32 %v850_v43, %v1637_v19  ;;  %v856_v60 = vsub.f32 %v851_v28, %v1648_v32 }
 0x138   :  { %v773_v47 = vsel %vm771_vm8, %v772_v25, %v770_v4  ;;  %v818_v9 = vsel %vm817_vm9, %v1439_v11, %v816_v7  ;;  %vm829_vm11 = vcmp.eq.f32.partialorder %v1445_v30, inf  ;;  %vm831_vm12 = vcmp.eq.f32.partialorder %v1445_v30, 0.0 }
 0x139   :  { %v821_v20 = vsel %vm819_vm10, %v820_v39, %v818_v9  ;;  %v828_v49 = vmul.f32 %v827_v35, %v1445_v30  ;;  %v873_v1 = vadd.f32 %v855_v12, %v854_v44  ;;  %v486_v40 = vadd.f32 %v1637_v19, %v1630_v38 }
 0x13a   :  { %v832_v34 = vand.u32 2147483648, %v1445_v30  ;;  %v837_v31 = vsub.f32 %v761_v21, %v821_v20  ;;  %v842_v18 = vmul.f32 %v1761_v36, %v1761_v36  ;;  %v490_v11 = vadd.f32 %v1328_v17, %v1304_v0 }
 0x13b   :  { %v830_v2 = vsel %vm829_vm11, %v1445_v30, %v828_v49  ;;  %v874_v54 = vadd.f32 %v873_v1, %v856_v60  ;;  %v882_v53 = vand.u32 127, %v881_v50  ;;  %v487_v3 = vadd.f32 %v486_v40, %v1648_v32 }
 0x13c   :  { %v833_v5 = vsel %vm831_vm12, %v832_v34, %v830_v2  ;;  %v847_v15 = vmul.f32 %v837_v31, %v837_v31  ;;  %v843_v56 = vmul.f32 %v713_v46, %v713_v46  ;;  %v491_v38 = vadd.f32 %v490_v11, %v1359_v37 }
 0x13d   :  { %v838_v45 = vsub.f32 %v773_v47, %v833_v5  ;;  %v488_v19 = vadd.f32 %v487_v3, %v1665_v24  ;;  %v481_v36 = vmul.f32 %v1659_v41, %v1659_v41  ;;  %vm883_vm13 = vcmp.eq.s32.totalorder %v882_v53, 0 }
 0x13e   :  { %v852_v42 = vadd.f32 %v847_v15, %v842_v18  ;;  %v492_v0 = vadd.f32 %v491_v38, %v1390_v6  ;;  %v482_v41 = vadd.f32 %v1449_v8, %v1441_v10 }
 0x13f   :  { %v848_v22 = vmul.f32 %v838_v45, %v838_v45  ;;  %v489_v46 = vadd.f32 %v488_v19, %v481_v36 }
 0x140   :  { %v857_v17 = vsub.f32 %v852_v42, %v1665_v24  ;;  %v493_v59 = vadd.f32 %v492_v0, %v1420_v14  ;;  %v483_v6 = vadd.f32 %v482_v41, %v1471_v27 }
 0x141   :  { %v853_v30 = vadd.f32 %v848_v22, %v843_v56 }
 0x142   :  { %v901_v32 = vpop.permute.xlu1 %900  ;;  %v875_v26 = vadd.f32 %v874_v54, %v857_v17  ;;  %v484_v24 = vadd.f32 %v483_v6, %v1476_v57 }
 0x143   :  { %v903_v13 = vsel %vm883_vm13, %v901_v32, 0.0  ;;  %v858_v37 = vsub.f32 %v853_v30, %v481_v36 }
 0x144   :  { %v904_v29 = vadd.f32 %v903_v13, %v493_v59  ;;  %v485_v62 = vadd.f32 %v484_v24, %v1479_v63 }
 0x145   :  { %v876_v52 = vadd.f32 %v875_v26, %v858_v37 }
 0x146   :  { %913 = vst [vmem:[#allocation8 + $0x10] sm:$0xff] %v904_v29 }
 0x147   :  { %893 = vperm.xlu0 %1014, %v876_v52  }
 0x160   :  { %v887_v25 = vpop.permute.xlu0 %886 }
 0x161   :  { %v889_v14 = vsel %vm883_vm13, %v887_v25, 0.0 }
 0x162   :  { %v890_v16 = vadd.f32 %v889_v14, %v485_v62 }
 0x164   :  { %907 = vst [vmem:[#allocation8] sm:$0xff] %v890_v16 }
 0x1b9   :  { %v894_v48 = vpop.permute.xlu0 %893 }
 0x1ba   :  { %v896_v58 = vsel %vm883_vm13, %v894_v48, 0.0 }
 0x1bb   :  { %v897_v10 = vadd.f32 %v896_v58, %v489_v46 }
 0x1bd   :  { %910 = vst [vmem:[#allocation8 + $0x8] sm:$0xff] %v897_v10 }
 0x1be   :  { %924 = dma.vmem_to_hbm [thread:$0]  %s920_s2, 384, %s922_s5, [#allocation4]  }
 0x1bf   :  { %1236 = dma.done.wait [#allocation4], 384  }
 0x1c0   :  { %1237 = vsyncadd [#allocation4], 4294966912 }
 0x1c1   :  { %929 = vsyncpa [#allocation3], 1 }
 0x1c2   :  { %930 = vsyncpa [#allocation6], 1 }
 0x1c3   :  { %931 = vsyncpa [#allocation4], 1 }

</bundles_post_ra>
